<compile_context>
chip_gen: v7x
topology: tpu7x:2x2x1
jax: 0.10.0
libtpu: 0.0.40
codegen_flags: <defaults>
</compile_context>

<pallas_src>
import functools

import jax
import jax.numpy as jnp
import numpy as np
from jax.experimental import pallas as pl
from jax.experimental.pallas import tpu as pltpu


# ----------------------------------------------------------------------------
# Hardware-aware sizing helpers
# ----------------------------------------------------------------------------
def _round_up(n, m):
    return -(-n // m) * m


def _largest_divisor(n, cap):
    cap = min(n, cap)
    for d in range(cap, 0, -1):
        if n % d == 0:
            return d
    return n


@functools.lru_cache(maxsize=None)
def _vmem_budget():
    """Scoped-VMEM budget: ~3/4 of physical, capped at 96 MiB.
    v5e/v6e (128 MiB physical) -> 96 MiB; v7x (64 MiB) -> 48 MiB."""
    cap = 64 * 1024 * 1024
    try:
        info = pltpu.get_tpu_info()
        cap = int(getattr(info, "vmem_capacity_bytes", cap) or cap)
    except Exception:   # no TPU info available at trace time: stay conservative
        pass
    return min(cap * 3 // 4, 96 * 1024 * 1024)


def _pick_row_cap(fin, fout, budget, lo=128, hi=2048):
    """Largest row tile such that double-buffered in/out tiles plus the
    resident weights stay within ~half the scoped VMEM budget."""
    weight_bytes = (fin * fout + fout) * 4
    per_row_bytes = 2 * (fin + fout) * 4
    cap = (budget // 2 - weight_bytes) // max(per_row_bytes, 1)
    return int(max(lo, min(hi, cap)))


def _row_tiling(n, cap):
    """Row tiling with padding: the block is a multiple of 8 (so the (8,128)
    BlockSpec rule always holds) and n is padded up to block * nblocks."""
    cap = max(8, min(cap, _round_up(n, 8)))
    nblocks = pl.cdiv(n, cap)
    bn = _round_up(pl.cdiv(n, nblocks), 8)
    return bn, bn * nblocks, nblocks


def _row_block_divisor(n, cap):
    """Largest row block that divides n and is a multiple of 8; fall back to
    the full n (always legal: block dim == full array dim)."""
    for bn in range(min(n, max(cap, 8)), 7, -1):
        if n % bn == 0 and bn % 8 == 0:
            return bn
    return n


def _default_time_chunk(t, b, hp):
    # Bound the static unroll so the per-step (B, 4*Hp) gates tile does not
    # exhaust the 64-vreg file at large B*H (review: vreg pressure).
    cap = 8 if b * hp >= 32 * 256 else 16
    # TODO(synk): for prime T this degrades to 1; pad/mask the time axis
    # (state must be held, not updated, on padded steps) to lift that.
    return _largest_divisor(t, cap)


# ----------------------------------------------------------------------------
# Row-tiled projection kernels (MXU, f32 accumulation; operands may be bf16)
# ----------------------------------------------------------------------------
def _linear_kernel(x_ref, w_ref, b_ref, o_ref):
    o_ref[...] = (
        jnp.dot(x_ref[...].astype(w_ref.dtype), w_ref[...],
                preferred_element_type=jnp.float32)
        + b_ref[...])


def _emb_kernel(hf_ref, hb_ref, wa_ref, wb_ref, be_ref, o_ref):
    # y = h_fwd @ Wa + h_bwd @ Wb + b  (concat-free "emb")
    o_ref[...] = (
        jnp.dot(hf_ref[...].astype(wa_ref.dtype), wa_ref[...],
                preferred_element_type=jnp.float32)
        + jnp.dot(hb_ref[...].astype(wb_ref.dtype), wb_ref[...],
                  preferred_element_type=jnp.float32)
        + be_ref[...])


def _emb_proj_kernel(hf_ref, hb_ref, wa_ref, wb_ref, be_ref,
                     w2_ref, b2_ref, o_ref):
    # Fused layer-N emb + layer-(N+1) input projection: the (rows, E)
    # intermediate y never leaves VMEM.
    y = (jnp.dot(hf_ref[...].astype(wa_ref.dtype), wa_ref[...],
                 preferred_element_type=jnp.float32)
         + jnp.dot(hb_ref[...].astype(wb_ref.dtype), wb_ref[...],
                   preferred_element_type=jnp.float32)
         + be_ref[...])
    o_ref[...] = (
        jnp.dot(y.astype(w2_ref.dtype), w2_ref[...],
                preferred_element_type=jnp.float32)
        + b2_ref[...])


def linear(x2d, w, b, *, row_cap=None):
    """x2d: (N, Fin); w: (Fin, Fout); b: (1, Fout) -> (N, Fout), row-tiled."""
    n, fin = x2d.shape
    fout = w.shape[1]
    if row_cap is None:
        row_cap = _pick_row_cap(fin, fout, _vmem_budget())
    bn, n_pad, nblocks = _row_tiling(n, row_cap)
    if n_pad != n:
        x2d = jnp.pad(x2d, ((0, n_pad - n), (0, 0)))
    out = pl.pallas_call(
        _linear_kernel,
        out_shape=jax.ShapeDtypeStruct((n_pad, fout), jnp.float32),
        grid_spec=pltpu.PrefetchScalarGridSpec(
            num_scalar_prefetch=0,
            grid=(nblocks,),
            in_specs=[
                pl.BlockSpec((bn, fin), lambda i: (i, 0)),
                pl.BlockSpec((fin, fout), lambda i: (0, 0)),
                pl.BlockSpec((1, fout), lambda i: (0, 0)),
            ],
            out_specs=pl.BlockSpec((bn, fout), lambda i: (i, 0)),
        ),
        compiler_params=pltpu.CompilerParams(
            dimension_semantics=("parallel",),
            vmem_limit_bytes=_vmem_budget()),
    )(x2d, w, b)
    return out[:n] if n_pad != n else out


def _h_in_specs(bn, hp):
    # h2d (2, N, Hp) is passed twice; the two specs pick dir-0 / dir-1 blocks.
    return [pl.BlockSpec((None, bn, hp), lambda i: (0, i, 0)),
            pl.BlockSpec((None, bn, hp), lambda i: (1, i, 0))]


def emb(h2d, wa, wb, be, *, row_cap=None):
    """h2d: (2, N, Hp) -> (N, out):  h_fwd @ Wa + h_bwd @ Wb + b."""
    _, n, hp = h2d.shape
    e = wa.shape[1]
    if row_cap is None:
        row_cap = _pick_row_cap(2 * hp, e, _vmem_budget())
    bn = _row_block_divisor(n, row_cap)
    # TODO(synk): if out_features < 128 this emits masked lane stores; pad the
    # emb weight columns to 128 and slice outside for fully lane-dense vst.
    return pl.pallas_call(
        _emb_kernel,
        out_shape=jax.ShapeDtypeStruct((n, e), jnp.float32),
        grid_spec=pltpu.PrefetchScalarGridSpec(
            num_scalar_prefetch=0,
            grid=(n // bn,),
            in_specs=_h_in_specs(bn, hp) + [
                pl.BlockSpec((hp, e), lambda i: (0, 0)),
                pl.BlockSpec((hp, e), lambda i: (0, 0)),
                pl.BlockSpec((1, e), lambda i: (0, 0)),
            ],
            out_specs=pl.BlockSpec((bn, e), lambda i: (i, 0)),
        ),
        compiler_params=pltpu.CompilerParams(
            dimension_semantics=("parallel",),
            vmem_limit_bytes=_vmem_budget()),
    )(h2d, h2d, wa, wb, be)


def emb_then_project(h2d, wa, wb, be, w2, b2, *, row_cap=None):
    """Fused layer-N emb + layer-(N+1) input projection.
    h2d: (2, N, Hp) -> (N, 8*Hp_next) pre-gates; y stays in VMEM."""
    _, n, hp = h2d.shape
    e = wa.shape[1]
    g2 = w2.shape[1]
    if row_cap is None:
        row_cap = _pick_row_cap(2 * hp + e, e + g2, _vmem_budget())
    bn = _row_block_divisor(n, row_cap)
    return pl.pallas_call(
        _emb_proj_kernel,
        out_shape=jax.ShapeDtypeStruct((n, g2), jnp.float32),
        grid_spec=pltpu.PrefetchScalarGridSpec(
            num_scalar_prefetch=0,
            grid=(n // bn,),
            in_specs=_h_in_specs(bn, hp) + [
                pl.BlockSpec((hp, e), lambda i: (0, 0)),
                pl.BlockSpec((hp, e), lambda i: (0, 0)),
                pl.BlockSpec((1, e), lambda i: (0, 0)),
                pl.BlockSpec((e, g2), lambda i: (0, 0)),
                pl.BlockSpec((1, g2), lambda i: (0, 0)),
            ],
            out_specs=pl.BlockSpec((bn, g2), lambda i: (i, 0)),
        ),
        compiler_params=pltpu.CompilerParams(
            dimension_semantics=("parallel",),
            vmem_limit_bytes=_vmem_budget()),
    )(h2d, h2d, wa, wb, be, w2, b2)


# ----------------------------------------------------------------------------
# Direction-parallel bidirectional LSTM recurrence (time-chunked)
# ----------------------------------------------------------------------------
def _bilstm_dir_kernel(pg_ref, whh_ref, h_out_ref, h_scr, c_scr):
    """One (direction, time-chunk) grid step.

    grid = (2, num_chunks), dimension_semantics = ("parallel", "arbitrary"):
    on v7x each TensorCore owns one direction; on 1-TC chips the two
    directions run back to back. h/c live in per-core scratch across chunks
    and are carried in registers inside the statically-unrolled chunk.
    """
    @pl.when(pl.program_id(1) == 0)
    def _init():
        h_scr[...] = jnp.zeros_like(h_scr)
        c_scr[...] = jnp.zeros_like(c_scr)

    d = pl.program_id(0)
    tc = pg_ref.shape[0]
    hp = h_scr.shape[1]
    whh = whh_ref[...]                       # (Hp, 4*Hp), f32 or bf16

    def run_chunk(step_order):
        h = h_scr[...]
        c = c_scr[...]
        for s in step_order:                 # static unroll, static indices
            # pre-gates already hold x_t @ W_ih + b_ih + b_hh (hoisted).
            gates = pg_ref[s] + jnp.dot(h.astype(whh.dtype), whh,
                                        preferred_element_type=jnp.float32)
            # Hp is a multiple of 128 -> every gate slice is lane-aligned.
            i_g = jax.nn.sigmoid(gates[:, 0 * hp:1 * hp])
            f_g = jax.nn.sigmoid(gates[:, 1 * hp:2 * hp])
            g_g = jnp.tanh(gates[:, 2 * hp:3 * hp])
            o_g = jax.nn.sigmoid(gates[:, 3 * hp:4 * hp])
            c = f_g * c + i_g * g_g
            h = o_g * jnp.tanh(c)
            h_out_ref[s] = h
        h_scr[...] = h
        c_scr[...] = c

    # Forward core walks its chunk 0..tc-1; backward core walks tc-1..0 of its
    # (block-reversed) chunk, i.e. global time T-1..0.
    @pl.when(d == 0)
    def _fwd():
        run_chunk(range(tc))

    @pl.when(d == 1)
    def _bwd():
        run_chunk(range(tc - 1, -1, -1))


def bilstm_recurrence(pre_gates, whh_stack, *, time_chunk=None):
    """pre_gates: (T, B, 8*Hp), cols [0:4Hp] forward / [4Hp:8Hp] backward.
    whh_stack:  (2, Hp, 4*Hp).
    Returns h: (2, T, B, Hp) — dir 0 = forward, dir 1 = backward, both in
    natural time order."""
    t, b, g8 = pre_gates.shape
    hp = whh_stack.shape[1]
    assert g8 == 8 * hp and hp % 128 == 0, "hidden dim must be lane-padded"

    if time_chunk is None:
        time_chunk = _default_time_chunk(t, b, hp)
    assert t % time_chunk == 0
    nc = t // time_chunk

    def t_blk(d, c):                         # chunk c for fwd, nc-1-c for bwd
        return d * (nc - 1) + (1 - 2 * d) * c

    return pl.pallas_call(
        _bilstm_dir_kernel,
        out_shape=jax.ShapeDtypeStruct((2, t, b, hp), jnp.float32),
        grid_spec=pltpu.PrefetchScalarGridSpec(
            num_scalar_prefetch=0,
            grid=(2, nc),
            in_specs=[
                # per-direction pre-gates: time chunk (reversed for bwd),
                # direction block d along the last (8*Hp) axis.
                pl.BlockSpec((time_chunk, b, 4 * hp),
                             lambda d, c: (t_blk(d, c), 0, d)),
                # per-direction W_hh (constant across c -> stays resident).
                pl.BlockSpec((None, hp, 4 * hp), lambda d, c: (d, 0, 0)),
            ],
            out_specs=pl.BlockSpec((None, time_chunk, b, hp),
                                   lambda d, c: (d, t_blk(d, c), 0, 0)),
            scratch_shapes=[pltpu.VMEM((b, hp), jnp.float32),   # h state
                            pltpu.VMEM((b, hp), jnp.float32)],  # c state
        ),
        compiler_params=pltpu.CompilerParams(
            dimension_semantics=("parallel", "arbitrary"),
            vmem_limit_bytes=_vmem_budget()),
    )(pre_gates, whh_stack)


# ----------------------------------------------------------------------------
# Parameters: PyTorch-layout init + one-time packing to kernel layout
# ----------------------------------------------------------------------------
def init_bilstm_params(key, in_features, hidden_features, out_features):
    """PyTorch-equivalent raw parameters (also used by the pure-JAX reference).
    Weights are stored pre-transposed: (in, 4H) / (H, 4H); b = b_ih + b_hh."""
    k = 1.0 / np.sqrt(hidden_features)
    keys = jax.random.split(key, 10)

    def u(key, shape, bound):
        return jax.random.uniform(key, shape, jnp.float32, -bound, bound)

    h = hidden_features
    return {
        "wih_f": u(keys[0], (in_features, 4 * h), k),
        "whh_f": u(keys[1], (h, 4 * h), k),
        "b_f": u(keys[2], (1, 4 * h), k) + u(keys[3], (1, 4 * h), k),
        "wih_b": u(keys[4], (in_features, 4 * h), k),
        "whh_b": u(keys[5], (h, 4 * h), k),
        "b_b": u(keys[6], (1, 4 * h), k) + u(keys[7], (1, 4 * h), k),
        "w_emb": u(keys[8], (2 * h, out_features), 1.0 / np.sqrt(2 * h)),
        "b_emb": u(keys[9], (1, out_features), 1.0 / np.sqrt(2 * h)),
    }


def pack_bilstm_params(p, *, lane=128, matmul_dtype=jnp.float32):
    """One-time packing (done outside the jitted forward):
      * concat fwd/bwd input weights and the folded biases,
      * zero-pad the hidden dim to a multiple of 128 lanes (exact: padded
        gate pre-activations are 0, so padded h/c stay 0 forever),
      * stack W_hh per direction for the direction-parallel recurrence grid,
      * split the emb weight into its h_fwd / h_bwd halves,
      * optionally cast matmul operands to bf16 (f32 accumulation).
        NOTE: bf16 will not meet the 1e-4 check against the f32 reference.
    """
    h = p["whh_f"].shape[0]
    hp = _round_up(h, lane)

    def pad_gate_cols(w):                    # (..., 4H) -> (..., 4Hp)
        lead = w.shape[:-1]
        w = w.reshape(lead + (4, h))
        w = jnp.pad(w, [(0, 0)] * len(lead) + [(0, 0), (0, hp - h)])
        return w.reshape(lead + (4 * hp,))

    def pad_rows(w):                         # (H, X) -> (Hp, X)
        return jnp.pad(w, ((0, hp - h), (0, 0)))

    md = matmul_dtype
    return {
        "wih": jnp.concatenate([pad_gate_cols(p["wih_f"]),
                                pad_gate_cols(p["wih_b"])],
                               axis=-1).astype(md),            # (C, 8*Hp)
        "b": jnp.concatenate([pad_gate_cols(p["b_f"]),
                              pad_gate_cols(p["b_b"])], axis=-1),  # (1, 8*Hp)
        "whh": jnp.stack([pad_rows(pad_gate_cols(p["whh_f"])),
                          pad_rows(pad_gate_cols(p["whh_b"]))],
                         axis=0).astype(md),                   # (2, Hp, 4*Hp)
        "w_emb_f": pad_rows(p["w_emb"][:h]).astype(md),        # (Hp, out)
        "w_emb_b": pad_rows(p["w_emb"][h:]).astype(md),        # (Hp, out)
        "b_emb": p["b_emb"],                                   # (1, out)
    }


# ----------------------------------------------------------------------------
# CRNNHead forward
# ----------------------------------------------------------------------------
def crnn_head(x, p0, p1, *, time_chunk=None):
    """x: (T, B, C) time-major; p0/p1: packed params of rnn0/rnn1."""
    t, b, c = x.shape
    hp0 = p0["whh"].shape[1]
    hp1 = p1["whh"].shape[1]

    # layer 0: hoisted input projection for both directions (one big matmul).
    # TODO(synk): optionally emit the pre-gates in bf16 to halve the HBM
    # stream feeding the recurrence (needs a looser tolerance than 1e-4).
    pre = linear(x.reshape(t * b, c), p0["wih"], p0["b"])
    h = bilstm_recurrence(pre.reshape(t, b, 8 * hp0), p0["whh"],
                          time_chunk=time_chunk)

    # fused: layer-0 emb + layer-1 input projection (the (T, B, H)
    # intermediate never round-trips HBM).
    pre = emb_then_project(h.reshape(2, t * b, hp0),
                           p0["w_emb_f"], p0["w_emb_b"], p0["b_emb"],
                           p1["wih"], p1["b"])
    h = bilstm_recurrence(pre.reshape(t, b, 8 * hp1), p1["whh"],
                          time_chunk=time_chunk)

    # layer 1: final emb -> (T, B, out_features)
    y = emb(h.reshape(2, t * b, hp1),
            p1["w_emb_f"], p1["w_emb_b"], p1["b_emb"])
    return y.reshape(t, b, -1)


# ----------------------------------------------------------------------------
# Pure-JAX reference (lax.scan) for the correctness check
# ----------------------------------------------------------------------------
def _ref_lstm_direction(x, w_ih, w_hh, b):
    _, bsz, _ = x.shape
    h_dim = w_hh.shape[0]

    def step(carry, x_t):
        h, c = carry
        gates = x_t @ w_ih + h @ w_hh + b
        i = jax.nn.sigmoid(gates[:, 0 * h_dim:1 * h_dim])
        f = jax.nn.sigmoid(gates[:, 1 * h_dim:2 * h_dim])
        g = jnp.tanh(gates[:, 2 * h_dim:3 * h_dim])
        o = jax.nn.sigmoid(gates[:, 3 * h_dim:4 * h_dim])
        c = f * c + i * g
        h = o * jnp.tanh(c)
        return (h, c), h

    init = (jnp.zeros((bsz, h_dim), jnp.float32),
            jnp.zeros((bsz, h_dim), jnp.float32))
    _, hs = jax.lax.scan(step, init, x)
    return hs


def _ref_bilstm(x, p):
    t, bsz, _ = x.shape
    hf = _ref_lstm_direction(x, p["wih_f"], p["whh_f"], p["b_f"])
    hb = _ref_lstm_direction(x[::-1], p["wih_b"], p["whh_b"], p["b_b"])[::-1]
    h = jnp.concatenate([hf, hb], axis=-1).reshape(t * bsz, -1)
    return (h @ p["w_emb"] + p["b_emb"]).reshape(t, bsz, -1)


def _ref_crnn_head(x, p0, p1):
    return _ref_bilstm(_ref_bilstm(x, p0), p1)


# ----------------------------------------------------------------------------
if __name__ == "__main__":
    # Small shapes consistent with the module's forward: x is [T, B, C].
    T, B = 8, 2
    in_features, hidden_features, out_features = 16, 32, 16

    root = jax.random.PRNGKey(0)
    kx, k0, k1 = jax.random.split(root, 3)

    x = jax.random.normal(kx, (T, B, in_features), jnp.float32)
    raw0 = init_bilstm_params(k0, in_features, hidden_features,
                              hidden_features)
    raw1 = init_bilstm_params(k1, hidden_features, hidden_features,
                              out_features)

    # One-time packing (weight concat, bias fold, lane padding, W_hh stack).
    # Pass matmul_dtype=jnp.bfloat16 for ~3x MXU throughput (needs a looser
    # tolerance than the 1e-4 f32 check below).
    dev0 = pack_bilstm_params(raw0)
    dev1 = pack_bilstm_params(raw1)

    # time_chunk=4 -> 2 chunks per direction, exercising the cross-chunk
    # h/c carry and the reversed backward-chunk indexing.
    crnn = jax.jit(functools.partial(crnn_head, time_chunk=4))
    y = jax.block_until_ready(crnn(x, dev0, dev1))

    y_ref = jax.block_until_ready(_ref_crnn_head(x, raw0, raw1))

    assert y.shape == (T, B, out_features), y.shape
    np.testing.assert_allclose(np.asarray(y), np.asarray(y_ref),
                               rtol=1e-4, atol=1e-4)
    print("KERNEL_OK")
</pallas_src>

<mosaic_0001>
module attributes {stable_mosaic.version = 11 : i64} {
  func.func @_linear_kernel(%arg0: i32, %arg1: memref<16x16xf32, #tpu.memory_space<vmem>>, %arg2: memref<16x1024xf32, #tpu.memory_space<vmem>>, %arg3: memref<1x1024xf32, #tpu.memory_space<vmem>>, %arg4: memref<16x1024xf32, #tpu.memory_space<vmem>>) attributes {dimension_semantics = [#tpu.dimension_semantics<parallel>], iteration_bounds = array<i64: 1>, scalar_prefetch = 0 : i64, scratch_operands = 0 : i64, tpu.core_type = #tpu.core_type<tc>, window_params = [{transform_indices = @transform_0, window_bounds = array<i64: 16, 16>}, {pipeline_mode = #tpu.pipeline_mode<synchronous>, transform_indices = @transform_1, window_bounds = array<i64: 16, 1024>}, {pipeline_mode = #tpu.pipeline_mode<synchronous>, transform_indices = @transform_2, window_bounds = array<i64: 1, 1024>}, {transform_indices = @transform_3, window_bounds = array<i64: 16, 1024>}]} {
    %c0 = arith.constant 0 : index
    %c0_0 = arith.constant 0 : index
    %0 = vector.load %arg1[%c0, %c0_0] : memref<16x16xf32, #tpu.memory_space<vmem>>, vector<16x16xf32>
    %c0_1 = arith.constant 0 : index
    %c0_2 = arith.constant 0 : index
    %1 = vector.load %arg2[%c0_1, %c0_2] : memref<16x1024xf32, #tpu.memory_space<vmem>>, vector<16x1024xf32>
    %cst = arith.constant dense<0.000000e+00> : vector<16x1024xf32>
    %2 = tpu.matmul %0, %1, %cst {dimension_numbers = #tpu.dot_dimension_numbers<[1], [0], [0], [1], [0, 0, 1, 1], [], []>} : vector<16x16xf32>, vector<16x1024xf32>, vector<16x1024xf32> -> vector<16x1024xf32>
    %c0_3 = arith.constant 0 : index
    %c0_4 = arith.constant 0 : index
    %3 = vector.load %arg3[%c0_3, %c0_4] : memref<1x1024xf32, #tpu.memory_space<vmem>>, vector<1x1024xf32>
    %4 = vector.broadcast %3 : vector<1x1024xf32> to vector<16x1024xf32>
    %5 = arith.addf %2, %4 : vector<16x1024xf32>
    %c0_5 = arith.constant 0 : index
    %c0_6 = arith.constant 0 : index
    %6 = vector.load %arg4[%c0_5, %c0_6] : memref<16x1024xf32, #tpu.memory_space<vmem>>, vector<16x1024xf32>
    tpu.vector_store %arg4[%c0_5, %c0_6], %5 {strides = array<i32>} : memref<16x1024xf32, #tpu.memory_space<vmem>>, vector<16x1024xf32>,
    return
  }
  func.func @transform_0(%arg0: i32) -> (i32, i32) {
    %c0_i32 = arith.constant 0 : i32
    %c0_i32_0 = arith.constant 0 : i32
    return %arg0, %c0_i32 : i32, i32
  }
  func.func @transform_1(%arg0: i32) -> (i32, i32) {
    %c0_i32 = arith.constant 0 : i32
    %c0_i32_0 = arith.constant 0 : i32
    %c0_i32_1 = arith.constant 0 : i32
    return %c0_i32, %c0_i32_0 : i32, i32
  }
  func.func @transform_2(%arg0: i32) -> (i32, i32) {
    %c0_i32 = arith.constant 0 : i32
    %c0_i32_0 = arith.constant 0 : i32
    %c0_i32_1 = arith.constant 0 : i32
    return %c0_i32, %c0_i32_0 : i32, i32
  }
  func.func @transform_3(%arg0: i32) -> (i32, i32) {
    %c0_i32 = arith.constant 0 : i32
    %c0_i32_0 = arith.constant 0 : i32
    return %arg0, %c0_i32 : i32, i32
  }
}

module attributes {stable_mosaic.version = 11 : i64} {
  func.func @_bilstm_dir_kernel(%arg0: i32, %arg1: i32, %arg2: memref<4x2x512xf32, #tpu.memory_space<vmem>>, %arg3: memref<1x128x512xf32, #tpu.memory_space<vmem>>, %arg4: memref<1x4x2x128xf32, #tpu.memory_space<vmem>>, %arg5: memref<2x128xf32, #tpu.memory_space<vmem>>, %arg6: memref<2x128xf32, #tpu.memory_space<vmem>>) attributes {dimension_semantics = [#tpu.dimension_semantics<parallel>, #tpu.dimension_semantics<arbitrary>], iteration_bounds = array<i64: 2, 2>, scalar_prefetch = 0 : i64, scratch_operands = 2 : i64, tpu.core_type = #tpu.core_type<tc>, window_params = [{transform_indices = @transform_0, window_bounds = array<i64: 4, 2, 512>}, {transform_indices = @transform_1, window_bounds = array<i64: 1, 128, 512>}, {transform_indices = @transform_2, window_bounds = array<i64: 1, 4, 2, 128>}]} {
    %c0_i32 = arith.constant 0 : i32
    %0 = arith.cmpi eq, %arg1, %c0_i32 : i32
    %1 = arith.extui %0 : i1 to i32
    %c0_i32_0 = arith.constant 0 : i32
    %2 = arith.cmpi ne, %1, %c0_i32_0 : i32
    scf.if %2 {
      %cst = arith.constant 0.000000e+00 : f32
      %11 = vector.broadcast %cst : f32 to vector<2x128xf32>
      %c0_6 = arith.constant 0 : index
      %c0_7 = arith.constant 0 : index
      %12 = vector.load %arg5[%c0_6, %c0_7] : memref<2x128xf32, #tpu.memory_space<vmem>>, vector<2x128xf32>
      tpu.vector_store %arg5[%c0_6, %c0_7], %11 {strides = array<i32>} : memref<2x128xf32, #tpu.memory_space<vmem>>, vector<2x128xf32>,
      %cst_8 = arith.constant 0.000000e+00 : f32
      %13 = vector.broadcast %cst_8 : f32 to vector<2x128xf32>
      %c0_9 = arith.constant 0 : index
      %c0_10 = arith.constant 0 : index
      %14 = vector.load %arg6[%c0_9, %c0_10] : memref<2x128xf32, #tpu.memory_space<vmem>>, vector<2x128xf32>
      tpu.vector_store %arg6[%c0_9, %c0_10], %13 {strides = array<i32>} : memref<2x128xf32, #tpu.memory_space<vmem>>, vector<2x128xf32>,
    } else {
    }
    %c0 = arith.constant 0 : index
    %c0_1 = arith.constant 0 : index
    %c0_2 = arith.constant 0 : index
    %3 = vector.load %arg3[%c0, %c0_1, %c0_2] : memref<1x128x512xf32, #tpu.memory_space<vmem>>, vector<1x128x512xf32>
    %4 = vector.shape_cast %3 : vector<1x128x512xf32> to vector<128x512xf32>
    %c0_i32_3 = arith.constant 0 : i32
    %5 = arith.cmpi eq, %arg0, %c0_i32_3 : i32
    %6 = arith.extui %5 : i1 to i32
    %c0_i32_4 = arith.constant 0 : i32
    %7 = arith.cmpi ne, %6, %c0_i32_4 : i32
    scf.if %7 {
      %c0_6 = arith.constant 0 : index
      %c0_7 = arith.constant 0 : index
      %11 = vector.load %arg5[%c0_6, %c0_7] : memref<2x128xf32, #tpu.memory_space<vmem>>, vector<2x128xf32>
      %c0_8 = arith.constant 0 : index
      %c0_9 = arith.constant 0 : index
      %12 = vector.load %arg6[%c0_8, %c0_9] : memref<2x128xf32, #tpu.memory_space<vmem>>, vector<2x128xf32>
      %c0_10 = arith.constant 0 : index
      %c0_11 = arith.constant 0 : index
      %c0_12 = arith.constant 0 : index
      %13 = vector.load %arg2[%c0_10, %c0_11, %c0_12] : memref<4x2x512xf32, #tpu.memory_space<vmem>>, vector<1x2x512xf32>
      %14 = vector.shape_cast %13 : vector<1x2x512xf32> to vector<2x512xf32>
      %cst = arith.constant dense<0.000000e+00> : vector<2x512xf32>
      %15 = tpu.matmul %11, %4, %cst {dimension_numbers = #tpu.dot_dimension_numbers<[1], [0], [0], [1], [0, 0, 1, 1], [], []>} : vector<2x128xf32>, vector<128x512xf32>, vector<2x512xf32> -> vector<2x512xf32>
      %16 = arith.addf %14, %15 : vector<2x512xf32>
      %17 = vector.extract_strided_slice %16 {offsets = [0, 0], sizes = [2, 128], strides = [1, 1]} : vector<2x512xf32> to vector<2x128xf32>
      %18 = arith.negf %17 : vector<2x128xf32>
      %19 = math.exp %18 : vector<2x128xf32>
      %cst_13 = arith.constant 1.000000e+00 : f32
      %20 = vector.broadcast %cst_13 : f32 to vector<2x128xf32>
      %21 = arith.addf %20, %19 : vector<2x128xf32>
      %22 = arith.divf %20, %21 : vector<2x128xf32>
      %23 = vector.extract_strided_slice %16 {offsets = [0, 128], sizes = [2, 128], strides = [1, 1]} : vector<2x512xf32> to vector<2x128xf32>
      %24 = arith.negf %23 : vector<2x128xf32>
      %25 = math.exp %24 : vector<2x128xf32>
      %cst_14 = arith.constant 1.000000e+00 : f32
      %26 = vector.broadcast %cst_14 : f32 to vector<2x128xf32>
      %27 = arith.addf %26, %25 : vector<2x128xf32>
      %28 = arith.divf %26, %27 : vector<2x128xf32>
      %29 = vector.extract_strided_slice %16 {offsets = [0, 256], sizes = [2, 128], strides = [1, 1]} : vector<2x512xf32> to vector<2x128xf32>
      %30 = math.tanh %29 : vector<2x128xf32>
      %31 = vector.extract_strided_slice %16 {offsets = [0, 384], sizes = [2, 128], strides = [1, 1]} : vector<2x512xf32> to vector<2x128xf32>
      %32 = arith.negf %31 : vector<2x128xf32>
      %33 = math.exp %32 : vector<2x128xf32>
      %cst_15 = arith.constant 1.000000e+00 : f32
      %34 = vector.broadcast %cst_15 : f32 to vector<2x128xf32>
      %35 = arith.addf %34, %33 : vector<2x128xf32>
      %36 = arith.divf %34, %35 : vector<2x128xf32>
      %37 = arith.mulf %28, %12 : vector<2x128xf32>
      %38 = arith.mulf %22, %30 : vector<2x128xf32>
      %39 = arith.addf %37, %38 : vector<2x128xf32>
      %40 = math.tanh %39 : vector<2x128xf32>
      %41 = arith.mulf %36, %40 : vector<2x128xf32>
      %c0_16 = arith.constant 0 : index
      %c0_17 = arith.constant 0 : index
      %c0_18 = arith.constant 0 : index
      %c0_19 = arith.constant 0 : index
      %42 = vector.load %arg4[%c0_16, %c0_17, %c0_18, %c0_19] : memref<1x4x2x128xf32, #tpu.memory_space<vmem>>, vector<1x1x2x128xf32>
      %43 = vector.shape_cast %42 : vector<1x1x2x128xf32> to vector<2x128xf32>
      %44 = vector.shape_cast %41 : vector<2x128xf32> to vector<1x1x2x128xf32>
      tpu.vector_store %arg4[%c0_16, %c0_17, %c0_18, %c0_19], %44 {strides = array<i32>} : memref<1x4x2x128xf32, #tpu.memory_space<vmem>>, vector<1x1x2x128xf32>,
      %c1 = arith.constant 1 : index
      %c0_20 = arith.constant 0 : index
      %c0_21 = arith.constant 0 : index
      %45 = vector.load %arg2[%c1, %c0_20, %c0_21] : memref<4x2x512xf32, #tpu.memory_space<vmem>>, vector<1x2x512xf32>
      %46 = vector.shape_cast %45 : vector<1x2x512xf32> to vector<2x512xf32>
      %cst_22 = arith.constant dense<0.000000e+00> : vector<2x512xf32>
      %47 = tpu.matmul %41, %4, %cst_22 {dimension_numbers = #tpu.dot_dimension_numbers<[1], [0], [0], [1], [0, 0, 1, 1], [], []>} : vector<2x128xf32>, vector<128x512xf32>, vector<2x512xf32> -> vector<2x512xf32>
      %48 = arith.addf %46, %47 : vector<2x512xf32>
      %49 = vector.extract_strided_slice %48 {offsets = [0, 0], sizes = [2, 128], strides = [1, 1]} : vector<2x512xf32> to vector<2x128xf32>
      %50 = arith.negf %49 : vector<2x128xf32>
      %51 = math.exp %50 : vector<2x128xf32>
      %cst_23 = arith.constant 1.000000e+00 : f32
      %52 = vector.broadcast %cst_23 : f32 to vector<2x128xf32>
      %53 = arith.addf %52, %51 : vector<2x128xf32>
      %54 = arith.divf %52, %53 : vector<2x128xf32>
      %55 = vector.extract_strided_slice %48 {offsets = [0, 128], sizes = [2, 128], strides = [1, 1]} : vector<2x512xf32> to vector<2x128xf32>
      %56 = arith.negf %55 : vector<2x128xf32>
      %57 = math.exp %56 : vector<2x128xf32>
      %cst_24 = arith.constant 1.000000e+00 : f32
      %58 = vector.broadcast %cst_24 : f32 to vector<2x128xf32>
      %59 = arith.addf %58, %57 : vector<2x128xf32>
      %60 = arith.divf %58, %59 : vector<2x128xf32>
      %61 = vector.extract_strided_slice %48 {offsets = [0, 256], sizes = [2, 128], strides = [1, 1]} : vector<2x512xf32> to vector<2x128xf32>
      %62 = math.tanh %61 : vector<2x128xf32>
      %63 = vector.extract_strided_slice %48 {offsets = [0, 384], sizes = [2, 128], strides = [1, 1]} : vector<2x512xf32> to vector<2x128xf32>
      %64 = arith.negf %63 : vector<2x128xf32>
      %65 = math.exp %64 : vector<2x128xf32>
      %cst_25 = arith.constant 1.000000e+00 : f32
      %66 = vector.broadcast %cst_25 : f32 to vector<2x128xf32>
      %67 = arith.addf %66, %65 : vector<2x128xf32>
      %68 = arith.divf %66, %67 : vector<2x128xf32>
      %69 = arith.mulf %60, %39 : vector<2x128xf32>
      %70 = arith.mulf %54, %62 : vector<2x128xf32>
      %71 = arith.addf %69, %70 : vector<2x128xf32>
      %72 = math.tanh %71 : vector<2x128xf32>
      %73 = arith.mulf %68, %72 : vector<2x128xf32>
      %c0_26 = arith.constant 0 : index
      %c1_27 = arith.constant 1 : index
      %c0_28 = arith.constant 0 : index
      %c0_29 = arith.constant 0 : index
      %74 = vector.load %arg4[%c0_26, %c1_27, %c0_28, %c0_29] : memref<1x4x2x128xf32, #tpu.memory_space<vmem>>, vector<1x1x2x128xf32>
      %75 = vector.shape_cast %74 : vector<1x1x2x128xf32> to vector<2x128xf32>
      %76 = vector.shape_cast %73 : vector<2x128xf32> to vector<1x1x2x128xf32>
      tpu.vector_store %arg4[%c0_26, %c1_27, %c0_28, %c0_29], %76 {strides = array<i32>} : memref<1x4x2x128xf32, #tpu.memory_space<vmem>>, vector<1x1x2x128xf32>,
      %c2 = arith.constant 2 : index
      %c0_30 = arith.constant 0 : index
      %c0_31 = arith.constant 0 : index
      %77 = vector.load %arg2[%c2, %c0_30, %c0_31] : memref<4x2x512xf32, #tpu.memory_space<vmem>>, vector<1x2x512xf32>
      %78 = vector.shape_cast %77 : vector<1x2x512xf32> to vector<2x512xf32>
      %cst_32 = arith.constant dense<0.000000e+00> : vector<2x512xf32>
      %79 = tpu.matmul %73, %4, %cst_32 {dimension_numbers = #tpu.dot_dimension_numbers<[1], [0], [0], [1], [0, 0, 1, 1], [], []>} : vector<2x128xf32>, vector<128x512xf32>, vector<2x512xf32> -> vector<2x512xf32>
      %80 = arith.addf %78, %79 : vector<2x512xf32>
      %81 = vector.extract_strided_slice %80 {offsets = [0, 0], sizes = [2, 128], strides = [1, 1]} : vector<2x512xf32> to vector<2x128xf32>
      %82 = arith.negf %81 : vector<2x128xf32>
      %83 = math.exp %82 : vector<2x128xf32>
      %cst_33 = arith.constant 1.000000e+00 : f32
      %84 = vector.broadcast %cst_33 : f32 to vector<2x128xf32>
      %85 = arith.addf %84, %83 : vector<2x128xf32>
      %86 = arith.divf %84, %85 : vector<2x128xf32>
      %87 = vector.extract_strided_slice %80 {offsets = [0, 128], sizes = [2, 128], strides = [1, 1]} : vector<2x512xf32> to vector<2x128xf32>
      %88 = arith.negf %87 : vector<2x128xf32>
      %89 = math.exp %88 : vector<2x128xf32>
      %cst_34 = arith.constant 1.000000e+00 : f32
      %90 = vector.broadcast %cst_34 : f32 to vector<2x128xf32>
      %91 = arith.addf %90, %89 : vector<2x128xf32>
      %92 = arith.divf %90, %91 : vector<2x128xf32>
      %93 = vector.extract_strided_slice %80 {offsets = [0, 256], sizes = [2, 128], strides = [1, 1]} : vector<2x512xf32> to vector<2x128xf32>
      %94 = math.tanh %93 : vector<2x128xf32>
      %95 = vector.extract_strided_slice %80 {offsets = [0, 384], sizes = [2, 128], strides = [1, 1]} : vector<2x512xf32> to vector<2x128xf32>
      %96 = arith.negf %95 : vector<2x128xf32>
      %97 = math.exp %96 : vector<2x128xf32>
      %cst_35 = arith.constant 1.000000e+00 : f32
      %98 = vector.broadcast %cst_35 : f32 to vector<2x128xf32>
      %99 = arith.addf %98, %97 : vector<2x128xf32>
      %100 = arith.divf %98, %99 : vector<2x128xf32>
      %101 = arith.mulf %92, %71 : vector<2x128xf32>
      %102 = arith.mulf %86, %94 : vector<2x128xf32>
      %103 = arith.addf %101, %102 : vector<2x128xf32>
      %104 = math.tanh %103 : vector<2x128xf32>
      %105 = arith.mulf %100, %104 : vector<2x128xf32>
      %c0_36 = arith.constant 0 : index
      %c2_37 = arith.constant 2 : index
      %c0_38 = arith.constant 0 : index
      %c0_39 = arith.constant 0 : index
      %106 = vector.load %arg4[%c0_36, %c2_37, %c0_38, %c0_39] : memref<1x4x2x128xf32, #tpu.memory_space<vmem>>, vector<1x1x2x128xf32>
      %107 = vector.shape_cast %106 : vector<1x1x2x128xf32> to vector<2x128xf32>
      %108 = vector.shape_cast %105 : vector<2x128xf32> to vector<1x1x2x128xf32>
      tpu.vector_store %arg4[%c0_36, %c2_37, %c0_38, %c0_39], %108 {strides = array<i32>} : memref<1x4x2x128xf32, #tpu.memory_space<vmem>>, vector<1x1x2x128xf32>,
      %c3 = arith.constant 3 : index
      %c0_40 = arith.constant 0 : index
      %c0_41 = arith.constant 0 : index
      %109 = vector.load %arg2[%c3, %c0_40, %c0_41] : memref<4x2x512xf32, #tpu.memory_space<vmem>>, vector<1x2x512xf32>
      %110 = vector.shape_cast %109 : vector<1x2x512xf32> to vector<2x512xf32>
      %cst_42 = arith.constant dense<0.000000e+00> : vector<2x512xf32>
      %111 = tpu.matmul %105, %4, %cst_42 {dimension_numbers = #tpu.dot_dimension_numbers<[1], [0], [0], [1], [0, 0, 1, 1], [], []>} : vector<2x128xf32>, vector<128x512xf32>, vector<2x512xf32> -> vector<2x512xf32>
      %112 = arith.addf %110, %111 : vector<2x512xf32>
      %113 = vector.extract_strided_slice %112 {offsets = [0, 0], sizes = [2, 128], strides = [1, 1]} : vector<2x512xf32> to vector<2x128xf32>
      %114 = arith.negf %113 : vector<2x128xf32>
      %115 = math.exp %114 : vector<2x128xf32>
      %cst_43 = arith.constant 1.000000e+00 : f32
      %116 = vector.broadcast %cst_43 : f32 to vector<2x128xf32>
      %117 = arith.addf %116, %115 : vector<2x128xf32>
      %118 = arith.divf %116, %117 : vector<2x128xf32>
      %119 = vector.extract_strided_slice %112 {offsets = [0, 128], sizes = [2, 128], strides = [1, 1]} : vector<2x512xf32> to vector<2x128xf32>
      %120 = arith.negf %119 : vector<2x128xf32>
      %121 = math.exp %120 : vector<2x128xf32>
      %cst_44 = arith.constant 1.000000e+00 : f32
      %122 = vector.broadcast %cst_44 : f32 to vector<2x128xf32>
      %123 = arith.addf %122, %121 : vector<2x128xf32>
      %124 = arith.divf %122, %123 : vector<2x128xf32>
      %125 = vector.extract_strided_slice %112 {offsets = [0, 256], sizes = [2, 128], strides = [1, 1]} : vector<2x512xf32> to vector<2x128xf32>
      %126 = math.tanh %125 : vector<2x128xf32>
      %127 = vector.extract_strided_slice %112 {offsets = [0, 384], sizes = [2, 128], strides = [1, 1]} : vector<2x512xf32> to vector<2x128xf32>
      %128 = arith.negf %127 : vector<2x128xf32>
      %129 = math.exp %128 : vector<2x128xf32>
      %cst_45 = arith.constant 1.000000e+00 : f32
      %130 = vector.broadcast %cst_45 : f32 to vector<2x128xf32>
      %131 = arith.addf %130, %129 : vector<2x128xf32>
      %132 = arith.divf %130, %131 : vector<2x128xf32>
      %133 = arith.mulf %124, %103 : vector<2x128xf32>
      %134 = arith.mulf %118, %126 : vector<2x128xf32>
      %135 = arith.addf %133, %134 : vector<2x128xf32>
      %136 = math.tanh %135 : vector<2x128xf32>
      %137 = arith.mulf %132, %136 : vector<2x128xf32>
      %c0_46 = arith.constant 0 : index
      %c3_47 = arith.constant 3 : index
      %c0_48 = arith.constant 0 : index
      %c0_49 = arith.constant 0 : index
      %138 = vector.load %arg4[%c0_46, %c3_47, %c0_48, %c0_49] : memref<1x4x2x128xf32, #tpu.memory_space<vmem>>, vector<1x1x2x128xf32>
      %139 = vector.shape_cast %138 : vector<1x1x2x128xf32> to vector<2x128xf32>
      %140 = vector.shape_cast %137 : vector<2x128xf32> to vector<1x1x2x128xf32>
      tpu.vector_store %arg4[%c0_46, %c3_47, %c0_48, %c0_49], %140 {strides = array<i32>} : memref<1x4x2x128xf32, #tpu.memory_space<vmem>>, vector<1x1x2x128xf32>,
      %c0_50 = arith.constant 0 : index
      %c0_51 = arith.constant 0 : index
      %141 = vector.load %arg5[%c0_50, %c0_51] : memref<2x128xf32, #tpu.memory_space<vmem>>, vector<2x128xf32>
      tpu.vector_store %arg5[%c0_50, %c0_51], %137 {strides = array<i32>} : memref<2x128xf32, #tpu.memory_space<vmem>>, vector<2x128xf32>,
      %c0_52 = arith.constant 0 : index
      %c0_53 = arith.constant 0 : index
      %142 = vector.load %arg6[%c0_52, %c0_53] : memref<2x128xf32, #tpu.memory_space<vmem>>, vector<2x128xf32>
      tpu.vector_store %arg6[%c0_52, %c0_53], %135 {strides = array<i32>} : memref<2x128xf32, #tpu.memory_space<vmem>>, vector<2x128xf32>,
    } else {
    }
    %c1_i32 = arith.constant 1 : i32
    %8 = arith.cmpi eq, %arg0, %c1_i32 : i32
    %9 = arith.extui %8 : i1 to i32
    %c0_i32_5 = arith.constant 0 : i32
    %10 = arith.cmpi ne, %9, %c0_i32_5 : i32
    scf.if %10 {
      %c0_6 = arith.constant 0 : index
      %c0_7 = arith.constant 0 : index
      %11 = vector.load %arg5[%c0_6, %c0_7] : memref<2x128xf32, #tpu.memory_space<vmem>>, vector<2x128xf32>
      %c0_8 = arith.constant 0 : index
      %c0_9 = arith.constant 0 : index
      %12 = vector.load %arg6[%c0_8, %c0_9] : memref<2x128xf32, #tpu.memory_space<vmem>>, vector<2x128xf32>
      %c3 = arith.constant 3 : index
      %c0_10 = arith.constant 0 : index
      %c0_11 = arith.constant 0 : index
      %13 = vector.load %arg2[%c3, %c0_10, %c0_11] : memref<4x2x512xf32, #tpu.memory_space<vmem>>, vector<1x2x512xf32>
      %14 = vector.shape_cast %13 : vector<1x2x512xf32> to vector<2x512xf32>
      %cst = arith.constant dense<0.000000e+00> : vector<2x512xf32>
      %15 = tpu.matmul %11, %4, %cst {dimension_numbers = #tpu.dot_dimension_numbers<[1], [0], [0], [1], [0, 0, 1, 1], [], []>} : vector<2x128xf32>, vector<128x512xf32>, vector<2x512xf32> -> vector<2x512xf32>
      %16 = arith.addf %14, %15 : vector<2x512xf32>
      %17 = vector.extract_strided_slice %16 {offsets = [0, 0], sizes = [2, 128], strides = [1, 1]} : vector<2x512xf32> to vector<2x128xf32>
      %18 = arith.negf %17 : vector<2x128xf32>
      %19 = math.exp %18 : vector<2x128xf32>
      %cst_12 = arith.constant 1.000000e+00 : f32
      %20 = vector.broadcast %cst_12 : f32 to vector<2x128xf32>
      %21 = arith.addf %20, %19 : vector<2x128xf32>
      %22 = arith.divf %20, %21 : vector<2x128xf32>
      %23 = vector.extract_strided_slice %16 {offsets = [0, 128], sizes = [2, 128], strides = [1, 1]} : vector<2x512xf32> to vector<2x128xf32>
      %24 = arith.negf %23 : vector<2x128xf32>
      %25 = math.exp %24 : vector<2x128xf32>
      %cst_13 = arith.constant 1.000000e+00 : f32
      %26 = vector.broadcast %cst_13 : f32 to vector<2x128xf32>
      %27 = arith.addf %26, %25 : vector<2x128xf32>
      %28 = arith.divf %26, %27 : vector<2x128xf32>
      %29 = vector.extract_strided_slice %16 {offsets = [0, 256], sizes = [2, 128], strides = [1, 1]} : vector<2x512xf32> to vector<2x128xf32>
      %30 = math.tanh %29 : vector<2x128xf32>
      %31 = vector.extract_strided_slice %16 {offsets = [0, 384], sizes = [2, 128], strides = [1, 1]} : vector<2x512xf32> to vector<2x128xf32>
      %32 = arith.negf %31 : vector<2x128xf32>
      %33 = math.exp %32 : vector<2x128xf32>
      %cst_14 = arith.constant 1.000000e+00 : f32
      %34 = vector.broadcast %cst_14 : f32 to vector<2x128xf32>
      %35 = arith.addf %34, %33 : vector<2x128xf32>
      %36 = arith.divf %34, %35 : vector<2x128xf32>
      %37 = arith.mulf %28, %12 : vector<2x128xf32>
      %38 = arith.mulf %22, %30 : vector<2x128xf32>
      %39 = arith.addf %37, %38 : vector<2x128xf32>
      %40 = math.tanh %39 : vector<2x128xf32>
      %41 = arith.mulf %36, %40 : vector<2x128xf32>
      %c0_15 = arith.constant 0 : index
      %c3_16 = arith.constant 3 : index
      %c0_17 = arith.constant 0 : index
      %c0_18 = arith.constant 0 : index
      %42 = vector.load %arg4[%c0_15, %c3_16, %c0_17, %c0_18] : memref<1x4x2x128xf32, #tpu.memory_space<vmem>>, vector<1x1x2x128xf32>
      %43 = vector.shape_cast %42 : vector<1x1x2x128xf32> to vector<2x128xf32>
      %44 = vector.shape_cast %41 : vector<2x128xf32> to vector<1x1x2x128xf32>
      tpu.vector_store %arg4[%c0_15, %c3_16, %c0_17, %c0_18], %44 {strides = array<i32>} : memref<1x4x2x128xf32, #tpu.memory_space<vmem>>, vector<1x1x2x128xf32>,
      %c2 = arith.constant 2 : index
      %c0_19 = arith.constant 0 : index
      %c0_20 = arith.constant 0 : index
      %45 = vector.load %arg2[%c2, %c0_19, %c0_20] : memref<4x2x512xf32, #tpu.memory_space<vmem>>, vector<1x2x512xf32>
      %46 = vector.shape_cast %45 : vector<1x2x512xf32> to vector<2x512xf32>
      %cst_21 = arith.constant dense<0.000000e+00> : vector<2x512xf32>
      %47 = tpu.matmul %41, %4, %cst_21 {dimension_numbers = #tpu.dot_dimension_numbers<[1], [0], [0], [1], [0, 0, 1, 1], [], []>} : vector<2x128xf32>, vector<128x512xf32>, vector<2x512xf32> -> vector<2x512xf32>
      %48 = arith.addf %46, %47 : vector<2x512xf32>
      %49 = vector.extract_strided_slice %48 {offsets = [0, 0], sizes = [2, 128], strides = [1, 1]} : vector<2x512xf32> to vector<2x128xf32>
      %50 = arith.negf %49 : vector<2x128xf32>
      %51 = math.exp %50 : vector<2x128xf32>
      %cst_22 = arith.constant 1.000000e+00 : f32
      %52 = vector.broadcast %cst_22 : f32 to vector<2x128xf32>
      %53 = arith.addf %52, %51 : vector<2x128xf32>
      %54 = arith.divf %52, %53 : vector<2x128xf32>
      %55 = vector.extract_strided_slice %48 {offsets = [0, 128], sizes = [2, 128], strides = [1, 1]} : vector<2x512xf32> to vector<2x128xf32>
      %56 = arith.negf %55 : vector<2x128xf32>
      %57 = math.exp %56 : vector<2x128xf32>
      %cst_23 = arith.constant 1.000000e+00 : f32
      %58 = vector.broadcast %cst_23 : f32 to vector<2x128xf32>
      %59 = arith.addf %58, %57 : vector<2x128xf32>
      %60 = arith.divf %58, %59 : vector<2x128xf32>
      %61 = vector.extract_strided_slice %48 {offsets = [0, 256], sizes = [2, 128], strides = [1, 1]} : vector<2x512xf32> to vector<2x128xf32>
      %62 = math.tanh %61 : vector<2x128xf32>
      %63 = vector.extract_strided_slice %48 {offsets = [0, 384], sizes = [2, 128], strides = [1, 1]} : vector<2x512xf32> to vector<2x128xf32>
      %64 = arith.negf %63 : vector<2x128xf32>
      %65 = math.exp %64 : vector<2x128xf32>
      %cst_24 = arith.constant 1.000000e+00 : f32
      %66 = vector.broadcast %cst_24 : f32 to vector<2x128xf32>
      %67 = arith.addf %66, %65 : vector<2x128xf32>
      %68 = arith.divf %66, %67 : vector<2x128xf32>
      %69 = arith.mulf %60, %39 : vector<2x128xf32>
      %70 = arith.mulf %54, %62 : vector<2x128xf32>
      %71 = arith.addf %69, %70 : vector<2x128xf32>
      %72 = math.tanh %71 : vector<2x128xf32>
      %73 = arith.mulf %68, %72 : vector<2x128xf32>
      %c0_25 = arith.constant 0 : index
      %c2_26 = arith.constant 2 : index
      %c0_27 = arith.constant 0 : index
      %c0_28 = arith.constant 0 : index
      %74 = vector.load %arg4[%c0_25, %c2_26, %c0_27, %c0_28] : memref<1x4x2x128xf32, #tpu.memory_space<vmem>>, vector<1x1x2x128xf32>
      %75 = vector.shape_cast %74 : vector<1x1x2x128xf32> to vector<2x128xf32>
      %76 = vector.shape_cast %73 : vector<2x128xf32> to vector<1x1x2x128xf32>
      tpu.vector_store %arg4[%c0_25, %c2_26, %c0_27, %c0_28], %76 {strides = array<i32>} : memref<1x4x2x128xf32, #tpu.memory_space<vmem>>, vector<1x1x2x128xf32>,
      %c1 = arith.constant 1 : index
      %c0_29 = arith.constant 0 : index
      %c0_30 = arith.constant 0 : index
      %77 = vector.load %arg2[%c1, %c0_29, %c0_30] : memref<4x2x512xf32, #tpu.memory_space<vmem>>, vector<1x2x512xf32>
      %78 = vector.shape_cast %77 : vector<1x2x512xf32> to vector<2x512xf32>
      %cst_31 = arith.constant dense<0.000000e+00> : vector<2x512xf32>
      %79 = tpu.matmul %73, %4, %cst_31 {dimension_numbers = #tpu.dot_dimension_numbers<[1], [0], [0], [1], [0, 0, 1, 1], [], []>} : vector<2x128xf32>, vector<128x512xf32>, vector<2x512xf32> -> vector<2x512xf32>
      %80 = arith.addf %78, %79 : vector<2x512xf32>
      %81 = vector.extract_strided_slice %80 {offsets = [0, 0], sizes = [2, 128], strides = [1, 1]} : vector<2x512xf32> to vector<2x128xf32>
      %82 = arith.negf %81 : vector<2x128xf32>
      %83 = math.exp %82 : vector<2x128xf32>
      %cst_32 = arith.constant 1.000000e+00 : f32
      %84 = vector.broadcast %cst_32 : f32 to vector<2x128xf32>
      %85 = arith.addf %84, %83 : vector<2x128xf32>
      %86 = arith.divf %84, %85 : vector<2x128xf32>
      %87 = vector.extract_strided_slice %80 {offsets = [0, 128], sizes = [2, 128], strides = [1, 1]} : vector<2x512xf32> to vector<2x128xf32>
      %88 = arith.negf %87 : vector<2x128xf32>
      %89 = math.exp %88 : vector<2x128xf32>
      %cst_33 = arith.constant 1.000000e+00 : f32
      %90 = vector.broadcast %cst_33 : f32 to vector<2x128xf32>
      %91 = arith.addf %90, %89 : vector<2x128xf32>
      %92 = arith.divf %90, %91 : vector<2x128xf32>
      %93 = vector.extract_strided_slice %80 {offsets = [0, 256], sizes = [2, 128], strides = [1, 1]} : vector<2x512xf32> to vector<2x128xf32>
      %94 = math.tanh %93 : vector<2x128xf32>
      %95 = vector.extract_strided_slice %80 {offsets = [0, 384], sizes = [2, 128], strides = [1, 1]} : vector<2x512xf32> to vector<2x128xf32>
      %96 = arith.negf %95 : vector<2x128xf32>
      %97 = math.exp %96 : vector<2x128xf32>
      %cst_34 = arith.constant 1.000000e+00 : f32
      %98 = vector.broadcast %cst_34 : f32 to vector<2x128xf32>
      %99 = arith.addf %98, %97 : vector<2x128xf32>
      %100 = arith.divf %98, %99 : vector<2x128xf32>
      %101 = arith.mulf %92, %71 : vector<2x128xf32>
      %102 = arith.mulf %86, %94 : vector<2x128xf32>
      %103 = arith.addf %101, %102 : vector<2x128xf32>
      %104 = math.tanh %103 : vector<2x128xf32>
      %105 = arith.mulf %100, %104 : vector<2x128xf32>
      %c0_35 = arith.constant 0 : index
      %c1_36 = arith.constant 1 : index
      %c0_37 = arith.constant 0 : index
      %c0_38 = arith.constant 0 : index
      %106 = vector.load %arg4[%c0_35, %c1_36, %c0_37, %c0_38] : memref<1x4x2x128xf32, #tpu.memory_space<vmem>>, vector<1x1x2x128xf32>
      %107 = vector.shape_cast %106 : vector<1x1x2x128xf32> to vector<2x128xf32>
      %108 = vector.shape_cast %105 : vector<2x128xf32> to vector<1x1x2x128xf32>
      tpu.vector_store %arg4[%c0_35, %c1_36, %c0_37, %c0_38], %108 {strides = array<i32>} : memref<1x4x2x128xf32, #tpu.memory_space<vmem>>, vector<1x1x2x128xf32>,
      %c0_39 = arith.constant 0 : index
      %c0_40 = arith.constant 0 : index
      %c0_41 = arith.constant 0 : index
      %109 = vector.load %arg2[%c0_39, %c0_40, %c0_41] : memref<4x2x512xf32, #tpu.memory_space<vmem>>, vector<1x2x512xf32>
      %110 = vector.shape_cast %109 : vector<1x2x512xf32> to vector<2x512xf32>
      %cst_42 = arith.constant dense<0.000000e+00> : vector<2x512xf32>
      %111 = tpu.matmul %105, %4, %cst_42 {dimension_numbers = #tpu.dot_dimension_numbers<[1], [0], [0], [1], [0, 0, 1, 1], [], []>} : vector<2x128xf32>, vector<128x512xf32>, vector<2x512xf32> -> vector<2x512xf32>
      %112 = arith.addf %110, %111 : vector<2x512xf32>
      %113 = vector.extract_strided_slice %112 {offsets = [0, 0], sizes = [2, 128], strides = [1, 1]} : vector<2x512xf32> to vector<2x128xf32>
      %114 = arith.negf %113 : vector<2x128xf32>
      %115 = math.exp %114 : vector<2x128xf32>
      %cst_43 = arith.constant 1.000000e+00 : f32
      %116 = vector.broadcast %cst_43 : f32 to vector<2x128xf32>
      %117 = arith.addf %116, %115 : vector<2x128xf32>
      %118 = arith.divf %116, %117 : vector<2x128xf32>
      %119 = vector.extract_strided_slice %112 {offsets = [0, 128], sizes = [2, 128], strides = [1, 1]} : vector<2x512xf32> to vector<2x128xf32>
      %120 = arith.negf %119 : vector<2x128xf32>
      %121 = math.exp %120 : vector<2x128xf32>
      %cst_44 = arith.constant 1.000000e+00 : f32
      %122 = vector.broadcast %cst_44 : f32 to vector<2x128xf32>
      %123 = arith.addf %122, %121 : vector<2x128xf32>
      %124 = arith.divf %122, %123 : vector<2x128xf32>
      %125 = vector.extract_strided_slice %112 {offsets = [0, 256], sizes = [2, 128], strides = [1, 1]} : vector<2x512xf32> to vector<2x128xf32>
      %126 = math.tanh %125 : vector<2x128xf32>
      %127 = vector.extract_strided_slice %112 {offsets = [0, 384], sizes = [2, 128], strides = [1, 1]} : vector<2x512xf32> to vector<2x128xf32>
      %128 = arith.negf %127 : vector<2x128xf32>
      %129 = math.exp %128 : vector<2x128xf32>
      %cst_45 = arith.constant 1.000000e+00 : f32
      %130 = vector.broadcast %cst_45 : f32 to vector<2x128xf32>
      %131 = arith.addf %130, %129 : vector<2x128xf32>
      %132 = arith.divf %130, %131 : vector<2x128xf32>
      %133 = arith.mulf %124, %103 : vector<2x128xf32>
      %134 = arith.mulf %118, %126 : vector<2x128xf32>
      %135 = arith.addf %133, %134 : vector<2x128xf32>
      %136 = math.tanh %135 : vector<2x128xf32>
      %137 = arith.mulf %132, %136 : vector<2x128xf32>
      %c0_46 = arith.constant 0 : index
      %c0_47 = arith.constant 0 : index
      %c0_48 = arith.constant 0 : index
      %c0_49 = arith.constant 0 : index
      %138 = vector.load %arg4[%c0_46, %c0_47, %c0_48, %c0_49] : memref<1x4x2x128xf32, #tpu.memory_space<vmem>>, vector<1x1x2x128xf32>
      %139 = vector.shape_cast %138 : vector<1x1x2x128xf32> to vector<2x128xf32>
      %140 = vector.shape_cast %137 : vector<2x128xf32> to vector<1x1x2x128xf32>
      tpu.vector_store %arg4[%c0_46, %c0_47, %c0_48, %c0_49], %140 {strides = array<i32>} : memref<1x4x2x128xf32, #tpu.memory_space<vmem>>, vector<1x1x2x128xf32>,
      %c0_50 = arith.constant 0 : index
      %c0_51 = arith.constant 0 : index
      %141 = vector.load %arg5[%c0_50, %c0_51] : memref<2x128xf32, #tpu.memory_space<vmem>>, vector<2x128xf32>
      tpu.vector_store %arg5[%c0_50, %c0_51], %137 {strides = array<i32>} : memref<2x128xf32, #tpu.memory_space<vmem>>, vector<2x128xf32>,
      %c0_52 = arith.constant 0 : index
      %c0_53 = arith.constant 0 : index
      %142 = vector.load %arg6[%c0_52, %c0_53] : memref<2x128xf32, #tpu.memory_space<vmem>>, vector<2x128xf32>
      tpu.vector_store %arg6[%c0_52, %c0_53], %135 {strides = array<i32>} : memref<2x128xf32, #tpu.memory_space<vmem>>, vector<2x128xf32>,
    } else {
    }
    return
  }
  func.func @transform_0(%arg0: i32, %arg1: i32) -> (i32, i32, i32) {
    %c1_i32 = arith.constant 1 : i32
    %0 = arith.muli %arg0, %c1_i32 : i32
    %c2_i32 = arith.constant 2 : i32
    %1 = arith.muli %c2_i32, %arg0 : i32
    %c1_i32_0 = arith.constant 1 : i32
    %2 = arith.subi %c1_i32_0, %1 : i32
    %3 = arith.muli %2, %arg1 : i32
    %4 = arith.addi %0, %3 : i32
    %c0_i32 = arith.constant 0 : i32
    %c0_i32_1 = arith.constant 0 : i32
    return %4, %c0_i32, %arg0 : i32, i32, i32
  }
  func.func @transform_1(%arg0: i32, %arg1: i32) -> (i32, i32, i32) {
    %c0_i32 = arith.constant 0 : i32
    %c0_i32_0 = arith.constant 0 : i32
    %c0_i32_1 = arith.constant 0 : i32
    return %arg0, %c0_i32, %c0_i32_0 : i32, i32, i32
  }
  func.func @transform_2(%arg0: i32, %arg1: i32) -> (i32, i32, i32, i32) {
    %c1_i32 = arith.constant 1 : i32
    %0 = arith.muli %arg0, %c1_i32 : i32
    %c2_i32 = arith.constant 2 : i32
    %1 = arith.muli %c2_i32, %arg0 : i32
    %c1_i32_0 = arith.constant 1 : i32
    %2 = arith.subi %c1_i32_0, %1 : i32
    %3 = arith.muli %2, %arg1 : i32
    %4 = arith.addi %0, %3 : i32
    %c0_i32 = arith.constant 0 : i32
    %c0_i32_1 = arith.constant 0 : i32
    %c0_i32_2 = arith.constant 0 : i32
    return %arg0, %4, %c0_i32, %c0_i32_1 : i32, i32, i32, i32
  }
}

module attributes {stable_mosaic.version = 11 : i64} {
  func.func @_emb_proj_kernel(%arg0: i32, %arg1: memref<1x16x128xf32, #tpu.memory_space<vmem>>, %arg2: memref<1x16x128xf32, #tpu.memory_space<vmem>>, %arg3: memref<128x32xf32, #tpu.memory_space<vmem>>, %arg4: memref<128x32xf32, #tpu.memory_space<vmem>>, %arg5: memref<1x32xf32, #tpu.memory_space<vmem>>, %arg6: memref<32x1024xf32, #tpu.memory_space<vmem>>, %arg7: memref<1x1024xf32, #tpu.memory_space<vmem>>, %arg8: memref<16x1024xf32, #tpu.memory_space<vmem>>) attributes {dimension_semantics = [#tpu.dimension_semantics<parallel>], iteration_bounds = array<i64: 1>, scalar_prefetch = 0 : i64, scratch_operands = 0 : i64, tpu.core_type = #tpu.core_type<tc>, window_params = [{transform_indices = @transform_0, window_bounds = array<i64: 1, 16, 128>}, {transform_indices = @transform_1, window_bounds = array<i64: 1, 16, 128>}, {pipeline_mode = #tpu.pipeline_mode<synchronous>, transform_indices = @transform_2, window_bounds = array<i64: 128, 32>}, {pipeline_mode = #tpu.pipeline_mode<synchronous>, transform_indices = @transform_3, window_bounds = array<i64: 128, 32>}, {pipeline_mode = #tpu.pipeline_mode<synchronous>, transform_indices = @transform_4, window_bounds = array<i64: 1, 32>}, {pipeline_mode = #tpu.pipeline_mode<synchronous>, transform_indices = @transform_5, window_bounds = array<i64: 32, 1024>}, {pipeline_mode = #tpu.pipeline_mode<synchronous>, transform_indices = @transform_6, window_bounds = array<i64: 1, 1024>}, {transform_indices = @transform_7, window_bounds = array<i64: 16, 1024>}]} {
    %c0 = arith.constant 0 : index
    %c0_0 = arith.constant 0 : index
    %c0_1 = arith.constant 0 : index
    %0 = vector.load %arg1[%c0, %c0_0, %c0_1] : memref<1x16x128xf32, #tpu.memory_space<vmem>>, vector<1x16x128xf32>
    %1 = vector.shape_cast %0 : vector<1x16x128xf32> to vector<16x128xf32>
    %c0_2 = arith.constant 0 : index
    %c0_3 = arith.constant 0 : index
    %2 = vector.load %arg3[%c0_2, %c0_3] : memref<128x32xf32, #tpu.memory_space<vmem>>, vector<128x32xf32>
    %cst = arith.constant dense<0.000000e+00> : vector<16x32xf32>
    %3 = tpu.matmul %1, %2, %cst {dimension_numbers = #tpu.dot_dimension_numbers<[1], [0], [0], [1], [0, 0, 1, 1], [], []>} : vector<16x128xf32>, vector<128x32xf32>, vector<16x32xf32> -> vector<16x32xf32>
    %c0_4 = arith.constant 0 : index
    %c0_5 = arith.constant 0 : index
    %c0_6 = arith.constant 0 : index
    %4 = vector.load %arg2[%c0_4, %c0_5, %c0_6] : memref<1x16x128xf32, #tpu.memory_space<vmem>>, vector<1x16x128xf32>
    %5 = vector.shape_cast %4 : vector<1x16x128xf32> to vector<16x128xf32>
    %c0_7 = arith.constant 0 : index
    %c0_8 = arith.constant 0 : index
    %6 = vector.load %arg4[%c0_7, %c0_8] : memref<128x32xf32, #tpu.memory_space<vmem>>, vector<128x32xf32>
    %cst_9 = arith.constant dense<0.000000e+00> : vector<16x32xf32>
    %7 = tpu.matmul %5, %6, %cst_9 {dimension_numbers = #tpu.dot_dimension_numbers<[1], [0], [0], [1], [0, 0, 1, 1], [], []>} : vector<16x128xf32>, vector<128x32xf32>, vector<16x32xf32> -> vector<16x32xf32>
    %8 = arith.addf %3, %7 : vector<16x32xf32>
    %c0_10 = arith.constant 0 : index
    %c0_11 = arith.constant 0 : index
    %9 = vector.load %arg5[%c0_10, %c0_11] : memref<1x32xf32, #tpu.memory_space<vmem>>, vector<1x32xf32>
    %10 = vector.broadcast %9 : vector<1x32xf32> to vector<16x32xf32>
    %11 = arith.addf %8, %10 : vector<16x32xf32>
    %c0_12 = arith.constant 0 : index
    %c0_13 = arith.constant 0 : index
    %12 = vector.load %arg6[%c0_12, %c0_13] : memref<32x1024xf32, #tpu.memory_space<vmem>>, vector<32x1024xf32>
    %cst_14 = arith.constant dense<0.000000e+00> : vector<16x1024xf32>
    %13 = tpu.matmul %11, %12, %cst_14 {dimension_numbers = #tpu.dot_dimension_numbers<[1], [0], [0], [1], [0, 0, 1, 1], [], []>} : vector<16x32xf32>, vector<32x1024xf32>, vector<16x1024xf32> -> vector<16x1024xf32>
    %c0_15 = arith.constant 0 : index
    %c0_16 = arith.constant 0 : index
    %14 = vector.load %arg7[%c0_15, %c0_16] : memref<1x1024xf32, #tpu.memory_space<vmem>>, vector<1x1024xf32>
    %15 = vector.broadcast %14 : vector<1x1024xf32> to vector<16x1024xf32>
    %16 = arith.addf %13, %15 : vector<16x1024xf32>
    %c0_17 = arith.constant 0 : index
    %c0_18 = arith.constant 0 : index
    %17 = vector.load %arg8[%c0_17, %c0_18] : memref<16x1024xf32, #tpu.memory_space<vmem>>, vector<16x1024xf32>
    tpu.vector_store %arg8[%c0_17, %c0_18], %16 {strides = array<i32>} : memref<16x1024xf32, #tpu.memory_space<vmem>>, vector<16x1024xf32>,
    return
  }
  func.func @transform_0(%arg0: i32) -> (i32, i32, i32) {
    %c0_i32 = arith.constant 0 : i32
    %c0_i32_0 = arith.constant 0 : i32
    %c0_i32_1 = arith.constant 0 : i32
    return %c0_i32, %arg0, %c0_i32_0 : i32, i32, i32
  }
  func.func @transform_1(%arg0: i32) -> (i32, i32, i32) {
    %c1_i32 = arith.constant 1 : i32
    %c0_i32 = arith.constant 0 : i32
    %c0_i32_0 = arith.constant 0 : i32
    return %c1_i32, %arg0, %c0_i32 : i32, i32, i32
  }
  func.func @transform_2(%arg0: i32) -> (i32, i32) {
    %c0_i32 = arith.constant 0 : i32
    %c0_i32_0 = arith.constant 0 : i32
    %c0_i32_1 = arith.constant 0 : i32
    return %c0_i32, %c0_i32_0 : i32, i32
  }
  func.func @transform_3(%arg0: i32) -> (i32, i32) {
    %c0_i32 = arith.constant 0 : i32
    %c0_i32_0 = arith.constant 0 : i32
    %c0_i32_1 = arith.constant 0 : i32
    return %c0_i32, %c0_i32_0 : i32, i32
  }
  func.func @transform_4(%arg0: i32) -> (i32, i32) {
    %c0_i32 = arith.constant 0 : i32
    %c0_i32_0 = arith.constant 0 : i32
    %c0_i32_1 = arith.constant 0 : i32
    return %c0_i32, %c0_i32_0 : i32, i32
  }
  func.func @transform_5(%arg0: i32) -> (i32, i32) {
    %c0_i32 = arith.constant 0 : i32
    %c0_i32_0 = arith.constant 0 : i32
    %c0_i32_1 = arith.constant 0 : i32
    return %c0_i32, %c0_i32_0 : i32, i32
  }
  func.func @transform_6(%arg0: i32) -> (i32, i32) {
    %c0_i32 = arith.constant 0 : i32
    %c0_i32_0 = arith.constant 0 : i32
    %c0_i32_1 = arith.constant 0 : i32
    return %c0_i32, %c0_i32_0 : i32, i32
  }
  func.func @transform_7(%arg0: i32) -> (i32, i32) {
    %c0_i32 = arith.constant 0 : i32
    %c0_i32_0 = arith.constant 0 : i32
    return %arg0, %c0_i32 : i32, i32
  }
}

module attributes {stable_mosaic.version = 11 : i64} {
  func.func @_bilstm_dir_kernel(%arg0: i32, %arg1: i32, %arg2: memref<4x2x512xf32, #tpu.memory_space<vmem>>, %arg3: memref<1x128x512xf32, #tpu.memory_space<vmem>>, %arg4: memref<1x4x2x128xf32, #tpu.memory_space<vmem>>, %arg5: memref<2x128xf32, #tpu.memory_space<vmem>>, %arg6: memref<2x128xf32, #tpu.memory_space<vmem>>) attributes {dimension_semantics = [#tpu.dimension_semantics<parallel>, #tpu.dimension_semantics<arbitrary>], iteration_bounds = array<i64: 2, 2>, scalar_prefetch = 0 : i64, scratch_operands = 2 : i64, tpu.core_type = #tpu.core_type<tc>, window_params = [{transform_indices = @transform_0, window_bounds = array<i64: 4, 2, 512>}, {transform_indices = @transform_1, window_bounds = array<i64: 1, 128, 512>}, {transform_indices = @transform_2, window_bounds = array<i64: 1, 4, 2, 128>}]} {
    %c0_i32 = arith.constant 0 : i32
    %0 = arith.cmpi eq, %arg1, %c0_i32 : i32
    %1 = arith.extui %0 : i1 to i32
    %c0_i32_0 = arith.constant 0 : i32
    %2 = arith.cmpi ne, %1, %c0_i32_0 : i32
    scf.if %2 {
      %cst = arith.constant 0.000000e+00 : f32
      %11 = vector.broadcast %cst : f32 to vector<2x128xf32>
      %c0_6 = arith.constant 0 : index
      %c0_7 = arith.constant 0 : index
      %12 = vector.load %arg5[%c0_6, %c0_7] : memref<2x128xf32, #tpu.memory_space<vmem>>, vector<2x128xf32>
      tpu.vector_store %arg5[%c0_6, %c0_7], %11 {strides = array<i32>} : memref<2x128xf32, #tpu.memory_space<vmem>>, vector<2x128xf32>,
      %cst_8 = arith.constant 0.000000e+00 : f32
      %13 = vector.broadcast %cst_8 : f32 to vector<2x128xf32>
      %c0_9 = arith.constant 0 : index
      %c0_10 = arith.constant 0 : index
      %14 = vector.load %arg6[%c0_9, %c0_10] : memref<2x128xf32, #tpu.memory_space<vmem>>, vector<2x128xf32>
      tpu.vector_store %arg6[%c0_9, %c0_10], %13 {strides = array<i32>} : memref<2x128xf32, #tpu.memory_space<vmem>>, vector<2x128xf32>,
    } else {
    }
    %c0 = arith.constant 0 : index
    %c0_1 = arith.constant 0 : index
    %c0_2 = arith.constant 0 : index
    %3 = vector.load %arg3[%c0, %c0_1, %c0_2] : memref<1x128x512xf32, #tpu.memory_space<vmem>>, vector<1x128x512xf32>
    %4 = vector.shape_cast %3 : vector<1x128x512xf32> to vector<128x512xf32>
    %c0_i32_3 = arith.constant 0 : i32
    %5 = arith.cmpi eq, %arg0, %c0_i32_3 : i32
    %6 = arith.extui %5 : i1 to i32
    %c0_i32_4 = arith.constant 0 : i32
    %7 = arith.cmpi ne, %6, %c0_i32_4 : i32
    scf.if %7 {
      %c0_6 = arith.constant 0 : index
      %c0_7 = arith.constant 0 : index
      %11 = vector.load %arg5[%c0_6, %c0_7] : memref<2x128xf32, #tpu.memory_space<vmem>>, vector<2x128xf32>
      %c0_8 = arith.constant 0 : index
      %c0_9 = arith.constant 0 : index
      %12 = vector.load %arg6[%c0_8, %c0_9] : memref<2x128xf32, #tpu.memory_space<vmem>>, vector<2x128xf32>
      %c0_10 = arith.constant 0 : index
      %c0_11 = arith.constant 0 : index
      %c0_12 = arith.constant 0 : index
      %13 = vector.load %arg2[%c0_10, %c0_11, %c0_12] : memref<4x2x512xf32, #tpu.memory_space<vmem>>, vector<1x2x512xf32>
      %14 = vector.shape_cast %13 : vector<1x2x512xf32> to vector<2x512xf32>
      %cst = arith.constant dense<0.000000e+00> : vector<2x512xf32>
      %15 = tpu.matmul %11, %4, %cst {dimension_numbers = #tpu.dot_dimension_numbers<[1], [0], [0], [1], [0, 0, 1, 1], [], []>} : vector<2x128xf32>, vector<128x512xf32>, vector<2x512xf32> -> vector<2x512xf32>
      %16 = arith.addf %14, %15 : vector<2x512xf32>
      %17 = vector.extract_strided_slice %16 {offsets = [0, 0], sizes = [2, 128], strides = [1, 1]} : vector<2x512xf32> to vector<2x128xf32>
      %18 = arith.negf %17 : vector<2x128xf32>
      %19 = math.exp %18 : vector<2x128xf32>
      %cst_13 = arith.constant 1.000000e+00 : f32
      %20 = vector.broadcast %cst_13 : f32 to vector<2x128xf32>
      %21 = arith.addf %20, %19 : vector<2x128xf32>
      %22 = arith.divf %20, %21 : vector<2x128xf32>
      %23 = vector.extract_strided_slice %16 {offsets = [0, 128], sizes = [2, 128], strides = [1, 1]} : vector<2x512xf32> to vector<2x128xf32>
      %24 = arith.negf %23 : vector<2x128xf32>
      %25 = math.exp %24 : vector<2x128xf32>
      %cst_14 = arith.constant 1.000000e+00 : f32
      %26 = vector.broadcast %cst_14 : f32 to vector<2x128xf32>
      %27 = arith.addf %26, %25 : vector<2x128xf32>
      %28 = arith.divf %26, %27 : vector<2x128xf32>
      %29 = vector.extract_strided_slice %16 {offsets = [0, 256], sizes = [2, 128], strides = [1, 1]} : vector<2x512xf32> to vector<2x128xf32>
      %30 = math.tanh %29 : vector<2x128xf32>
      %31 = vector.extract_strided_slice %16 {offsets = [0, 384], sizes = [2, 128], strides = [1, 1]} : vector<2x512xf32> to vector<2x128xf32>
      %32 = arith.negf %31 : vector<2x128xf32>
      %33 = math.exp %32 : vector<2x128xf32>
      %cst_15 = arith.constant 1.000000e+00 : f32
      %34 = vector.broadcast %cst_15 : f32 to vector<2x128xf32>
      %35 = arith.addf %34, %33 : vector<2x128xf32>
      %36 = arith.divf %34, %35 : vector<2x128xf32>
      %37 = arith.mulf %28, %12 : vector<2x128xf32>
      %38 = arith.mulf %22, %30 : vector<2x128xf32>
      %39 = arith.addf %37, %38 : vector<2x128xf32>
      %40 = math.tanh %39 : vector<2x128xf32>
      %41 = arith.mulf %36, %40 : vector<2x128xf32>
      %c0_16 = arith.constant 0 : index
      %c0_17 = arith.constant 0 : index
      %c0_18 = arith.constant 0 : index
      %c0_19 = arith.constant 0 : index
      %42 = vector.load %arg4[%c0_16, %c0_17, %c0_18, %c0_19] : memref<1x4x2x128xf32, #tpu.memory_space<vmem>>, vector<1x1x2x128xf32>
      %43 = vector.shape_cast %42 : vector<1x1x2x128xf32> to vector<2x128xf32>
      %44 = vector.shape_cast %41 : vector<2x128xf32> to vector<1x1x2x128xf32>
      tpu.vector_store %arg4[%c0_16, %c0_17, %c0_18, %c0_19], %44 {strides = array<i32>} : memref<1x4x2x128xf32, #tpu.memory_space<vmem>>, vector<1x1x2x128xf32>,
      %c1 = arith.constant 1 : index
      %c0_20 = arith.constant 0 : index
      %c0_21 = arith.constant 0 : index
      %45 = vector.load %arg2[%c1, %c0_20, %c0_21] : memref<4x2x512xf32, #tpu.memory_space<vmem>>, vector<1x2x512xf32>
      %46 = vector.shape_cast %45 : vector<1x2x512xf32> to vector<2x512xf32>
      %cst_22 = arith.constant dense<0.000000e+00> : vector<2x512xf32>
      %47 = tpu.matmul %41, %4, %cst_22 {dimension_numbers = #tpu.dot_dimension_numbers<[1], [0], [0], [1], [0, 0, 1, 1], [], []>} : vector<2x128xf32>, vector<128x512xf32>, vector<2x512xf32> -> vector<2x512xf32>
      %48 = arith.addf %46, %47 : vector<2x512xf32>
      %49 = vector.extract_strided_slice %48 {offsets = [0, 0], sizes = [2, 128], strides = [1, 1]} : vector<2x512xf32> to vector<2x128xf32>
      %50 = arith.negf %49 : vector<2x128xf32>
      %51 = math.exp %50 : vector<2x128xf32>
      %cst_23 = arith.constant 1.000000e+00 : f32
      %52 = vector.broadcast %cst_23 : f32 to vector<2x128xf32>
      %53 = arith.addf %52, %51 : vector<2x128xf32>
      %54 = arith.divf %52, %53 : vector<2x128xf32>
      %55 = vector.extract_strided_slice %48 {offsets = [0, 128], sizes = [2, 128], strides = [1, 1]} : vector<2x512xf32> to vector<2x128xf32>
      %56 = arith.negf %55 : vector<2x128xf32>
      %57 = math.exp %56 : vector<2x128xf32>
      %cst_24 = arith.constant 1.000000e+00 : f32
      %58 = vector.broadcast %cst_24 : f32 to vector<2x128xf32>
      %59 = arith.addf %58, %57 : vector<2x128xf32>
      %60 = arith.divf %58, %59 : vector<2x128xf32>
      %61 = vector.extract_strided_slice %48 {offsets = [0, 256], sizes = [2, 128], strides = [1, 1]} : vector<2x512xf32> to vector<2x128xf32>
      %62 = math.tanh %61 : vector<2x128xf32>
      %63 = vector.extract_strided_slice %48 {offsets = [0, 384], sizes = [2, 128], strides = [1, 1]} : vector<2x512xf32> to vector<2x128xf32>
      %64 = arith.negf %63 : vector<2x128xf32>
      %65 = math.exp %64 : vector<2x128xf32>
      %cst_25 = arith.constant 1.000000e+00 : f32
      %66 = vector.broadcast %cst_25 : f32 to vector<2x128xf32>
      %67 = arith.addf %66, %65 : vector<2x128xf32>
      %68 = arith.divf %66, %67 : vector<2x128xf32>
      %69 = arith.mulf %60, %39 : vector<2x128xf32>
      %70 = arith.mulf %54, %62 : vector<2x128xf32>
      %71 = arith.addf %69, %70 : vector<2x128xf32>
      %72 = math.tanh %71 : vector<2x128xf32>
      %73 = arith.mulf %68, %72 : vector<2x128xf32>
      %c0_26 = arith.constant 0 : index
      %c1_27 = arith.constant 1 : index
      %c0_28 = arith.constant 0 : index
      %c0_29 = arith.constant 0 : index
      %74 = vector.load %arg4[%c0_26, %c1_27, %c0_28, %c0_29] : memref<1x4x2x128xf32, #tpu.memory_space<vmem>>, vector<1x1x2x128xf32>
      %75 = vector.shape_cast %74 : vector<1x1x2x128xf32> to vector<2x128xf32>
      %76 = vector.shape_cast %73 : vector<2x128xf32> to vector<1x1x2x128xf32>
      tpu.vector_store %arg4[%c0_26, %c1_27, %c0_28, %c0_29], %76 {strides = array<i32>} : memref<1x4x2x128xf32, #tpu.memory_space<vmem>>, vector<1x1x2x128xf32>,
      %c2 = arith.constant 2 : index
      %c0_30 = arith.constant 0 : index
      %c0_31 = arith.constant 0 : index
      %77 = vector.load %arg2[%c2, %c0_30, %c0_31] : memref<4x2x512xf32, #tpu.memory_space<vmem>>, vector<1x2x512xf32>
      %78 = vector.shape_cast %77 : vector<1x2x512xf32> to vector<2x512xf32>
      %cst_32 = arith.constant dense<0.000000e+00> : vector<2x512xf32>
      %79 = tpu.matmul %73, %4, %cst_32 {dimension_numbers = #tpu.dot_dimension_numbers<[1], [0], [0], [1], [0, 0, 1, 1], [], []>} : vector<2x128xf32>, vector<128x512xf32>, vector<2x512xf32> -> vector<2x512xf32>
      %80 = arith.addf %78, %79 : vector<2x512xf32>
      %81 = vector.extract_strided_slice %80 {offsets = [0, 0], sizes = [2, 128], strides = [1, 1]} : vector<2x512xf32> to vector<2x128xf32>
      %82 = arith.negf %81 : vector<2x128xf32>
      %83 = math.exp %82 : vector<2x128xf32>
      %cst_33 = arith.constant 1.000000e+00 : f32
      %84 = vector.broadcast %cst_33 : f32 to vector<2x128xf32>
      %85 = arith.addf %84, %83 : vector<2x128xf32>
      %86 = arith.divf %84, %85 : vector<2x128xf32>
      %87 = vector.extract_strided_slice %80 {offsets = [0, 128], sizes = [2, 128], strides = [1, 1]} : vector<2x512xf32> to vector<2x128xf32>
      %88 = arith.negf %87 : vector<2x128xf32>
      %89 = math.exp %88 : vector<2x128xf32>
      %cst_34 = arith.constant 1.000000e+00 : f32
      %90 = vector.broadcast %cst_34 : f32 to vector<2x128xf32>
      %91 = arith.addf %90, %89 : vector<2x128xf32>
      %92 = arith.divf %90, %91 : vector<2x128xf32>
      %93 = vector.extract_strided_slice %80 {offsets = [0, 256], sizes = [2, 128], strides = [1, 1]} : vector<2x512xf32> to vector<2x128xf32>
      %94 = math.tanh %93 : vector<2x128xf32>
      %95 = vector.extract_strided_slice %80 {offsets = [0, 384], sizes = [2, 128], strides = [1, 1]} : vector<2x512xf32> to vector<2x128xf32>
      %96 = arith.negf %95 : vector<2x128xf32>
      %97 = math.exp %96 : vector<2x128xf32>
      %cst_35 = arith.constant 1.000000e+00 : f32
      %98 = vector.broadcast %cst_35 : f32 to vector<2x128xf32>
      %99 = arith.addf %98, %97 : vector<2x128xf32>
      %100 = arith.divf %98, %99 : vector<2x128xf32>
      %101 = arith.mulf %92, %71 : vector<2x128xf32>
      %102 = arith.mulf %86, %94 : vector<2x128xf32>
      %103 = arith.addf %101, %102 : vector<2x128xf32>
      %104 = math.tanh %103 : vector<2x128xf32>
      %105 = arith.mulf %100, %104 : vector<2x128xf32>
      %c0_36 = arith.constant 0 : index
      %c2_37 = arith.constant 2 : index
      %c0_38 = arith.constant 0 : index
      %c0_39 = arith.constant 0 : index
      %106 = vector.load %arg4[%c0_36, %c2_37, %c0_38, %c0_39] : memref<1x4x2x128xf32, #tpu.memory_space<vmem>>, vector<1x1x2x128xf32>
      %107 = vector.shape_cast %106 : vector<1x1x2x128xf32> to vector<2x128xf32>
      %108 = vector.shape_cast %105 : vector<2x128xf32> to vector<1x1x2x128xf32>
      tpu.vector_store %arg4[%c0_36, %c2_37, %c0_38, %c0_39], %108 {strides = array<i32>} : memref<1x4x2x128xf32, #tpu.memory_space<vmem>>, vector<1x1x2x128xf32>,
      %c3 = arith.constant 3 : index
      %c0_40 = arith.constant 0 : index
      %c0_41 = arith.constant 0 : index
      %109 = vector.load %arg2[%c3, %c0_40, %c0_41] : memref<4x2x512xf32, #tpu.memory_space<vmem>>, vector<1x2x512xf32>
      %110 = vector.shape_cast %109 : vector<1x2x512xf32> to vector<2x512xf32>
      %cst_42 = arith.constant dense<0.000000e+00> : vector<2x512xf32>
      %111 = tpu.matmul %105, %4, %cst_42 {dimension_numbers = #tpu.dot_dimension_numbers<[1], [0], [0], [1], [0, 0, 1, 1], [], []>} : vector<2x128xf32>, vector<128x512xf32>, vector<2x512xf32> -> vector<2x512xf32>
      %112 = arith.addf %110, %111 : vector<2x512xf32>
      %113 = vector.extract_strided_slice %112 {offsets = [0, 0], sizes = [2, 128], strides = [1, 1]} : vector<2x512xf32> to vector<2x128xf32>
      %114 = arith.negf %113 : vector<2x128xf32>
      %115 = math.exp %114 : vector<2x128xf32>
      %cst_43 = arith.constant 1.000000e+00 : f32
      %116 = vector.broadcast %cst_43 : f32 to vector<2x128xf32>
      %117 = arith.addf %116, %115 : vector<2x128xf32>
      %118 = arith.divf %116, %117 : vector<2x128xf32>
      %119 = vector.extract_strided_slice %112 {offsets = [0, 128], sizes = [2, 128], strides = [1, 1]} : vector<2x512xf32> to vector<2x128xf32>
      %120 = arith.negf %119 : vector<2x128xf32>
      %121 = math.exp %120 : vector<2x128xf32>
      %cst_44 = arith.constant 1.000000e+00 : f32
      %122 = vector.broadcast %cst_44 : f32 to vector<2x128xf32>
      %123 = arith.addf %122, %121 : vector<2x128xf32>
      %124 = arith.divf %122, %123 : vector<2x128xf32>
      %125 = vector.extract_strided_slice %112 {offsets = [0, 256], sizes = [2, 128], strides = [1, 1]} : vector<2x512xf32> to vector<2x128xf32>
      %126 = math.tanh %125 : vector<2x128xf32>
      %127 = vector.extract_strided_slice %112 {offsets = [0, 384], sizes = [2, 128], strides = [1, 1]} : vector<2x512xf32> to vector<2x128xf32>
      %128 = arith.negf %127 : vector<2x128xf32>
      %129 = math.exp %128 : vector<2x128xf32>
      %cst_45 = arith.constant 1.000000e+00 : f32
      %130 = vector.broadcast %cst_45 : f32 to vector<2x128xf32>
      %131 = arith.addf %130, %129 : vector<2x128xf32>
      %132 = arith.divf %130, %131 : vector<2x128xf32>
      %133 = arith.mulf %124, %103 : vector<2x128xf32>
      %134 = arith.mulf %118, %126 : vector<2x128xf32>
      %135 = arith.addf %133, %134 : vector<2x128xf32>
      %136 = math.tanh %135 : vector<2x128xf32>
      %137 = arith.mulf %132, %136 : vector<2x128xf32>
      %c0_46 = arith.constant 0 : index
      %c3_47 = arith.constant 3 : index
      %c0_48 = arith.constant 0 : index
      %c0_49 = arith.constant 0 : index
      %138 = vector.load %arg4[%c0_46, %c3_47, %c0_48, %c0_49] : memref<1x4x2x128xf32, #tpu.memory_space<vmem>>, vector<1x1x2x128xf32>
      %139 = vector.shape_cast %138 : vector<1x1x2x128xf32> to vector<2x128xf32>
      %140 = vector.shape_cast %137 : vector<2x128xf32> to vector<1x1x2x128xf32>
      tpu.vector_store %arg4[%c0_46, %c3_47, %c0_48, %c0_49], %140 {strides = array<i32>} : memref<1x4x2x128xf32, #tpu.memory_space<vmem>>, vector<1x1x2x128xf32>,
      %c0_50 = arith.constant 0 : index
      %c0_51 = arith.constant 0 : index
      %141 = vector.load %arg5[%c0_50, %c0_51] : memref<2x128xf32, #tpu.memory_space<vmem>>, vector<2x128xf32>
      tpu.vector_store %arg5[%c0_50, %c0_51], %137 {strides = array<i32>} : memref<2x128xf32, #tpu.memory_space<vmem>>, vector<2x128xf32>,
      %c0_52 = arith.constant 0 : index
      %c0_53 = arith.constant 0 : index
      %142 = vector.load %arg6[%c0_52, %c0_53] : memref<2x128xf32, #tpu.memory_space<vmem>>, vector<2x128xf32>
      tpu.vector_store %arg6[%c0_52, %c0_53], %135 {strides = array<i32>} : memref<2x128xf32, #tpu.memory_space<vmem>>, vector<2x128xf32>,
    } else {
    }
    %c1_i32 = arith.constant 1 : i32
    %8 = arith.cmpi eq, %arg0, %c1_i32 : i32
    %9 = arith.extui %8 : i1 to i32
    %c0_i32_5 = arith.constant 0 : i32
    %10 = arith.cmpi ne, %9, %c0_i32_5 : i32
    scf.if %10 {
      %c0_6 = arith.constant 0 : index
      %c0_7 = arith.constant 0 : index
      %11 = vector.load %arg5[%c0_6, %c0_7] : memref<2x128xf32, #tpu.memory_space<vmem>>, vector<2x128xf32>
      %c0_8 = arith.constant 0 : index
      %c0_9 = arith.constant 0 : index
      %12 = vector.load %arg6[%c0_8, %c0_9] : memref<2x128xf32, #tpu.memory_space<vmem>>, vector<2x128xf32>
      %c3 = arith.constant 3 : index
      %c0_10 = arith.constant 0 : index
      %c0_11 = arith.constant 0 : index
      %13 = vector.load %arg2[%c3, %c0_10, %c0_11] : memref<4x2x512xf32, #tpu.memory_space<vmem>>, vector<1x2x512xf32>
      %14 = vector.shape_cast %13 : vector<1x2x512xf32> to vector<2x512xf32>
      %cst = arith.constant dense<0.000000e+00> : vector<2x512xf32>
      %15 = tpu.matmul %11, %4, %cst {dimension_numbers = #tpu.dot_dimension_numbers<[1], [0], [0], [1], [0, 0, 1, 1], [], []>} : vector<2x128xf32>, vector<128x512xf32>, vector<2x512xf32> -> vector<2x512xf32>
      %16 = arith.addf %14, %15 : vector<2x512xf32>
      %17 = vector.extract_strided_slice %16 {offsets = [0, 0], sizes = [2, 128], strides = [1, 1]} : vector<2x512xf32> to vector<2x128xf32>
      %18 = arith.negf %17 : vector<2x128xf32>
      %19 = math.exp %18 : vector<2x128xf32>
      %cst_12 = arith.constant 1.000000e+00 : f32
      %20 = vector.broadcast %cst_12 : f32 to vector<2x128xf32>
      %21 = arith.addf %20, %19 : vector<2x128xf32>
      %22 = arith.divf %20, %21 : vector<2x128xf32>
      %23 = vector.extract_strided_slice %16 {offsets = [0, 128], sizes = [2, 128], strides = [1, 1]} : vector<2x512xf32> to vector<2x128xf32>
      %24 = arith.negf %23 : vector<2x128xf32>
      %25 = math.exp %24 : vector<2x128xf32>
      %cst_13 = arith.constant 1.000000e+00 : f32
      %26 = vector.broadcast %cst_13 : f32 to vector<2x128xf32>
      %27 = arith.addf %26, %25 : vector<2x128xf32>
      %28 = arith.divf %26, %27 : vector<2x128xf32>
      %29 = vector.extract_strided_slice %16 {offsets = [0, 256], sizes = [2, 128], strides = [1, 1]} : vector<2x512xf32> to vector<2x128xf32>
      %30 = math.tanh %29 : vector<2x128xf32>
      %31 = vector.extract_strided_slice %16 {offsets = [0, 384], sizes = [2, 128], strides = [1, 1]} : vector<2x512xf32> to vector<2x128xf32>
      %32 = arith.negf %31 : vector<2x128xf32>
      %33 = math.exp %32 : vector<2x128xf32>
      %cst_14 = arith.constant 1.000000e+00 : f32
      %34 = vector.broadcast %cst_14 : f32 to vector<2x128xf32>
      %35 = arith.addf %34, %33 : vector<2x128xf32>
      %36 = arith.divf %34, %35 : vector<2x128xf32>
      %37 = arith.mulf %28, %12 : vector<2x128xf32>
      %38 = arith.mulf %22, %30 : vector<2x128xf32>
      %39 = arith.addf %37, %38 : vector<2x128xf32>
      %40 = math.tanh %39 : vector<2x128xf32>
      %41 = arith.mulf %36, %40 : vector<2x128xf32>
      %c0_15 = arith.constant 0 : index
      %c3_16 = arith.constant 3 : index
      %c0_17 = arith.constant 0 : index
      %c0_18 = arith.constant 0 : index
      %42 = vector.load %arg4[%c0_15, %c3_16, %c0_17, %c0_18] : memref<1x4x2x128xf32, #tpu.memory_space<vmem>>, vector<1x1x2x128xf32>
      %43 = vector.shape_cast %42 : vector<1x1x2x128xf32> to vector<2x128xf32>
      %44 = vector.shape_cast %41 : vector<2x128xf32> to vector<1x1x2x128xf32>
      tpu.vector_store %arg4[%c0_15, %c3_16, %c0_17, %c0_18], %44 {strides = array<i32>} : memref<1x4x2x128xf32, #tpu.memory_space<vmem>>, vector<1x1x2x128xf32>,
      %c2 = arith.constant 2 : index
      %c0_19 = arith.constant 0 : index
      %c0_20 = arith.constant 0 : index
      %45 = vector.load %arg2[%c2, %c0_19, %c0_20] : memref<4x2x512xf32, #tpu.memory_space<vmem>>, vector<1x2x512xf32>
      %46 = vector.shape_cast %45 : vector<1x2x512xf32> to vector<2x512xf32>
      %cst_21 = arith.constant dense<0.000000e+00> : vector<2x512xf32>
      %47 = tpu.matmul %41, %4, %cst_21 {dimension_numbers = #tpu.dot_dimension_numbers<[1], [0], [0], [1], [0, 0, 1, 1], [], []>} : vector<2x128xf32>, vector<128x512xf32>, vector<2x512xf32> -> vector<2x512xf32>
      %48 = arith.addf %46, %47 : vector<2x512xf32>
      %49 = vector.extract_strided_slice %48 {offsets = [0, 0], sizes = [2, 128], strides = [1, 1]} : vector<2x512xf32> to vector<2x128xf32>
      %50 = arith.negf %49 : vector<2x128xf32>
      %51 = math.exp %50 : vector<2x128xf32>
      %cst_22 = arith.constant 1.000000e+00 : f32
      %52 = vector.broadcast %cst_22 : f32 to vector<2x128xf32>
      %53 = arith.addf %52, %51 : vector<2x128xf32>
      %54 = arith.divf %52, %53 : vector<2x128xf32>
      %55 = vector.extract_strided_slice %48 {offsets = [0, 128], sizes = [2, 128], strides = [1, 1]} : vector<2x512xf32> to vector<2x128xf32>
      %56 = arith.negf %55 : vector<2x128xf32>
      %57 = math.exp %56 : vector<2x128xf32>
      %cst_23 = arith.constant 1.000000e+00 : f32
      %58 = vector.broadcast %cst_23 : f32 to vector<2x128xf32>
      %59 = arith.addf %58, %57 : vector<2x128xf32>
      %60 = arith.divf %58, %59 : vector<2x128xf32>
      %61 = vector.extract_strided_slice %48 {offsets = [0, 256], sizes = [2, 128], strides = [1, 1]} : vector<2x512xf32> to vector<2x128xf32>
      %62 = math.tanh %61 : vector<2x128xf32>
      %63 = vector.extract_strided_slice %48 {offsets = [0, 384], sizes = [2, 128], strides = [1, 1]} : vector<2x512xf32> to vector<2x128xf32>
      %64 = arith.negf %63 : vector<2x128xf32>
      %65 = math.exp %64 : vector<2x128xf32>
      %cst_24 = arith.constant 1.000000e+00 : f32
      %66 = vector.broadcast %cst_24 : f32 to vector<2x128xf32>
      %67 = arith.addf %66, %65 : vector<2x128xf32>
      %68 = arith.divf %66, %67 : vector<2x128xf32>
      %69 = arith.mulf %60, %39 : vector<2x128xf32>
      %70 = arith.mulf %54, %62 : vector<2x128xf32>
      %71 = arith.addf %69, %70 : vector<2x128xf32>
      %72 = math.tanh %71 : vector<2x128xf32>
      %73 = arith.mulf %68, %72 : vector<2x128xf32>
      %c0_25 = arith.constant 0 : index
      %c2_26 = arith.constant 2 : index
      %c0_27 = arith.constant 0 : index
      %c0_28 = arith.constant 0 : index
      %74 = vector.load %arg4[%c0_25, %c2_26, %c0_27, %c0_28] : memref<1x4x2x128xf32, #tpu.memory_space<vmem>>, vector<1x1x2x128xf32>
      %75 = vector.shape_cast %74 : vector<1x1x2x128xf32> to vector<2x128xf32>
      %76 = vector.shape_cast %73 : vector<2x128xf32> to vector<1x1x2x128xf32>
      tpu.vector_store %arg4[%c0_25, %c2_26, %c0_27, %c0_28], %76 {strides = array<i32>} : memref<1x4x2x128xf32, #tpu.memory_space<vmem>>, vector<1x1x2x128xf32>,
      %c1 = arith.constant 1 : index
      %c0_29 = arith.constant 0 : index
      %c0_30 = arith.constant 0 : index
      %77 = vector.load %arg2[%c1, %c0_29, %c0_30] : memref<4x2x512xf32, #tpu.memory_space<vmem>>, vector<1x2x512xf32>
      %78 = vector.shape_cast %77 : vector<1x2x512xf32> to vector<2x512xf32>
      %cst_31 = arith.constant dense<0.000000e+00> : vector<2x512xf32>
      %79 = tpu.matmul %73, %4, %cst_31 {dimension_numbers = #tpu.dot_dimension_numbers<[1], [0], [0], [1], [0, 0, 1, 1], [], []>} : vector<2x128xf32>, vector<128x512xf32>, vector<2x512xf32> -> vector<2x512xf32>
      %80 = arith.addf %78, %79 : vector<2x512xf32>
      %81 = vector.extract_strided_slice %80 {offsets = [0, 0], sizes = [2, 128], strides = [1, 1]} : vector<2x512xf32> to vector<2x128xf32>
      %82 = arith.negf %81 : vector<2x128xf32>
      %83 = math.exp %82 : vector<2x128xf32>
      %cst_32 = arith.constant 1.000000e+00 : f32
      %84 = vector.broadcast %cst_32 : f32 to vector<2x128xf32>
      %85 = arith.addf %84, %83 : vector<2x128xf32>
      %86 = arith.divf %84, %85 : vector<2x128xf32>
      %87 = vector.extract_strided_slice %80 {offsets = [0, 128], sizes = [2, 128], strides = [1, 1]} : vector<2x512xf32> to vector<2x128xf32>
      %88 = arith.negf %87 : vector<2x128xf32>
      %89 = math.exp %88 : vector<2x128xf32>
      %cst_33 = arith.constant 1.000000e+00 : f32
      %90 = vector.broadcast %cst_33 : f32 to vector<2x128xf32>
      %91 = arith.addf %90, %89 : vector<2x128xf32>
      %92 = arith.divf %90, %91 : vector<2x128xf32>
      %93 = vector.extract_strided_slice %80 {offsets = [0, 256], sizes = [2, 128], strides = [1, 1]} : vector<2x512xf32> to vector<2x128xf32>
      %94 = math.tanh %93 : vector<2x128xf32>
      %95 = vector.extract_strided_slice %80 {offsets = [0, 384], sizes = [2, 128], strides = [1, 1]} : vector<2x512xf32> to vector<2x128xf32>
      %96 = arith.negf %95 : vector<2x128xf32>
      %97 = math.exp %96 : vector<2x128xf32>
      %cst_34 = arith.constant 1.000000e+00 : f32
      %98 = vector.broadcast %cst_34 : f32 to vector<2x128xf32>
      %99 = arith.addf %98, %97 : vector<2x128xf32>
      %100 = arith.divf %98, %99 : vector<2x128xf32>
      %101 = arith.mulf %92, %71 : vector<2x128xf32>
      %102 = arith.mulf %86, %94 : vector<2x128xf32>
      %103 = arith.addf %101, %102 : vector<2x128xf32>
      %104 = math.tanh %103 : vector<2x128xf32>
      %105 = arith.mulf %100, %104 : vector<2x128xf32>
      %c0_35 = arith.constant 0 : index
      %c1_36 = arith.constant 1 : index
      %c0_37 = arith.constant 0 : index
      %c0_38 = arith.constant 0 : index
      %106 = vector.load %arg4[%c0_35, %c1_36, %c0_37, %c0_38] : memref<1x4x2x128xf32, #tpu.memory_space<vmem>>, vector<1x1x2x128xf32>
      %107 = vector.shape_cast %106 : vector<1x1x2x128xf32> to vector<2x128xf32>
      %108 = vector.shape_cast %105 : vector<2x128xf32> to vector<1x1x2x128xf32>
      tpu.vector_store %arg4[%c0_35, %c1_36, %c0_37, %c0_38], %108 {strides = array<i32>} : memref<1x4x2x128xf32, #tpu.memory_space<vmem>>, vector<1x1x2x128xf32>,
      %c0_39 = arith.constant 0 : index
      %c0_40 = arith.constant 0 : index
      %c0_41 = arith.constant 0 : index
      %109 = vector.load %arg2[%c0_39, %c0_40, %c0_41] : memref<4x2x512xf32, #tpu.memory_space<vmem>>, vector<1x2x512xf32>
      %110 = vector.shape_cast %109 : vector<1x2x512xf32> to vector<2x512xf32>
      %cst_42 = arith.constant dense<0.000000e+00> : vector<2x512xf32>
      %111 = tpu.matmul %105, %4, %cst_42 {dimension_numbers = #tpu.dot_dimension_numbers<[1], [0], [0], [1], [0, 0, 1, 1], [], []>} : vector<2x128xf32>, vector<128x512xf32>, vector<2x512xf32> -> vector<2x512xf32>
      %112 = arith.addf %110, %111 : vector<2x512xf32>
      %113 = vector.extract_strided_slice %112 {offsets = [0, 0], sizes = [2, 128], strides = [1, 1]} : vector<2x512xf32> to vector<2x128xf32>
      %114 = arith.negf %113 : vector<2x128xf32>
      %115 = math.exp %114 : vector<2x128xf32>
      %cst_43 = arith.constant 1.000000e+00 : f32
      %116 = vector.broadcast %cst_43 : f32 to vector<2x128xf32>
      %117 = arith.addf %116, %115 : vector<2x128xf32>
      %118 = arith.divf %116, %117 : vector<2x128xf32>
      %119 = vector.extract_strided_slice %112 {offsets = [0, 128], sizes = [2, 128], strides = [1, 1]} : vector<2x512xf32> to vector<2x128xf32>
      %120 = arith.negf %119 : vector<2x128xf32>
      %121 = math.exp %120 : vector<2x128xf32>
      %cst_44 = arith.constant 1.000000e+00 : f32
      %122 = vector.broadcast %cst_44 : f32 to vector<2x128xf32>
      %123 = arith.addf %122, %121 : vector<2x128xf32>
      %124 = arith.divf %122, %123 : vector<2x128xf32>
      %125 = vector.extract_strided_slice %112 {offsets = [0, 256], sizes = [2, 128], strides = [1, 1]} : vector<2x512xf32> to vector<2x128xf32>
      %126 = math.tanh %125 : vector<2x128xf32>
      %127 = vector.extract_strided_slice %112 {offsets = [0, 384], sizes = [2, 128], strides = [1, 1]} : vector<2x512xf32> to vector<2x128xf32>
      %128 = arith.negf %127 : vector<2x128xf32>
      %129 = math.exp %128 : vector<2x128xf32>
      %cst_45 = arith.constant 1.000000e+00 : f32
      %130 = vector.broadcast %cst_45 : f32 to vector<2x128xf32>
      %131 = arith.addf %130, %129 : vector<2x128xf32>
      %132 = arith.divf %130, %131 : vector<2x128xf32>
      %133 = arith.mulf %124, %103 : vector<2x128xf32>
      %134 = arith.mulf %118, %126 : vector<2x128xf32>
      %135 = arith.addf %133, %134 : vector<2x128xf32>
      %136 = math.tanh %135 : vector<2x128xf32>
      %137 = arith.mulf %132, %136 : vector<2x128xf32>
      %c0_46 = arith.constant 0 : index
      %c0_47 = arith.constant 0 : index
      %c0_48 = arith.constant 0 : index
      %c0_49 = arith.constant 0 : index
      %138 = vector.load %arg4[%c0_46, %c0_47, %c0_48, %c0_49] : memref<1x4x2x128xf32, #tpu.memory_space<vmem>>, vector<1x1x2x128xf32>
      %139 = vector.shape_cast %138 : vector<1x1x2x128xf32> to vector<2x128xf32>
      %140 = vector.shape_cast %137 : vector<2x128xf32> to vector<1x1x2x128xf32>
      tpu.vector_store %arg4[%c0_46, %c0_47, %c0_48, %c0_49], %140 {strides = array<i32>} : memref<1x4x2x128xf32, #tpu.memory_space<vmem>>, vector<1x1x2x128xf32>,
      %c0_50 = arith.constant 0 : index
      %c0_51 = arith.constant 0 : index
      %141 = vector.load %arg5[%c0_50, %c0_51] : memref<2x128xf32, #tpu.memory_space<vmem>>, vector<2x128xf32>
      tpu.vector_store %arg5[%c0_50, %c0_51], %137 {strides = array<i32>} : memref<2x128xf32, #tpu.memory_space<vmem>>, vector<2x128xf32>,
      %c0_52 = arith.constant 0 : index
      %c0_53 = arith.constant 0 : index
      %142 = vector.load %arg6[%c0_52, %c0_53] : memref<2x128xf32, #tpu.memory_space<vmem>>, vector<2x128xf32>
      tpu.vector_store %arg6[%c0_52, %c0_53], %135 {strides = array<i32>} : memref<2x128xf32, #tpu.memory_space<vmem>>, vector<2x128xf32>,
    } else {
    }
    return
  }
  func.func @transform_0(%arg0: i32, %arg1: i32) -> (i32, i32, i32) {
    %c1_i32 = arith.constant 1 : i32
    %0 = arith.muli %arg0, %c1_i32 : i32
    %c2_i32 = arith.constant 2 : i32
    %1 = arith.muli %c2_i32, %arg0 : i32
    %c1_i32_0 = arith.constant 1 : i32
    %2 = arith.subi %c1_i32_0, %1 : i32
    %3 = arith.muli %2, %arg1 : i32
    %4 = arith.addi %0, %3 : i32
    %c0_i32 = arith.constant 0 : i32
    %c0_i32_1 = arith.constant 0 : i32
    return %4, %c0_i32, %arg0 : i32, i32, i32
  }
  func.func @transform_1(%arg0: i32, %arg1: i32) -> (i32, i32, i32) {
    %c0_i32 = arith.constant 0 : i32
    %c0_i32_0 = arith.constant 0 : i32
    %c0_i32_1 = arith.constant 0 : i32
    return %arg0, %c0_i32, %c0_i32_0 : i32, i32, i32
  }
  func.func @transform_2(%arg0: i32, %arg1: i32) -> (i32, i32, i32, i32) {
    %c1_i32 = arith.constant 1 : i32
    %0 = arith.muli %arg0, %c1_i32 : i32
    %c2_i32 = arith.constant 2 : i32
    %1 = arith.muli %c2_i32, %arg0 : i32
    %c1_i32_0 = arith.constant 1 : i32
    %2 = arith.subi %c1_i32_0, %1 : i32
    %3 = arith.muli %2, %arg1 : i32
    %4 = arith.addi %0, %3 : i32
    %c0_i32 = arith.constant 0 : i32
    %c0_i32_1 = arith.constant 0 : i32
    %c0_i32_2 = arith.constant 0 : i32
    return %arg0, %4, %c0_i32, %c0_i32_1 : i32, i32, i32, i32
  }
}

module attributes {stable_mosaic.version = 11 : i64} {
  func.func @_emb_kernel(%arg0: i32, %arg1: memref<1x16x128xf32, #tpu.memory_space<vmem>>, %arg2: memref<1x16x128xf32, #tpu.memory_space<vmem>>, %arg3: memref<128x16xf32, #tpu.memory_space<vmem>>, %arg4: memref<128x16xf32, #tpu.memory_space<vmem>>, %arg5: memref<1x16xf32, #tpu.memory_space<vmem>>, %arg6: memref<16x16xf32, #tpu.memory_space<vmem>>) attributes {dimension_semantics = [#tpu.dimension_semantics<parallel>], iteration_bounds = array<i64: 1>, scalar_prefetch = 0 : i64, scratch_operands = 0 : i64, tpu.core_type = #tpu.core_type<tc>, window_params = [{transform_indices = @transform_0, window_bounds = array<i64: 1, 16, 128>}, {transform_indices = @transform_1, window_bounds = array<i64: 1, 16, 128>}, {pipeline_mode = #tpu.pipeline_mode<synchronous>, transform_indices = @transform_2, window_bounds = array<i64: 128, 16>}, {pipeline_mode = #tpu.pipeline_mode<synchronous>, transform_indices = @transform_3, window_bounds = array<i64: 128, 16>}, {pipeline_mode = #tpu.pipeline_mode<synchronous>, transform_indices = @transform_4, window_bounds = array<i64: 1, 16>}, {transform_indices = @transform_5, window_bounds = array<i64: 16, 16>}]} {
    %c0 = arith.constant 0 : index
    %c0_0 = arith.constant 0 : index
    %c0_1 = arith.constant 0 : index
    %0 = vector.load %arg1[%c0, %c0_0, %c0_1] : memref<1x16x128xf32, #tpu.memory_space<vmem>>, vector<1x16x128xf32>
    %1 = vector.shape_cast %0 : vector<1x16x128xf32> to vector<16x128xf32>
    %c0_2 = arith.constant 0 : index
    %c0_3 = arith.constant 0 : index
    %2 = vector.load %arg3[%c0_2, %c0_3] : memref<128x16xf32, #tpu.memory_space<vmem>>, vector<128x16xf32>
    %cst = arith.constant dense<0.000000e+00> : vector<16x16xf32>
    %3 = tpu.matmul %1, %2, %cst {dimension_numbers = #tpu.dot_dimension_numbers<[1], [0], [0], [1], [0, 0, 1, 1], [], []>} : vector<16x128xf32>, vector<128x16xf32>, vector<16x16xf32> -> vector<16x16xf32>
    %c0_4 = arith.constant 0 : index
    %c0_5 = arith.constant 0 : index
    %c0_6 = arith.constant 0 : index
    %4 = vector.load %arg2[%c0_4, %c0_5, %c0_6] : memref<1x16x128xf32, #tpu.memory_space<vmem>>, vector<1x16x128xf32>
    %5 = vector.shape_cast %4 : vector<1x16x128xf32> to vector<16x128xf32>
    %c0_7 = arith.constant 0 : index
    %c0_8 = arith.constant 0 : index
    %6 = vector.load %arg4[%c0_7, %c0_8] : memref<128x16xf32, #tpu.memory_space<vmem>>, vector<128x16xf32>
    %cst_9 = arith.constant dense<0.000000e+00> : vector<16x16xf32>
    %7 = tpu.matmul %5, %6, %cst_9 {dimension_numbers = #tpu.dot_dimension_numbers<[1], [0], [0], [1], [0, 0, 1, 1], [], []>} : vector<16x128xf32>, vector<128x16xf32>, vector<16x16xf32> -> vector<16x16xf32>
    %8 = arith.addf %3, %7 : vector<16x16xf32>
    %c0_10 = arith.constant 0 : index
    %c0_11 = arith.constant 0 : index
    %9 = vector.load %arg5[%c0_10, %c0_11] : memref<1x16xf32, #tpu.memory_space<vmem>>, vector<1x16xf32>
    %10 = vector.broadcast %9 : vector<1x16xf32> to vector<16x16xf32>
    %11 = arith.addf %8, %10 : vector<16x16xf32>
    %c0_12 = arith.constant 0 : index
    %c0_13 = arith.constant 0 : index
    %12 = vector.load %arg6[%c0_12, %c0_13] : memref<16x16xf32, #tpu.memory_space<vmem>>, vector<16x16xf32>
    tpu.vector_store %arg6[%c0_12, %c0_13], %11 {strides = array<i32>} : memref<16x16xf32, #tpu.memory_space<vmem>>, vector<16x16xf32>,
    return
  }
  func.func @transform_0(%arg0: i32) -> (i32, i32, i32) {
    %c0_i32 = arith.constant 0 : i32
    %c0_i32_0 = arith.constant 0 : i32
    %c0_i32_1 = arith.constant 0 : i32
    return %c0_i32, %arg0, %c0_i32_0 : i32, i32, i32
  }
  func.func @transform_1(%arg0: i32) -> (i32, i32, i32) {
    %c1_i32 = arith.constant 1 : i32
    %c0_i32 = arith.constant 0 : i32
    %c0_i32_0 = arith.constant 0 : i32
    return %c1_i32, %arg0, %c0_i32 : i32, i32, i32
  }
  func.func @transform_2(%arg0: i32) -> (i32, i32) {
    %c0_i32 = arith.constant 0 : i32
    %c0_i32_0 = arith.constant 0 : i32
    %c0_i32_1 = arith.constant 0 : i32
    return %c0_i32, %c0_i32_0 : i32, i32
  }
  func.func @transform_3(%arg0: i32) -> (i32, i32) {
    %c0_i32 = arith.constant 0 : i32
    %c0_i32_0 = arith.constant 0 : i32
    %c0_i32_1 = arith.constant 0 : i32
    return %c0_i32, %c0_i32_0 : i32, i32
  }
  func.func @transform_4(%arg0: i32) -> (i32, i32) {
    %c0_i32 = arith.constant 0 : i32
    %c0_i32_0 = arith.constant 0 : i32
    %c0_i32_1 = arith.constant 0 : i32
    return %c0_i32, %c0_i32_0 : i32, i32
  }
  func.func @transform_5(%arg0: i32) -> (i32, i32) {
    %c0_i32 = arith.constant 0 : i32
    %c0_i32_0 = arith.constant 0 : i32
    return %arg0, %c0_i32 : i32, i32
  }
}

</mosaic_0001>

<bundles_post_ra>
// kernel: crnn_head.5
= control target key start
LH: loop header
LB: loop body
LE: loop exit
PB: predicated region body
PF: predicated region fallthrough
CT: control target
= control target key end

     0   :  { %8 = vsyncpa [#allocation3], 0  ;;  %s672_s0 = inlined_call_operand.hbm [shape: f32[16,16], index: 0, kind: input, shape index: {}]   ;;  %s673_s1 = inlined_call_operand.hbm [shape: f32[16,1024], index: 1, kind: input, shape index: {}]   ;;  %s674_s2 = inlined_call_operand.hbm [shape: f32[1,1024], index: 2, kind: input, shape index: {}]   ;;  %s675_s3 = inlined_call_operand.vmem [shape: f32[16,1024], index: 3, kind: output, shape index: {}]  }
   0x1   :  { %9 = vsyncpa [#allocation5], 0  ;;  %s552_s12 = smov [#allocation4]   ;;  %s482_s16 = scalar_lea.hbm %s673_s1, 2048 }
   0x2   :  { %s27_s13 = sshll.u32 %s552_s12, 4  ;;  %p483_p0 = scmp.ne.s32.totalorder %s673_s1, %s482_s16  ;;  %s28_s13 = int_to_ptr.vmem [resolvable:$true] %s27_s13 }
   0x3   :  { %p486_p1 = scmp.lt.u32.totalorder %s482_s16, %s673_s1 }
   0x5   :  { %p488_p2 = pnand %p486_p1, %p483_p0 }
   0x7   :  { %491 = shalt.err (!%p488_p2)
}
   0x8   :  { %s492_s21 = scalar_lea.vmem %s28_s13, 2048  ;;  %p497_p4 = scmp.lt.s32.totalorder %s28_s13, %s28_s13 }
   0x9   :  { %p493_p3 = scmp.ne.s32.totalorder %s28_s13, %s492_s21  ;;  %p498_p5 = scmp.lt.s32.totalorder %s492_s21, %s492_s21 }
   0xb   :  { %p499_p6 = por %p498_p5, %p497_p4 }
   0xd   :  { %p500_p7 = pnand %p499_p6, %p493_p3 }
   0xf   :  { %503 = shalt.err (!%p500_p7)
}
  0x10   :  { %s553_s22 = smov 1024   ;;  %s554_s23 = smov 64  }
  0x11   :  { %33 = dma.hbm_to_vmem [thread:$0]  %s673_s1, 2048, %s28_s13, [#allocation5], %s553_s22, %s553_s22, %s554_s23  }
  0x12   :  { %s555_s26 = smov [#allocation2]   ;;  %s504_s30 = scalar_lea.hbm %s672_s0, 256 }
  0x13   :  { %s15_s27 = sshll.u32 %s555_s26, 4  ;;  %p505_p8 = scmp.ne.s32.totalorder %s672_s0, %s504_s30  ;;  %s16_s27 = int_to_ptr.vmem [resolvable:$true] %s15_s27 }
  0x14   :  { %p508_p9 = scmp.lt.u32.totalorder %s504_s30, %s672_s0 }
  0x16   :  { %p510_p10 = pnand %p508_p9, %p505_p8 }
  0x18   :  { %513 = shalt.err (!%p510_p10)
}
  0x19   :  { %s514_s8 = scalar_lea.vmem %s16_s27, 256  ;;  %p519_p12 = scmp.lt.s32.totalorder %s16_s27, %s16_s27 }
  0x1a   :  { %p515_p11 = scmp.ne.s32.totalorder %s16_s27, %s514_s8  ;;  %p520_p13 = scmp.lt.s32.totalorder %s514_s8, %s514_s8 }
  0x1c   :  { %p521_p0 = por %p520_p13, %p519_p12 }
  0x1e   :  { %p522_p1 = pnand %p521_p0, %p515_p11 }
  0x20   :  { %525 = shalt.err (!%p522_p1)
}
  0x21   :  { %s556_s1 = smov 128   ;;  %s557_s9 = smov 8  }
  0x22   :  { %21 = dma.hbm_to_vmem [thread:$0]  %s672_s0, 256, %s16_s27, [#allocation3], %s556_s1, %s556_s1, %s557_s9  }
  0x23   :  { %s558_s12 = smov [#allocation6]   ;;  %s526_s16 = scalar_lea.hbm %s674_s2, 128 }
  0x24   :  { %s40_s13 = sshll.u32 %s558_s12, 4  ;;  %p527_p2 = scmp.ne.s32.totalorder %s674_s2, %s526_s16  ;;  %s41_s13 = int_to_ptr.vmem [resolvable:$true] %s40_s13 }
  0x25   :  { %p530_p3 = scmp.lt.u32.totalorder %s526_s16, %s674_s2 }
  0x27   :  { %p532_p4 = pnand %p530_p3, %p527_p2 }
  0x29   :  { %535 = shalt.err (!%p532_p4)
}
  0x2a   :  { %s536_s21 = scalar_lea.vmem %s41_s13, 128  ;;  %p541_p6 = scmp.lt.s32.totalorder %s41_s13, %s41_s13 }
  0x2b   :  { %p537_p5 = scmp.ne.s32.totalorder %s41_s13, %s536_s21  ;;  %p542_p7 = scmp.lt.s32.totalorder %s536_s21, %s536_s21 }
  0x2d   :  { %p543_p8 = por %p542_p7, %p541_p6 }
  0x2f   :  { %p544_p9 = pnand %p543_p8, %p537_p5 }
  0x31   :  { %547 = shalt.err (!%p544_p9)
}
  0x32   :  { %43 = dma.hbm_to_vmem [thread:$0]  %s674_s2, 128, %s41_s13, [#allocation5]  }
  0x33   :  { %548 = dma.done.wait [#allocation3], 256  }
  0x34   :  { %549 = vsyncadd [#allocation3], 4294967040 }
  0x35   :  { %550 = dma.done.wait [#allocation5], 2176  }
  0x36   :  { %551 = vsyncadd [#allocation5], 4294965120  ;;  %v559_v0 = vmov 0.0   ;;  %v56_v1 = vld [vmem:[#allocation4 + $0x8] sm:$0xff]  ;;  %v58_v3 = vld [vmem:[#allocation4 + $0x18] sm:$0xff]  ;;  %vm113_vm0 = vcmask 130048   ;;  %v73_v27 = vlaneseq }
  0x37   :  { %184 = vmatprep.mubr.f32.mxu0 %v559_v0  ;;  %261 = vmatprep.mubr.f32.mxu1 %v559_v0  ;;  %v64_v2 = vld [vmem:[#allocation4 + $0x48] sm:$0xff]  ;;  %v66_v5 = vld [vmem:[#allocation4 + $0x58] sm:$0xff]  ;;  %v55_v6 = vld [vmem:[#allocation4] sm:$0xff] }
  0x38   :  { %v458_v4 = vpack.c.bf16 %v64_v2, %v56_v1  ;;  %v63_v7 = vld [vmem:[#allocation4 + $0x40] sm:$0xff]  ;;  %v462_v8 = vpack.c.bf16 %v66_v5, %v58_v3  ;;  %v57_v10 = vld [vmem:[#allocation4 + $0x10] sm:$0xff]  ;;  %v60_v14 = vld [vmem:[#allocation4 + $0x28] sm:$0xff]  ;;  %v74_v28 = vshrl.u32 %v73_v27, 7 }
  0x39   :  { %v460_v9 = vpack.c.bf16 %v63_v7, %v55_v6  ;;  %v65_v11 = vld [vmem:[#allocation4 + $0x50] sm:$0xff]  ;;  %v68_v15 = vld [vmem:[#allocation4 + $0x68] sm:$0xff]  ;;  %v62_v16 = vld [vmem:[#allocation4 + $0x38] sm:$0xff] }
  0x3a   :  { %v53_v12 = vld [vmem:[#allocation2] sm:$0xff]  ;;  %459 = vmatprep.subr.bf16.mxu0 %v458_v4  ;;  %v464_v13 = vpack.c.bf16 %v65_v11, %v57_v10  ;;  %463 = vmatprep.subr.bf16.mxu1 %v462_v8  ;;  %v466_v17 = vpack.c.bf16 %v68_v15, %v60_v14  ;;  %v70_v18 = vld [vmem:[#allocation4 + $0x78] sm:$0xff]  ;;  %v59_v19 = vld [vmem:[#allocation4 + $0x20] sm:$0xff]  ;;  %v75_v29 = vsub.s32 0, %v74_v28  ;;  %v83_v31 = vsub.s32 2, %v74_v28 }
  0x3b   :  { %461 = vmatpush1.bf16.msra.mxu0 %v460_v9  ;;  %v67_v20 = vld [vmem:[#allocation4 + $0x60] sm:$0xff]  ;;  %v470_v21 = vpack.c.bf16 %v70_v18, %v62_v16  ;;  %v61_v23 = vld [vmem:[#allocation4 + $0x30] sm:$0xff]  ;;  %v54_v26 = vld [vmem:[#allocation2 + $0x8] sm:$0xff]  ;;  %v79_v32 = vsub.s32 1, %v74_v28  ;;  %v87_v33 = vsub.s32 3, %v74_v28  ;;  %v91_v42 = vsub.s32 4, %v74_v28 }
  0x3c   :  { %465 = vmatpush1.bf16.msra.mxu1 %v464_v13  ;;  %v468_v22 = vpack.c.bf16 %v67_v20, %v59_v19  ;;  %v69_v24 = vld [vmem:[#allocation4 + $0x70] sm:$0xff]  ;;  %467 = vmatprep.subr.bf16.mxu0 %v466_v17  ;;  %v71_v30 = vld [vmem:[#allocation6] sm:$0xff]  ;;  %v99_v46 = vsub.s32 6, %v74_v28  ;;  %v95_v47 = vsub.s32 5, %v74_v28  ;;  %v103_v49 = vsub.s32 7, %v74_v28 }
  0x3d   :  { %v472_v25 = vpack.c.bf16 %v69_v24, %v61_v23  ;;  %471 = vmatprep.subr.bf16.mxu1 %v470_v21  ;;  %v76_v34 = vrot.slane %v71_v30, %v75_v29  ;;  %v84_v35 = vrot.slane %v71_v30, %v83_v31  ;;  %v80_v36 = vrot.slane %v71_v30, %v79_v32 }
  0x3e   :  { %450 = vmatmul.mubr.msk.f32.vlgmr.msra.gmra.mrb[0].mxu0 %vm113_vm0, %v53_v12  ;;  %v88_v37 = vrot.slane %v71_v30, %v87_v33  ;;  %v92_v54 = vrot.slane %v71_v30, %v91_v42  ;;  %v100_v58 = vrot.slane %v71_v30, %v99_v46  ;;  %v96_v59 = vrot.slane %v71_v30, %v95_v47 }
  0x3f   :  { %452 = vmatmul.mubr.msk.f32.vlgmr.msra.gmra.mrb[0].mxu1 %vm113_vm0, %v53_v12  ;;  %469 = vmatpush1.bf16.msra.mxu0 %v468_v22  ;;  %v104_v61 = vrot.slane %v71_v30, %v103_v49 }
  0x40   :  { %473 = vmatpush1.bf16.msra.mxu1 %v472_v25  ;;  %190 = vmatprep.mubr.f32.mxu0 %v559_v0 }
  0x41   :  { %267 = vmatprep.mubr.f32.mxu1 %v559_v0 }
  0x42   :  { %451 = vmatmul.mubr.msk.f32.gmra.mrb[2].mxu0 %vm113_vm0, %v54_v26 }
  0x43   :  { %453 = vmatmul.mubr.msk.f32.gmra.mrb[2].mxu1 %vm113_vm0, %v54_v26  ;;  %338 = vmatprep.mubr.f32.mxu0 %v559_v0 }
  0x44   :  { %415 = vmatprep.mubr.f32.mxu1 %v559_v0 }
  0x46   :  { %454 = vmatmul.mubr.msk.f32.vlgmr.msra.gmra.mrb[4].mxu0 %vm113_vm0, %v53_v12 }
  0x47   :  { %456 = vmatmul.mubr.msk.f32.vlgmr.msra.gmra.mrb[4].mxu1 %vm113_vm0, %v53_v12  ;;  %344 = vmatprep.mubr.f32.mxu0 %v559_v0 }
  0x48   :  { %421 = vmatprep.mubr.f32.mxu1 %v559_v0 }
  0x4a   :  { %455 = vmatmul.mubr.msk.f32.gmra.mrb[6].mxu0 %vm113_vm0, %v54_v26 }
  0x4b   :  { %457 = vmatmul.mubr.msk.f32.gmra.mrb[6].mxu1 %vm113_vm0, %v54_v26 }
 0x111   :  { %v186_v38 = vpop.f32.mrb[0].mxu0 }
 0x112   :  { %v187_v39 = vadd.f32 %v186_v38, %v76_v34  ;;  %v263_v40 = vpop.f32.mrb[0].mxu1  ;;  %v188_v41 = vpop.f32.mrb[1].mxu0 }
 0x113   :  { %v264_v43 = vadd.f32 %v263_v40, %v84_v35  ;;  %v189_v44 = vadd.f32 %v188_v41, %v80_v36  ;;  %v265_v45 = vpop.f32.mrb[1].mxu1 }
 0x114   :  { %428 = vst [vmem:[%s675_s3] sm:$0xff] %v187_v39  ;;  %v266_v48 = vadd.f32 %v265_v45, %v88_v37 }
 0x115   :  { %430 = vst [vmem:[%s675_s3 + $0x10] sm:$0xff] %v264_v43  ;;  %429 = vst [vmem:[%s675_s3 + $0x8] sm:$0xff] %v189_v44  ;;  %v192_v50 = vpop.f32.mrb[2].mxu0 }
 0x116   :  { %431 = vst [vmem:[%s675_s3 + $0x18] sm:$0xff] %v266_v48  ;;  %v193_v51 = vadd.f32 %v192_v50, %v76_v34  ;;  %v269_v52 = vpop.f32.mrb[2].mxu1  ;;  %v194_v53 = vpop.f32.mrb[3].mxu0 }
 0x117   :  { %v270_v55 = vadd.f32 %v269_v52, %v84_v35  ;;  %v195_v56 = vadd.f32 %v194_v53, %v80_v36  ;;  %v271_v57 = vpop.f32.mrb[3].mxu1 }
 0x118   :  { %436 = vst [vmem:[%s675_s3 + $0x40] sm:$0xff] %v193_v51  ;;  %v272_v60 = vadd.f32 %v271_v57, %v88_v37 }
 0x119   :  { %438 = vst [vmem:[%s675_s3 + $0x50] sm:$0xff] %v270_v55  ;;  %437 = vst [vmem:[%s675_s3 + $0x48] sm:$0xff] %v195_v56  ;;  %v340_v62 = vpop.f32.mrb[4].mxu0 }
 0x11a   :  { %439 = vst [vmem:[%s675_s3 + $0x58] sm:$0xff] %v272_v60  ;;  %v341_v63 = vadd.f32 %v340_v62, %v92_v54  ;;  %v417_v0 = vpop.f32.mrb[4].mxu1  ;;  %v342_v1 = vpop.f32.mrb[5].mxu0 }
 0x11b   :  { %v418_v2 = vadd.f32 %v417_v0, %v100_v58  ;;  %v343_v3 = vadd.f32 %v342_v1, %v96_v59  ;;  %v419_v4 = vpop.f32.mrb[5].mxu1 }
 0x11c   :  { %432 = vst [vmem:[%s675_s3 + $0x20] sm:$0xff] %v341_v63  ;;  %v420_v5 = vadd.f32 %v419_v4, %v104_v61 }
 0x11d   :  { %434 = vst [vmem:[%s675_s3 + $0x30] sm:$0xff] %v418_v2  ;;  %433 = vst [vmem:[%s675_s3 + $0x28] sm:$0xff] %v343_v3  ;;  %v346_v6 = vpop.f32.mrb[6].mxu0 }
 0x11e   :  { %435 = vst [vmem:[%s675_s3 + $0x38] sm:$0xff] %v420_v5  ;;  %v347_v7 = vadd.f32 %v346_v6, %v92_v54  ;;  %v423_v8 = vpop.f32.mrb[6].mxu1  ;;  %v348_v9 = vpop.f32.mrb[7].mxu0 }
 0x11f   :  { %v424_v10 = vadd.f32 %v423_v8, %v100_v58  ;;  %v349_v11 = vadd.f32 %v348_v9, %v96_v59  ;;  %v425_v12 = vpop.f32.mrb[7].mxu1 }
 0x120   :  { %440 = vst [vmem:[%s675_s3 + $0x60] sm:$0xff] %v347_v7  ;;  %v426_v13 = vadd.f32 %v425_v12, %v104_v61 }
 0x121   :  { %442 = vst [vmem:[%s675_s3 + $0x70] sm:$0xff] %v424_v10  ;;  %441 = vst [vmem:[%s675_s3 + $0x68] sm:$0xff] %v349_v11 }
 0x122   :  { %443 = vst [vmem:[%s675_s3 + $0x78] sm:$0xff] %v426_v13 }
 0x123   :  { %448 = vsyncpa [#allocation3], 1 }
 0x124   :  { %449 = vsyncpa [#allocation5], 1 }

// kernel: crnn_head.7
= control target key start
LH: loop header
LB: loop body
LE: loop exit
PB: predicated region body
PF: predicated region fallthrough
CT: control target
= control target key end

     0   :  { %vm298_vm0 = vcmask 261120   ;;  %s1164_s3 = inlined_call_operand.vmem [shape: f32[128,32], index: 3, kind: input, shape index: {}]   ;;  %s1165_s1 = inlined_call_operand.vmem [shape: f32[2,16,128], index: 1, kind: input, shape index: {}, may-alias: {0,1}]   ;;  %s1166_s5 = inlined_call_operand.vmem [shape: f32[32,1024], index: 5, kind: input, shape index: {}]   ;;  %s1167_s2 = inlined_call_operand.vmem [shape: f32[128,32], index: 2, kind: input, shape index: {}]   ;;  %s1168_s0 = inlined_call_operand.vmem [shape: f32[2,16,128], index: 0, kind: input, shape index: {}, may-alias: {0,1}]   ;;  %s1169_s4 = inlined_call_operand.vmem [shape: f32[1,32], index: 4, kind: input, shape index: {}]   ;;  %s1170_s6 = inlined_call_operand.vmem [shape: f32[1,1024], index: 6, kind: input, shape index: {}]   ;;  %s1171_s7 = inlined_call_operand.vmem [shape: f32[16,1024], index: 7, kind: output, shape index: {}]  }
   0x1   :  { %v49_v0 = vld [vmem:[%s1164_s3] sm:$0xff]  ;;  %v50_v1 = vld [vmem:[%s1164_s3 + $0x8] sm:$0xff]  ;;  %v51_v2 = vld [vmem:[%s1164_s3 + $0x10] sm:$0xff] }
   0x2   :  { %v750_v3 = vpack.c.bf16 %v50_v1, %v49_v0  ;;  %v52_v4 = vld [vmem:[%s1164_s3 + $0x18] sm:$0xff]  ;;  %v53_v6 = vld [vmem:[%s1164_s3 + $0x20] sm:$0xff]  ;;  %v54_v7 = vld [vmem:[%s1164_s3 + $0x28] sm:$0xff] }
   0x3   :  { %v754_v5 = vpack.c.bf16 %v52_v4, %v51_v2  ;;  %v758_v8 = vpack.c.bf16 %v54_v7, %v53_v6  ;;  %v633_v9 = vld [vmem:[%s1165_s1 + $0x10] sm:$0xff]  ;;  %v56_v11 = vld [vmem:[%s1164_s3 + $0x38] sm:$0xff]  ;;  %v57_v13 = vld [vmem:[%s1164_s3 + $0x40] sm:$0xff] }
   0x4   :  { %751 = vmatprep.subr.bf16.mxu0 %v750_v3  ;;  %v55_v10 = vld [vmem:[%s1164_s3 + $0x30] sm:$0xff]  ;;  %712 = vmatprep.mubr.f32.mxu0 %v633_v9  ;;  %v58_v14 = vld [vmem:[%s1164_s3 + $0x48] sm:$0xff]  ;;  %v224_v17 = vld [vmem:[%s1166_s5] sm:$0xff] }
   0x5   :  { %753 = vmatpush3.bf16.msra.mxu0 %v750_v3  ;;  %v762_v12 = vpack.c.bf16 %v56_v11, %v55_v10  ;;  %v225_v15 = vld [vmem:[%s1166_s5 + $0x8] sm:$0xff]  ;;  %v766_v18 = vpack.c.bf16 %v58_v14, %v57_v13  ;;  %v232_v20 = vld [vmem:[%s1166_s5 + $0x40] sm:$0xff]  ;;  %v59_v23 = vld [vmem:[%s1164_s3 + $0x50] sm:$0xff]  ;;  %v849_v3 = vmov 0.0  }
   0x6   :  { %755 = vmatprep.subr.bf16.mxu0 %v754_v5  ;;  %v233_v16 = vld [vmem:[%s1166_s5 + $0x48] sm:$0xff]  ;;  %v60_v24 = vld [vmem:[%s1164_s3 + $0x58] sm:$0xff]  ;;  %v816_v25 = vpack.c.bf16 %v232_v20, %v224_v17  ;;  %v61_v28 = vld [vmem:[%s1164_s3 + $0x60] sm:$0xff]  ;;  %369 = vmatprep.mubr.f32.mxu1 %v849_v3 }
   0x7   :  { %v814_v19 = vpack.c.bf16 %v233_v16, %v225_v15  ;;  %v241_v21 = vld [vmem:[%s1166_s5 + $0x88] sm:$0xff]  ;;  %v770_v27 = vpack.c.bf16 %v60_v24, %v59_v23  ;;  %v63_v31 = vld [vmem:[%s1164_s3 + $0x70] sm:$0xff]  ;;  %v64_v32 = vld [vmem:[%s1164_s3 + $0x78] sm:$0xff] }
   0x8   :  { %v249_v22 = vld [vmem:[%s1166_s5 + $0xc8] sm:$0xff]  ;;  %v778_v33 = vpack.c.bf16 %v64_v32, %v63_v31  ;;  %v31_v34 = vld [vmem:[%s1167_s2] sm:$0xff]  ;;  %v33_v37 = vld [vmem:[%s1167_s2 + $0x10] sm:$0xff] }
   0x9   :  { %757 = vmatpush3.bf16.msra.mxu0 %v754_v5  ;;  %v818_v26 = vpack.c.bf16 %v249_v22, %v241_v21  ;;  %815 = vmatprep.subr.bf16.mxu1 %v814_v19  ;;  %v62_v29 = vld [vmem:[%s1164_s3 + $0x68] sm:$0xff]  ;;  %v34_v38 = vld [vmem:[%s1167_s2 + $0x18] sm:$0xff]  ;;  %v29_v41 = vld [vmem:[%s1168_s0] sm:$0xff] }
   0xa   :  { %759 = vmatprep.subr.bf16.mxu0 %v758_v8  ;;  %817 = vmatpush1.bf16.msra.mxu1 %v816_v25  ;;  %v774_v30 = vpack.c.bf16 %v62_v29, %v61_v28  ;;  %v32_v35 = vld [vmem:[%s1167_s2 + $0x8] sm:$0xff]  ;;  %v634_v39 = vld [vmem:[%s1165_s1 + $0x18] sm:$0xff]  ;;  %v786_v40 = vpack.c.bf16 %v34_v38, %v33_v37  ;;  %v35_v42 = vld [vmem:[%s1167_s2 + $0x20] sm:$0xff] }
   0xb   :  { %819 = vmatprep.subr.bf16.mxu1 %v818_v26  ;;  %v782_v36 = vpack.c.bf16 %v32_v35, %v31_v34  ;;  %v36_v43 = vld [vmem:[%s1167_s2 + $0x28] sm:$0xff]  ;;  %v37_v45 = vld [vmem:[%s1167_s2 + $0x30] sm:$0xff]  ;;  %v38_v46 = vld [vmem:[%s1167_s2 + $0x38] sm:$0xff] }
   0xc   :  { %v790_v44 = vpack.c.bf16 %v36_v43, %v35_v42  ;;  %v794_v47 = vpack.c.bf16 %v38_v46, %v37_v45  ;;  %v39_v48 = vld [vmem:[%s1167_s2 + $0x40] sm:$0xff]  ;;  %v40_v49 = vld [vmem:[%s1167_s2 + $0x48] sm:$0xff]  ;;  %v41_v51 = vld [vmem:[%s1167_s2 + $0x50] sm:$0xff]  ;;  %v258_v42 = vlaneseq }
   0xd   :  { %761 = vmatpush3.bf16.msra.mxu0 %v758_v8  ;;  %v798_v50 = vpack.c.bf16 %v40_v49, %v39_v48  ;;  %v42_v52 = vld [vmem:[%s1167_s2 + $0x58] sm:$0xff]  ;;  %v43_v54 = vld [vmem:[%s1167_s2 + $0x60] sm:$0xff]  ;;  %v44_v55 = vld [vmem:[%s1167_s2 + $0x68] sm:$0xff] }
   0xe   :  { %763 = vmatprep.subr.bf16.mxu0 %v762_v12  ;;  %v802_v53 = vpack.c.bf16 %v42_v52, %v41_v51  ;;  %v806_v56 = vpack.c.bf16 %v44_v55, %v43_v54  ;;  %v45_v57 = vld [vmem:[%s1167_s2 + $0x70] sm:$0xff]  ;;  %v46_v58 = vld [vmem:[%s1167_s2 + $0x78] sm:$0xff]  ;;  %v30_v60 = vld [vmem:[%s1168_s0 + $0x8] sm:$0xff]  ;;  %v259_v43 = vshrl.u32 %v258_v42, 7 }
   0xf   :  { %v810_v59 = vpack.c.bf16 %v46_v58, %v45_v57  ;;  %v240_v61 = vld [vmem:[%s1166_s5 + $0x80] sm:$0xff]  ;;  %v227_v0 = vld [vmem:[%s1166_s5 + $0x18] sm:$0xff]  ;;  %v226_v4 = vld [vmem:[%s1166_s5 + $0x10] sm:$0xff] }
  0x10   :  { %v248_v62 = vld [vmem:[%s1166_s5 + $0xc0] sm:$0xff]  ;;  %v235_v1 = vld [vmem:[%s1166_s5 + $0x58] sm:$0xff]  ;;  %v234_v5 = vld [vmem:[%s1166_s5 + $0x50] sm:$0xff]  ;;  %v264_v46 = vsub.s32 1, %v259_v43  ;;  %v268_v52 = vsub.s32 2, %v259_v43  ;;  %v272_v54 = vsub.s32 3, %v259_v43 }
  0x11   :  { %765 = vmatpush3.bf16.msra.mxu0 %v762_v12  ;;  %v820_v63 = vpack.c.bf16 %v248_v62, %v240_v61  ;;  %v822_v2 = vpack.c.bf16 %v235_v1, %v227_v0  ;;  %v635_v6 = vld [vmem:[%s1169_s4] ss:$0 sm:$0xff]  ;;  %v243_v7 = vld [vmem:[%s1166_s5 + $0x98] sm:$0xff]  ;;  %v824_v11 = vpack.c.bf16 %v234_v5, %v226_v4  ;;  %v242_v14 = vld [vmem:[%s1166_s5 + $0x90] sm:$0xff]  ;;  %v276_v0 = vsub.s32 4, %v259_v43 }
  0x12   :  { %767 = vmatprep.subr.bf16.mxu0 %v766_v18  ;;  %v251_v8 = vld [vmem:[%s1166_s5 + $0xd8] sm:$0xff]  ;;  %v250_v15 = vld [vmem:[%s1166_s5 + $0xd0] sm:$0xff]  ;;  %v229_v16 = vld [vmem:[%s1166_s5 + $0x28] sm:$0xff] }
  0x13   :  { %821 = vmatpush1.bf16.msra.mxu1 %v820_v63  ;;  %v826_v13 = vpack.c.bf16 %v251_v8, %v243_v7  ;;  %v237_v17 = vld [vmem:[%s1166_s5 + $0x68] sm:$0xff]  ;;  %v228_v21 = vld [vmem:[%s1166_s5 + $0x20] sm:$0xff]  ;;  %v231_v29 = vld [vmem:[%s1166_s5 + $0x38] sm:$0xff] }
  0x14   :  { %823 = vmatprep.subr.bf16.mxu1 %v822_v2  ;;  %v830_v20 = vpack.c.bf16 %v237_v17, %v229_v16  ;;  %v236_v22 = vld [vmem:[%s1166_s5 + $0x60] sm:$0xff]  ;;  %v245_v23 = vld [vmem:[%s1166_s5 + $0xa8] sm:$0xff]  ;;  %v238_v34 = vld [vmem:[%s1166_s5 + $0x70] sm:$0xff]  ;;  %v280_v2 = vsub.s32 5, %v259_v43 }
  0x15   :  { %769 = vmatpush3.bf16.msra.mxu0 %v766_v18  ;;  %v828_v18 = vpack.c.bf16 %v250_v15, %v242_v14  ;;  %v253_v24 = vld [vmem:[%s1166_s5 + $0xe8] sm:$0xff]  ;;  %v832_v25 = vpack.c.bf16 %v236_v22, %v228_v21  ;;  %v252_v28 = vld [vmem:[%s1166_s5 + $0xe0] sm:$0xff]  ;;  %v247_v35 = vld [vmem:[%s1166_s5 + $0xb8] sm:$0xff]  ;;  %v288_v14 = vsub.s32 7, %v259_v43 }
  0x16   :  { %771 = vmatprep.subr.bf16.mxu0 %v770_v27  ;;  %v834_v26 = vpack.c.bf16 %v253_v24, %v245_v23  ;;  %v256_v45 = vld [vmem:[%s1170_s6] sm:$0xff] }
  0x17   :  { %v265_v48 = vrot.slane %v256_v45, %v264_v46  ;;  %v269_v58 = vrot.slane %v256_v45, %v268_v52  ;;  %v281_v8 = vrot.slane %v256_v45, %v280_v2 }
  0x19   :  { %773 = vmatpush3.bf16.msra.mxu0 %v770_v27  ;;  %v244_v27 = vld [vmem:[%s1166_s5 + $0xa0] sm:$0xff] }
  0x1a   :  { %775 = vmatprep.subr.bf16.mxu0 %v774_v30  ;;  %v836_v31 = vpack.c.bf16 %v252_v28, %v244_v27 }
  0x1d   :  { %777 = vmatpush3.bf16.msra.mxu0 %v774_v30  ;;  %v239_v30 = vld [vmem:[%s1166_s5 + $0x78] sm:$0xff] }
  0x1e   :  { %779 = vmatprep.subr.bf16.mxu0 %v778_v33  ;;  %v838_v32 = vpack.c.bf16 %v239_v30, %v231_v29 }
  0x21   :  { %781 = vmatpush3.bf16.msra.mxu0 %v778_v33  ;;  %v230_v33 = vld [vmem:[%s1166_s5 + $0x30] sm:$0xff] }
  0x22   :  { %783 = vmatprep.subr.bf16.mxu0 %v782_v36  ;;  %v840_v37 = vpack.c.bf16 %v238_v34, %v230_v33 }
  0x24   :  { %713 = vmatmul.mubr.f32.vlgmr.msra.gmra.mrb[0].mxu0 %v634_v39  ;;  %v246_v39 = vld [vmem:[%s1166_s5 + $0xb0] sm:$0xff] }
  0x25   :  { %785 = vmatpush3.bf16.msra.mxu0 %v782_v36  ;;  %747 = vmatprep.mubr.f32.mxu0 %v29_v41  ;;  %v255_v36 = vld [vmem:[%s1166_s5 + $0xf8] sm:$0xff] }
  0x26   :  { %787 = vmatprep.subr.bf16.mxu0 %v786_v40  ;;  %v842_v38 = vpack.c.bf16 %v255_v36, %v247_v35 }
  0x29   :  { %789 = vmatpush3.bf16.msra.mxu0 %v786_v40  ;;  %v254_v40 = vld [vmem:[%s1166_s5 + $0xf0] sm:$0xff] }
  0x2a   :  { %791 = vmatprep.subr.bf16.mxu0 %v790_v44  ;;  %v844_v41 = vpack.c.bf16 %v254_v40, %v246_v39 }
  0x2d   :  { %793 = vmatpush3.bf16.msra.mxu0 %v790_v44  ;;  %v260_v44 = vsub.s32 0, %v259_v43 }
  0x2e   :  { %795 = vmatprep.subr.bf16.mxu0 %v794_v47 }
  0x31   :  { %797 = vmatpush3.bf16.msra.mxu0 %v794_v47  ;;  %v261_v47 = vrot.slane %v256_v45, %v260_v44 }
  0x32   :  { %799 = vmatprep.subr.bf16.mxu0 %v798_v50 }
  0x35   :  { %801 = vmatpush3.bf16.msra.mxu0 %v798_v50 }
  0x36   :  { %803 = vmatprep.subr.bf16.mxu0 %v802_v53 }
  0x39   :  { %805 = vmatpush3.bf16.msra.mxu0 %v802_v53 }
  0x3a   :  { %807 = vmatprep.subr.bf16.mxu0 %v806_v56 }
  0x3d   :  { %809 = vmatpush3.bf16.msra.mxu0 %v806_v56 }
  0x3e   :  { %811 = vmatprep.subr.bf16.mxu0 %v810_v59 }
  0x41   :  { %813 = vmatpush3.bf16.msra.mxu0 %v810_v59 }
  0x44   :  { %748 = vmatmul.mubr.f32.vlgmr.msra.gmra.mrb[0].mxu0 %v30_v60  ;;  %v273_v60 = vrot.slane %v256_v45, %v272_v54 }
 0x117   :  { %v749_v9 = vpop.f32.mrb[0].mxu0 }
 0x118   :  { %v206_v10 = vpop.f32.mrb[1].mxu0  ;;  %v223_v19 = vadd.f32 %v749_v9, %v635_v6 }
 0x119   :  { %v222_v12 = vadd.f32 %v635_v6, %v206_v10  ;;  %v277_v6 = vrot.slane %v256_v45, %v276_v0 }
 0x11b   :  { %636 = vmatmul.mubr.msk.f32.vlgmr.msra.gmra.mrb[0].mxu1 %vm298_vm0, %v222_v12 }
 0x11c   :  { %825 = vmatpush1.bf16.msra.mxu1 %v824_v11  ;;  %375 = vmatprep.mubr.f32.mxu1 %v849_v3 }
 0x11d   :  { %827 = vmatprep.subr.bf16.mxu1 %v826_v13 }
 0x11f   :  { %637 = vmatmul.mubr.msk.f32.gmra.mrb[2].mxu1 %vm298_vm0, %v223_v19 }
 0x120   :  { %829 = vmatpush1.bf16.msra.mxu1 %v828_v18  ;;  %446 = vmatprep.mubr.f32.mxu1 %v849_v3 }
 0x121   :  { %831 = vmatprep.subr.bf16.mxu1 %v830_v20  ;;  %v289_v20 = vrot.slane %v256_v45, %v288_v14 }
 0x123   :  { %638 = vmatmul.mubr.msk.f32.vlgmr.msra.gmra.mrb[4].mxu1 %vm298_vm0, %v222_v12 }
 0x124   :  { %833 = vmatpush1.bf16.msra.mxu1 %v832_v25  ;;  %452 = vmatprep.mubr.f32.mxu1 %v849_v3 }
 0x125   :  { %835 = vmatprep.subr.bf16.mxu1 %v834_v26 }
 0x127   :  { %639 = vmatmul.mubr.msk.f32.gmra.mrb[6].mxu1 %vm298_vm0, %v223_v19 }
 0x128   :  { %837 = vmatpush1.bf16.msra.mxu1 %v836_v31  ;;  %523 = vmatprep.mubr.f32.mxu1 %v849_v3 }
 0x129   :  { %839 = vmatprep.subr.bf16.mxu1 %v838_v32 }
 0x12b   :  { %640 = vmatmul.mubr.msk.f32.vlgmr.msra.gmra.mrb[8].mxu1 %vm298_vm0, %v222_v12 }
 0x12c   :  { %841 = vmatpush1.bf16.msra.mxu1 %v840_v37  ;;  %529 = vmatprep.mubr.f32.mxu1 %v849_v3 }
 0x12d   :  { %843 = vmatprep.subr.bf16.mxu1 %v842_v38 }
 0x12f   :  { %641 = vmatmul.mubr.msk.f32.gmra.mrb[10].mxu1 %vm298_vm0, %v223_v19 }
 0x130   :  { %845 = vmatpush1.bf16.msra.mxu1 %v844_v41  ;;  %600 = vmatprep.mubr.f32.mxu1 %v849_v3 }
 0x133   :  { %642 = vmatmul.mubr.msk.f32.vlgmr.msra.gmra.mrb[12].mxu1 %vm298_vm0, %v222_v12  ;;  %v284_v12 = vsub.s32 6, %v259_v43 }
 0x134   :  { %606 = vmatprep.mubr.f32.mxu1 %v849_v3 }
 0x135   :  { %v285_v18 = vrot.slane %v256_v45, %v284_v12 }
 0x137   :  { %643 = vmatmul.mubr.msk.f32.gmra.mrb[14].mxu1 %vm298_vm0, %v223_v19 }
 0x1ee   :  { %v371_v49 = vpop.f32.mrb[0].mxu1 }
 0x1ef   :  { %v372_v50 = vadd.f32 %v371_v49, %v261_v47  ;;  %v373_v51 = vpop.f32.mrb[1].mxu1 }
 0x1f0   :  { %v374_v53 = vadd.f32 %v373_v51, %v265_v48 }
 0x1f1   :  { %613 = vst [vmem:[%s1171_s7] sm:$0xff] %v372_v50 }
 0x1f2   :  { %614 = vst [vmem:[%s1171_s7 + $0x8] sm:$0xff] %v374_v53  ;;  %v377_v55 = vpop.f32.mrb[2].mxu1 }
 0x1f3   :  { %v378_v56 = vadd.f32 %v377_v55, %v261_v47  ;;  %v379_v57 = vpop.f32.mrb[3].mxu1 }
 0x1f4   :  { %v380_v59 = vadd.f32 %v379_v57, %v265_v48 }
 0x1f5   :  { %621 = vst [vmem:[%s1171_s7 + $0x40] sm:$0xff] %v378_v56 }
 0x1f6   :  { %622 = vst [vmem:[%s1171_s7 + $0x48] sm:$0xff] %v380_v59  ;;  %v448_v61 = vpop.f32.mrb[4].mxu1 }
 0x1f7   :  { %v449_v62 = vadd.f32 %v448_v61, %v269_v58  ;;  %v450_v63 = vpop.f32.mrb[5].mxu1 }
 0x1f8   :  { %v451_v1 = vadd.f32 %v450_v63, %v273_v60 }
 0x1f9   :  { %615 = vst [vmem:[%s1171_s7 + $0x10] sm:$0xff] %v449_v62 }
 0x1fa   :  { %616 = vst [vmem:[%s1171_s7 + $0x18] sm:$0xff] %v451_v1  ;;  %v454_v3 = vpop.f32.mrb[6].mxu1 }
 0x1fb   :  { %v455_v4 = vadd.f32 %v454_v3, %v269_v58  ;;  %v456_v5 = vpop.f32.mrb[7].mxu1 }
 0x1fc   :  { %v457_v7 = vadd.f32 %v456_v5, %v273_v60 }
 0x1fd   :  { %623 = vst [vmem:[%s1171_s7 + $0x50] sm:$0xff] %v455_v4 }
 0x1fe   :  { %624 = vst [vmem:[%s1171_s7 + $0x58] sm:$0xff] %v457_v7  ;;  %v525_v9 = vpop.f32.mrb[8].mxu1 }
 0x1ff   :  { %v526_v10 = vadd.f32 %v525_v9, %v277_v6  ;;  %v527_v11 = vpop.f32.mrb[9].mxu1 }
 0x200   :  { %v528_v13 = vadd.f32 %v527_v11, %v281_v8 }
 0x201   :  { %617 = vst [vmem:[%s1171_s7 + $0x20] sm:$0xff] %v526_v10 }
 0x202   :  { %618 = vst [vmem:[%s1171_s7 + $0x28] sm:$0xff] %v528_v13  ;;  %v531_v15 = vpop.f32.mrb[10].mxu1 }
 0x203   :  { %v532_v16 = vadd.f32 %v531_v15, %v277_v6  ;;  %v533_v17 = vpop.f32.mrb[11].mxu1 }
 0x204   :  { %v534_v19 = vadd.f32 %v533_v17, %v281_v8 }
 0x205   :  { %625 = vst [vmem:[%s1171_s7 + $0x60] sm:$0xff] %v532_v16 }
 0x206   :  { %626 = vst [vmem:[%s1171_s7 + $0x68] sm:$0xff] %v534_v19  ;;  %v602_v21 = vpop.f32.mrb[12].mxu1 }
 0x207   :  { %v603_v22 = vadd.f32 %v602_v21, %v285_v18  ;;  %v604_v23 = vpop.f32.mrb[13].mxu1 }
 0x208   :  { %v605_v24 = vadd.f32 %v604_v23, %v289_v20 }
 0x209   :  { %619 = vst [vmem:[%s1171_s7 + $0x30] sm:$0xff] %v603_v22 }
 0x20a   :  { %620 = vst [vmem:[%s1171_s7 + $0x38] sm:$0xff] %v605_v24  ;;  %v608_v25 = vpop.f32.mrb[14].mxu1 }
 0x20b   :  { %v609_v26 = vadd.f32 %v608_v25, %v285_v18  ;;  %v610_v27 = vpop.f32.mrb[15].mxu1 }
 0x20c   :  { %v611_v28 = vadd.f32 %v610_v27, %v289_v20 }
 0x20d   :  { %627 = vst [vmem:[%s1171_s7 + $0x70] sm:$0xff] %v609_v26 }
 0x20e   :  { %628 = vst [vmem:[%s1171_s7 + $0x78] sm:$0xff] %v611_v28 }

// kernel: crnn_head.6
= control target key start
LH: loop header
LB: loop body
LE: loop exit
PB: predicated region body
PF: predicated region fallthrough
CT: control target
= control target key end

     0   :  { %7 = vsyncpa [#allocation6], 0  ;;  %s4006_s0 = inlined_call_operand.vmem [shape: f32[8,2,1024], index: 0, kind: input, shape index: {}]   ;;  %s4007_s1 = inlined_call_operand.hbm [shape: f32[2,128,512], index: 1, kind: input, shape index: {}]   ;;  %s4008_s2 = inlined_call_operand.vmem [shape: f32[2,8,2,128], index: 2, kind: output, shape index: {}]  }
   0x1   :  { %9 = vsyncpa [#allocation6 + $0x1], 0  ;;  %s3039_s9 = smov 0   ;;  %s3041_s10 = smov 0  }
   0x2   :  { %s3043_s11 = smov 0   ;;  %s3045_s12 = smov 0  }
   0x3   :  { %s3047_s13 = smov 0   ;;  %s3049_s14 = smov 0  }
   0x4   :  { %s3051_s15 = smov 0   ;;  %s3053_s16 = smov 0  }
   0x5   :  { %s3055_s17 = smov 0   ;;  %s3057_s18 = smov 0  }
   0x6 LB: > { %s2108_s19 = sadd.s32 4294967295, %s3014_s18   ;;  %s24_s20 = sadd.s32 1, %s3006_s16  ;;  %s3014_s18 = sphi %s3057_s18, %s15_s18   ;;  %s3010_s17 = sphi %s3055_s17, %s4185_s17   ;;  %s3006_s16 = sphi %s3053_s16, %s4184_s16   ;;  %s3002_s15 = sphi %s3051_s15, %s4183_s15   ;;  %s2998_s14 = sphi %s3049_s14, %s4182_s14   ;;  %s2994_s13 = sphi %s3047_s13, %s4181_s13   ;;  %s2990_s12 = sphi %s3045_s12, %s4180_s12   ;;  %s2986_s11 = sphi %s3043_s11, %s4179_s11   ;;  %s2982_s10 = sphi %s3041_s10, %s4178_s10   ;;  %s2978_s9 = sphi %s3039_s9, %s4177_s9  }
   0x7   : > { %p25_p0 = scmp.ge.s32.totalorder %s24_s20, 2  ;;  %s27_s21 = sadd.s32 1, %s3010_s17 }
   0x8   : > { %s2110_s22 = sshll.u32 %s3010_s17, 1  ;;  %s44_s23 = sadd.s32 1, %s2994_s13 }
   0x9   : > { %s4187_s20 = smov (%p25_p0, %s24_s20), 0  ;;  %s4189_s21 = smov (!%p25_p0, %s27_s21), %s3010_s17 }
   0xa   : > { %s32_s24 = ssub.s32 1, %s2110_s22  ;;  %p51_p1 = scmp.ne.s32.totalorder %s2994_s13, %s2990_s12 }
   0xb   : > { %p29_p2 = scmp.ge.s32.totalorder %s4189_s21, 2  ;;  %s33_s25 = smul.u32 %s3006_s16, %s32_s24 }
   0xc   : > { %p52_p3 = scmp.eq.s32.totalorder %s3014_s18, 0  ;;  %s70_s26 = sadd.s32 1, %s2986_s11 }
   0xd   : > { %s4191_s21 = smov (%p29_p2, %s4189_s21), 0  ;;  %s34_s27 = sadd.s32 %s3010_s17, %s33_s25 }
   0xe   : > { %p3107_p4 = por %p52_p3, %p51_p1  ;;  %s2111_s29 = sshll.u32 %s4191_s21, 1 }
   0xf   : > { %s40_s30 = ssub.s32 %s3010_s17, %s4191_s21  ;;  %s36_s3 = ssub.s32 1, %s2111_s29 }
  0x10   : > { %p68_p5 = scmp.eq.s32.totalorder %s40_s30, 0  ;;  %s37_s4 = smul.u32 %s36_s3, %s4187_s20 }
  0x11   : > { %p77_p6 = scmp.ne.s32.totalorder %s2986_s11, %s2982_s10  ;;  %p83_p8 = scmp.ne.s32.totalorder %s2982_s10, %s2978_s9 }
  0x12   : > { %s3118_s5 = scalar_select %p68_p5, %s2986_s11, %s70_s26  }
  0x13   : > { %s38_s6 = sadd.s32 %s37_s4, %s4191_s21  ;;  %p3123_p7 = por %p77_p6, %p52_p3 }
  0x14   : > { %s39_s8 = ssub.s32 %s34_s27, %s38_s6  ;;  %p84_p9 = scmp.eq.s32.totalorder %s2108_s19, 0 }
  0x15   : > { %s41_s22 = sor.u32 %s40_s30, %s39_s8  ;;  %p2115_p12 = scmp.ge.s32.totalorder %s3014_s18, 4 }
  0x16   : > { %p42_p10 = scmp.eq.s32.totalorder %s41_s22, 0  ;;  %p3131_p11 = por %p84_p9, %p83_p8 }
  0x17   : > { %139 = sbr.rel (%p2115_p12) target bundleno = 65 (0x41), region = 16 }
  0x18   : > { %s3136_s25 = scalar_select %p42_p10, %s2994_s13, %s44_s23  }
  0x1e   : > { %142 = sbr.rel (!%p3107_p4) target bundleno = 39 (0x27), region = 20  ;;  %s144_s26 = sand.u32 (%p3107_p4), 1, %s2994_s13  }
  0x1f   : > { %s2119_s9 = sshll.u32 (%p3107_p4), %s3010_s17, 2  ;;  %s2116_s29 = sshll.u32 (%p3107_p4), %s144_s26, 5 }
  0x20   : > { %s2173_s30 = sshll.u32 (%p3107_p4), %s34_s27, 5  ;;  %s146_s23 = scalar_lea.vmem (%p3107_p4), [#allocation4], %s2116_s29 }
  0x21   : > { %s154_s19 = sadd.s32 (%p3107_p4), %s2173_s30, %s2119_s9 }
  0x22   : > { %s2121_s3 = sshll.u32 (%p3107_p4), %s154_s19, 1 }
  0x23   : > { %s156_s8 = scalar_lea.vmem (%p3107_p4), %s4006_s0, %s2121_s3 }
  0x24   : > { %v190_v0 = vld [vmem:[%s156_s8] sm:$0xff] (%p3107_p4)  ;;  %v192_v1 = vld [vmem:[%s156_s8 + $0x10] sm:$0xff] (%p3107_p4) }
  0x25   : > { %v194_v2 = vld [vmem:[%s156_s8 + $0x20] sm:$0xff]  ;;  %191 = vst [vmem:[%s146_s23] sm:$0xff] %v190_v0  ;;  %193 = vst [vmem:[%s146_s23 + $0x8] sm:$0xff] %v192_v1  ;;  %v196_v3 = vld [vmem:[%s156_s8 + $0x30] sm:$0xff] }
  0x26   : > { %195 = vst [vmem:[%s146_s23 + $0x10] sm:$0xff] %v194_v2  ;;  %197 = vst [vmem:[%s146_s23 + $0x18] sm:$0xff] %v196_v3 }
  0x27 PF: > { %s204_s27 = sand.u32 1, %s2986_s11   ;;  %s2174_s28 = sshll.u32 %s3010_s17, 13 }
  0x28   : > { %s2122_s22 = sshll.u32 %s204_s27, 9  ;;  %s3151_s30 = scalar_lea.hbm %s4007_s1, %s2174_s28 }
  0x29   : > { %s208_s29 = scalar_lea.vmem [#allocation5], %s2122_s22  ;;  %s3155_s3 = scalar_lea.sflag [#allocation6], %s204_s27 }
  0x2a   : > { %s215_s19 = sshll.u32 %s208_s29, 4  ;;  %s2904_s4 = scalar_lea.hbm %s3151_s30, 8192  ;;  %s3153_s19 = int_to_ptr.vmem [resolvable:$true] %s215_s19 }
  0x2b   : > { %p2905_p13 = scmp.ne.s32.totalorder %s3151_s30, %s2904_s4  ;;  %s2908_s23 = scalar_lea.hbm %s4007_s1, 16384 }
  0x2c   : > { %p2909_p2 = scmp.lt.u32.totalorder %s3151_s30, %s4007_s1  ;;  %p2910_p3 = scmp.lt.u32.totalorder %s2908_s23, %s2904_s4 }
  0x2d   : > { %p2906_p0 = pnand %p2905_p13, %p3123_p7  ;;  %p2912_p5 = scmp.lt.u32.totalorder %s2904_s4, %s3151_s30 }
  0x2e   : > { %p2911_p4 = por %p2910_p3, %p2909_p2 }
  0x2f   : > { %p2907_p1 = pneg %p2906_p0 }
  0x30   : > { %p2913_p6 = por %p2912_p5, %p2911_p4 }
  0x32   : > { %p2914_p8 = pnand %p2913_p6, %p2907_p1 }
  0x34   : > { %2917 = shalt.err (!%p2914_p8)
}
  0x35   : > { %s2918_s27 = scalar_lea.vmem %s3153_s19, 8192  ;;  %s3016_s22 = smov [#allocation5]  }
  0x36   : > { %p2919_p9 = scmp.ne.s32.totalorder %s3153_s19, %s2918_s27  ;;  %s2922_s9 = sshll.u32 %s3016_s22, 4  ;;  %s2923_s9 = int_to_ptr.vmem [resolvable:$false] %s2922_s9 }
  0x37   : > { %s2924_s29 = scalar_lea.vmem %s2923_s9, 16384  ;;  %p2925_p13 = scmp.lt.s32.totalorder %s3153_s19, %s2923_s9 }
  0x38   : > { %p2920_p10 = pnand %p2919_p9, %p3123_p7  ;;  %p2926_p0 = scmp.lt.s32.totalorder %s2924_s29, %s2918_s27 }
  0x3a   : > { %p2921_p12 = pneg %p2920_p10  ;;  %p2927_p2 = por %p2926_p0, %p2925_p13 }
  0x3c   : > { %p2928_p3 = pnand %p2927_p2, %p2921_p12 }
  0x3e   : > { %2931 = shalt.err (!%p2928_p3)
}
  0x3f   : > { %s3017_s4 = smov 512   ;;  %s3018_s6 = smov 32  }
  0x40   : > { %2687 = dma.hbm_to_vmem [thread:$0]  (%p3123_p7), %s3151_s30, 8192, %s3153_s19, %s3155_s3, %s3017_s4, %s3017_s4, %s3018_s6  }
  0x41 PF: > { %p2125_p1 = scmp.ge.s32.totalorder %s3014_s18, 1  ;;  %p223_p4 = scmp.lt.s32.totalorder %s3014_s18, 5 }
  0x43   : > { %p224_p5 = pnand %p2125_p1, %p223_p4 }
  0x45   : > { %227 = sbr.rel (%p224_p5) target bundleno = 2322 (0x912), region = 62 }
  0x4c   : > { %s230_s8 = sand.u32 1, %s2990_s12   ;;  %s236_s23 = sand.u32 1, %s2982_s10  }
  0x4d   : > { %s2126_s28 = sshll.u32 %s230_s8, 5  ;;  %s2127_s26 = sshll.u32 %s236_s23, 9 }
  0x4e   : > { %s3183_s27 = scalar_lea.vmem [#allocation4], %s2126_s28  ;;  %s237_s22 = scalar_lea.sflag [#allocation6], %s236_s23 }
  0x4f   : > { %s3185_s9 = scalar_lea.vmem [#allocation5], %s2127_s26 }
  0x50   : > { %2973 = dma.done.wait (%p3131_p11), %s237_s22, 8192  }
  0x51   : > { %2975 = vsyncadd (%p3131_p11), %s237_s22, 4294959104  ;;  %s2128_s7 = sshll.u32 %s3002_s15, 1  ;;  %p284_p7 = scmp.lt.s32.totalorder %s3002_s15, 1 }
  0x52   : > { %s280_s12 = ssub.s32 1, %s2128_s7  ;;  %p2132_p11 = scmp.ne.s32.totalorder %s2998_s14, 0 }
  0x53   : > { %s281_s30 = smul.u32 %s2998_s14, %s280_s12  ;;  %v3019_v4 = vmov (!%p2132_p11), 0.0  }
  0x54   : > { %s285_s19 = scalar_select %p284_p7, %s3002_s15, 1 }
  0x55   : > { %s282_s3 = sadd.s32 %s3002_s15, %s281_s30  ;;  %301 = vst [vmem:[#allocation2] sm:$0x3] (!%p2132_p11), %v3019_v4  ;;  %302 = vst [vmem:[#allocation3] sm:$0x3] (!%p2132_p11), %v3019_v4 }
  0x56   : > { %s2129_s29 = sshll.u32 %s282_s3, 2  ;;  %s2130_s4 = sshll.u32 %s285_s19, 3 }
  0x57   : > { %p286_p6 = scmp.lt.s32.totalorder %s2129_s29, 7  ;;  %300 = sbr.rel (%p2132_p11) target bundleno = 94 (0x5e), region = 74 }
  0x59   : > { %s4193_s29 = smov (!%p286_p6, %s2129_s29), 7 }
  0x5a   : > { %s289_s6 = sadd.s32 %s2130_s4, %s4193_s29 }
  0x5b   : > { %s2131_s8 = sshll.u32 %s289_s6, 1 }
  0x5c   : > { %s3199_s28 = scalar_lea.vmem %s4008_s2, %s2131_s8 }
  0x5e PF: > { %v3203_v5 = vld [vmem:[%s3185_s9] sm:$0xff]  ;;  %v3206_v6 = vld [vmem:[%s3185_s9 + $0x8] sm:$0xff]  ;;  %v3209_v7 = vld [vmem:[%s3185_s9 + $0x10] sm:$0xff]  ;;  %p2133_p8 = scmp.ne.s32.totalorder %s3002_s15, 0 }
  0x5f   : > { %v3212_v8 = vld [vmem:[%s3185_s9 + $0x18] sm:$0xff]  ;;  %v3215_v9 = vld [vmem:[%s3185_s9 + $0x20] sm:$0xff]  ;;  %v3218_v10 = vld [vmem:[%s3185_s9 + $0x28] sm:$0xff] }
  0x60   : > { %4063 = vst [vmem:[#allocation8_spill] sm:$0xff] %v3218_v10  ;;  %v3221_v11 = vld [vmem:[%s3185_s9 + $0x30] sm:$0xff]  ;;  %v3224_v12 = vld [vmem:[%s3185_s9 + $0x38] sm:$0xff]  ;;  %v3227_v13 = vld [vmem:[%s3185_s9 + $0x40] sm:$0xff] }
  0x61   : > { %4064 = vst [vmem:[#allocation9_spill] sm:$0xff] %v3221_v11  ;;  %v3230_v14 = vld [vmem:[%s3185_s9 + $0x48] sm:$0xff]  ;;  %v3233_v15 = vld [vmem:[%s3185_s9 + $0x50] sm:$0xff]  ;;  %v3236_v16 = vld [vmem:[%s3185_s9 + $0x58] sm:$0xff] }
  0x62   : > { %4065 = vst [vmem:[#allocation10_spill] sm:$0xff] %v3230_v14  ;;  %4066 = vst [vmem:[#allocation11_spill] sm:$0xff] %v3236_v16  ;;  %v3239_v17 = vld [vmem:[%s3185_s9 + $0x60] sm:$0xff]  ;;  %v3242_v18 = vld [vmem:[%s3185_s9 + $0x68] sm:$0xff] }
  0x63   : > { %4067 = vst [vmem:[#allocation12_spill] sm:$0xff] %v3242_v18  ;;  %v3245_v19 = vld [vmem:[%s3185_s9 + $0x70] sm:$0xff]  ;;  %v3248_v20 = vld [vmem:[%s3185_s9 + $0x78] sm:$0xff]  ;;  %v3251_v21 = vld [vmem:[%s3185_s9 + $0x80] sm:$0xff] }
  0x64   : > { %4068 = vst [vmem:[#allocation13_spill] sm:$0xff] %v3245_v19  ;;  %4069 = vst [vmem:[#allocation14_spill] sm:$0xff] %v3248_v20  ;;  %v3254_v22 = vld [vmem:[%s3185_s9 + $0x88] sm:$0xff]  ;;  %v3257_v23 = vld [vmem:[%s3185_s9 + $0x90] sm:$0xff] }
  0x65   : > { %4070 = vst [vmem:[#allocation15_spill] sm:$0xff] %v3251_v21  ;;  %4071 = vst [vmem:[#allocation16_spill] sm:$0xff] %v3257_v23  ;;  %v3260_v24 = vld [vmem:[%s3185_s9 + $0x98] sm:$0xff]  ;;  %v3263_v25 = vld [vmem:[%s3185_s9 + $0xa0] sm:$0xff] }
  0x66   : > { %4072 = vst [vmem:[#allocation17_spill] sm:$0xff] %v3260_v24  ;;  %4073 = vst [vmem:[#allocation18_spill] sm:$0xff] %v3263_v25  ;;  %v3266_v26 = vld [vmem:[%s3185_s9 + $0xa8] sm:$0xff]  ;;  %v3269_v27 = vld [vmem:[%s3185_s9 + $0xb0] sm:$0xff] }
  0x67   : > { %4074 = vst [vmem:[#allocation19_spill] sm:$0xff] %v3266_v26  ;;  %4075 = vst [vmem:[#allocation20_spill] sm:$0xff] %v3269_v27  ;;  %v3272_v28 = vld [vmem:[%s3185_s9 + $0xb8] sm:$0xff]  ;;  %v3275_v29 = vld [vmem:[%s3185_s9 + $0xc0] sm:$0xff] }
  0x68   : > { %4076 = vst [vmem:[#allocation21_spill] sm:$0xff] %v3272_v28  ;;  %4077 = vst [vmem:[#allocation22_spill] sm:$0xff] %v3275_v29  ;;  %v3278_v30 = vld [vmem:[%s3185_s9 + $0xc8] sm:$0xff]  ;;  %v3281_v31 = vld [vmem:[%s3185_s9 + $0xd0] sm:$0xff] }
  0x69   : > { %4078 = vst [vmem:[#allocation23_spill] sm:$0xff] %v3278_v30  ;;  %4079 = vst [vmem:[#allocation24_spill] sm:$0xff] %v3281_v31  ;;  %v3284_v32 = vld [vmem:[%s3185_s9 + $0xd8] sm:$0xff]  ;;  %v3287_v33 = vld [vmem:[%s3185_s9 + $0xe0] sm:$0xff] }
  0x6a   : > { %4080 = vst [vmem:[#allocation25_spill] sm:$0xff] %v3284_v32  ;;  %4081 = vst [vmem:[#allocation26_spill] sm:$0xff] %v3287_v33  ;;  %v3290_v34 = vld [vmem:[%s3185_s9 + $0xe8] sm:$0xff]  ;;  %v3293_v35 = vld [vmem:[%s3185_s9 + $0xf0] sm:$0xff] }
  0x6b   : > { %4082 = vst [vmem:[#allocation27_spill] sm:$0xff] %v3290_v34  ;;  %4083 = vst [vmem:[#allocation28_spill] sm:$0xff] %v3293_v35  ;;  %v3296_v36 = vld [vmem:[%s3185_s9 + $0xf8] sm:$0xff]  ;;  %v3299_v37 = vld [vmem:[%s3185_s9 + $0x100] sm:$0xff] }
  0x6c   : > { %4084 = vst [vmem:[#allocation29_spill] sm:$0xff] %v3296_v36  ;;  %4085 = vst [vmem:[#allocation30_spill] sm:$0xff] %v3299_v37  ;;  %v3302_v38 = vld [vmem:[%s3185_s9 + $0x108] sm:$0xff]  ;;  %v3305_v39 = vld [vmem:[%s3185_s9 + $0x110] sm:$0xff] }
  0x6d   : > { %4086 = vst [vmem:[#allocation31_spill] sm:$0xff] %v3302_v38  ;;  %4087 = vst [vmem:[#allocation32_spill] sm:$0xff] %v3305_v39  ;;  %v3308_v40 = vld [vmem:[%s3185_s9 + $0x118] sm:$0xff]  ;;  %v3311_v41 = vld [vmem:[%s3185_s9 + $0x120] sm:$0xff] }
  0x6e   : > { %4088 = vst [vmem:[#allocation33_spill] sm:$0xff] %v3308_v40  ;;  %4089 = vst [vmem:[#allocation34_spill] sm:$0xff] %v3311_v41  ;;  %v3314_v42 = vld [vmem:[%s3185_s9 + $0x128] sm:$0xff]  ;;  %v3317_v43 = vld [vmem:[%s3185_s9 + $0x130] sm:$0xff] }
  0x6f   : > { %4090 = vst [vmem:[#allocation35_spill] sm:$0xff] %v3314_v42  ;;  %4091 = vst [vmem:[#allocation36_spill] sm:$0xff] %v3317_v43  ;;  %v3320_v44 = vld [vmem:[%s3185_s9 + $0x138] sm:$0xff]  ;;  %v3323_v45 = vld [vmem:[%s3185_s9 + $0x140] sm:$0xff] }
  0x70   : > { %4092 = vst [vmem:[#allocation37_spill] sm:$0xff] %v3320_v44  ;;  %4093 = vst [vmem:[#allocation38_spill] sm:$0xff] %v3323_v45  ;;  %v3326_v46 = vld [vmem:[%s3185_s9 + $0x148] sm:$0xff]  ;;  %v3329_v47 = vld [vmem:[%s3185_s9 + $0x150] sm:$0xff] }
  0x71   : > { %4094 = vst [vmem:[#allocation39_spill] sm:$0xff] %v3326_v46  ;;  %4095 = vst [vmem:[#allocation40_spill] sm:$0xff] %v3329_v47  ;;  %v3332_v48 = vld [vmem:[%s3185_s9 + $0x158] sm:$0xff]  ;;  %v3335_v49 = vld [vmem:[%s3185_s9 + $0x160] sm:$0xff] }
  0x72   : > { %4096 = vst [vmem:[#allocation41_spill] sm:$0xff] %v3332_v48  ;;  %4097 = vst [vmem:[#allocation42_spill] sm:$0xff] %v3335_v49  ;;  %v3338_v50 = vld [vmem:[%s3185_s9 + $0x168] sm:$0xff]  ;;  %v3341_v51 = vld [vmem:[%s3185_s9 + $0x170] sm:$0xff] }
  0x73   : > { %4098 = vst [vmem:[#allocation43_spill] sm:$0xff] %v3338_v50  ;;  %4099 = vst [vmem:[#allocation44_spill] sm:$0xff] %v3341_v51  ;;  %v3344_v52 = vld [vmem:[%s3185_s9 + $0x178] sm:$0xff]  ;;  %v3347_v53 = vld [vmem:[%s3185_s9 + $0x180] sm:$0xff] }
  0x74   : > { %4100 = vst [vmem:[#allocation45_spill] sm:$0xff] %v3344_v52  ;;  %4101 = vst [vmem:[#allocation46_spill] sm:$0xff] %v3347_v53  ;;  %v3350_v54 = vld [vmem:[%s3185_s9 + $0x188] sm:$0xff]  ;;  %v3353_v55 = vld [vmem:[%s3185_s9 + $0x190] sm:$0xff] }
  0x75   : > { %4102 = vst [vmem:[#allocation47_spill] sm:$0xff] %v3350_v54  ;;  %4103 = vst [vmem:[#allocation48_spill] sm:$0xff] %v3353_v55  ;;  %v3356_v56 = vld [vmem:[%s3185_s9 + $0x198] sm:$0xff]  ;;  %v3359_v57 = vld [vmem:[%s3185_s9 + $0x1a0] sm:$0xff] }
  0x76   : > { %4104 = vst [vmem:[#allocation49_spill] sm:$0xff] %v3356_v56  ;;  %4105 = vst [vmem:[#allocation50_spill] sm:$0xff] %v3359_v57  ;;  %v3362_v58 = vld [vmem:[%s3185_s9 + $0x1a8] sm:$0xff]  ;;  %v3365_v59 = vld [vmem:[%s3185_s9 + $0x1b0] sm:$0xff]  ;;  %370 = sbr.rel (%p2133_p8) target bundleno = 1221 (0x4c5), region = 78 }
  0x77   : > { %4106 = vst [vmem:[#allocation51_spill] sm:$0xff] %v3362_v58  ;;  %4107 = vst [vmem:[#allocation52_spill] sm:$0xff] %v3365_v59  ;;  %v3368_v60 = vld [vmem:[%s3185_s9 + $0x1b8] sm:$0xff]  ;;  %v3371_v61 = vld [vmem:[%s3185_s9 + $0x1c0] sm:$0xff] }
  0x78   : > { %4108 = vst [vmem:[#allocation53_spill] sm:$0xff] %v3368_v60  ;;  %4109 = vst [vmem:[#allocation54_spill] sm:$0xff] %v3371_v61  ;;  %v3374_v62 = vld [vmem:[%s3185_s9 + $0x1c8] sm:$0xff]  ;;  %v3377_v63 = vld [vmem:[%s3185_s9 + $0x1d0] sm:$0xff]  ;;  %v3397_v61 = vpack.c.bf16 (!%p2133_p8), %v3218_v10, %v3206_v6  ;;  %v3417_v10 = vpack.c.bf16 (!%p2133_p8), %v3248_v20, %v3236_v16  ;;  %v3435_v20 = vpack.c.bf16 (!%p2133_p8), %v3266_v26, %v3254_v22 }
  0x79   : > { %4110 = vst [vmem:[#allocation55_spill] sm:$0xff] %v3374_v62  ;;  %4111 = vst [vmem:[#allocation56_spill] sm:$0xff] %v3377_v63  ;;  %v3380_v0 = vld [vmem:[%s3185_s9 + $0x1d8] sm:$0xff]  ;;  %v3383_v1 = vld [vmem:[%s3185_s9 + $0x1e0] sm:$0xff]  ;;  %v3401_v63 = vpack.c.bf16 (!%p2133_p8), %v3224_v12, %v3212_v8  ;;  %v3439_v16 = vpack.c.bf16 (!%p2133_p8), %v3272_v28, %v3260_v24  ;;  %v3451_v26 = vpack.c.bf16 (!%p2133_p8), %v3269_v27, %v3257_v23 }
  0x7a   : > { %4112 = vst [vmem:[#allocation57_spill] sm:$0xff] %v3380_v0  ;;  %4113 = vst [vmem:[#allocation58_spill] sm:$0xff] %v3383_v1  ;;  %v3386_v2 = vld [vmem:[%s3185_s9 + $0x1e8] sm:$0xff]  ;;  %v3389_v3 = vld [vmem:[%s3185_s9 + $0x1f0] sm:$0xff]  ;;  %v3405_v1 = vpack.c.bf16 (!%p2133_p8), %v3215_v9, %v3203_v5  ;;  %2176 = vmatprep.subr.bf16.mxu0 (!%p2133_p8), %v3397_v61  ;;  %v3457_v28 = vpack.c.bf16 (!%p2133_p8), %v3290_v34, %v3278_v30  ;;  %v3467_v27 = vpack.c.bf16 (!%p2133_p8), %v3287_v33, %v3275_v29 }
  0x7b   : > { %4114 = vst [vmem:[#allocation59_spill] sm:$0xff] %v3386_v2  ;;  %4115 = vst [vmem:[#allocation60_spill] sm:$0xff] %v3389_v3  ;;  %v3392_v4 = vld [vmem:[%s3185_s9 + $0x1f8] sm:$0xff]  ;;  %v3409_v3 = vpack.c.bf16 (!%p2133_p8), %v3221_v11, %v3209_v7  ;;  %2208 = vmatprep.subr.bf16.mxu1 (!%p2133_p8), %v3401_v63  ;;  %v3425_v11 = vpack.c.bf16 (!%p2133_p8), %v3239_v17, %v3227_v13  ;;  %v3471_v23 = vpack.c.bf16 (!%p2133_p8), %v3293_v35, %v3281_v31  ;;  %v373_v33 = vld [vmem:[%s3183_s27] sm:$0xff] (!%p2133_p8) }
  0x7c   : > { %4116 = vst [vmem:[#allocation61_spill] sm:$0xff] %v3392_v4  ;;  %v3413_v4 = vpack.c.bf16 (!%p2133_p8), %v3242_v18, %v3230_v14  ;;  %2178 = vmatpush1.bf16.msra.mxu0 (!%p2133_p8), %v3405_v1  ;;  %v3429_v18 = vpack.c.bf16 (!%p2133_p8), %v3245_v19, %v3233_v15  ;;  %v4018_v14 = vmov (!%p2133_p8), 0.0   ;;  %v3447_v19 = vpack.c.bf16 (!%p2133_p8), %v3263_v25, %v3251_v21 }
  0x7d   : > { %2210 = vmatpush1.bf16.msra.mxu1 %v3409_v3  ;;  %438 = vmatprep.mubr.f32.mxu0 %v4018_v14  ;;  %v3487_v35 = vpack.c.bf16 %v3311_v41, %v3299_v37  ;;  %v3491_v31 = vpack.c.bf16 %v3317_v43, %v3305_v39  ;;  %v3507_v43 = vpack.c.bf16 %v3335_v49, %v3323_v45 }
  0x7e   : > { %2180 = vmatprep.subr.bf16.mxu0 %v3413_v4  ;;  %2212 = vmatprep.subr.bf16.mxu1 %v3417_v10  ;;  %v3511_v39 = vpack.c.bf16 %v3341_v51, %v3329_v47  ;;  %v3527_v51 = vpack.c.bf16 %v3359_v57, %v3347_v53  ;;  %v3531_v47 = vpack.c.bf16 %v3365_v59, %v3353_v55 }
  0x7f   : > { %509 = vmatprep.mubr.f32.mxu1 %v4018_v14  ;;  %v3461_v14 = vpack.c.bf16 %v3296_v36, %v3284_v32  ;;  %v3477_v36 = vpack.c.bf16 %v3314_v42, %v3302_v38  ;;  %v3481_v32 = vpack.c.bf16 %v3320_v44, %v3308_v40  ;;  %v3497_v44 = vpack.c.bf16 %v3338_v50, %v3326_v46  ;;  %v4118_v57 = vld [vmem:[#allocation54_spill] sm:$0xff] }
  0x80   : > { %2182 = vmatpush1.bf16.msra.mxu0 %v3425_v11  ;;  %v3501_v40 = vpack.c.bf16 %v3344_v52, %v3332_v48  ;;  %v3517_v52 = vpack.c.bf16 %v3362_v58, %v3350_v54  ;;  %v3521_v48 = vpack.c.bf16 %v3368_v60, %v3356_v56  ;;  %v3537_v60 = vpack.c.bf16 %v3386_v2, %v3374_v62  ;;  %v4120_v55 = vld [vmem:[#allocation56_spill] sm:$0xff] }
  0x81   : > { %2214 = vmatpush1.bf16.msra.mxu1 %v3429_v18  ;;  %2184 = vmatprep.subr.bf16.mxu0 %v3435_v20  ;;  %v4119_v53 = vld [vmem:[#allocation58_spill] sm:$0xff] }
  0x82   : > { %2216 = vmatprep.subr.bf16.mxu1 %v3439_v16  ;;  %v3547_v59 = vpack.c.bf16 %v4119_v53, %v4118_v57  ;;  %v4121_v54 = vld [vmem:[#allocation60_spill] sm:$0xff]  ;;  %v4122_v53 = vmov 0.0   ;;  %v525_v57 = vlaneseq }
  0x83   : > { %v4117_v56 = vld [vmem:[#allocation61_spill] sm:$0xff]  ;;  %v3551_v49 = vpack.c.bf16 %v4121_v54, %v4120_v55  ;;  %v3021_v54 = vmov 1983009808  }
  0x84   : > { %2186 = vmatpush1.bf16.msra.mxu0 %v3447_v19  ;;  %v3541_v58 = vpack.c.bf16 %v4117_v56, %v3380_v0  ;;  %v371_v56 = vld [vmem:[#allocation2] sm:$0x3]  ;;  %v523_v55 = vunpack.c.l.s4 %v3021_v54  ;;  %v526_v0 = vshrl.u32 %v525_v57, 7 }
  0x85   : > { %2218 = vmatpush1.bf16.msra.mxu1 %v3451_v26  ;;  %2188 = vmatprep.subr.bf16.mxu0 %v3457_v28 }
  0x86   : > { %2220 = vmatprep.subr.bf16.mxu1 %v3461_v14 }
  0x88   : > { %2190 = vmatpush1.bf16.msra.mxu0 %v3467_v27 }
  0x89   : > { %2222 = vmatpush1.bf16.msra.mxu1 %v3471_v23  ;;  %2192 = vmatprep.subr.bf16.mxu0 %v3477_v36 }
  0x8a   : > { %2224 = vmatprep.subr.bf16.mxu1 %v3481_v32 }
  0x8c   : > { %2194 = vmatpush1.bf16.msra.mxu0 %v3487_v35 }
  0x8d   : > { %2226 = vmatpush1.bf16.msra.mxu1 %v3491_v31  ;;  %2196 = vmatprep.subr.bf16.mxu0 %v3497_v44 }
  0x8e   : > { %2228 = vmatprep.subr.bf16.mxu1 %v3501_v40 }
  0x90   : > { %2198 = vmatpush1.bf16.msra.mxu0 %v3507_v43 }
  0x91   : > { %2230 = vmatpush1.bf16.msra.mxu1 %v3511_v39  ;;  %2200 = vmatprep.subr.bf16.mxu0 %v3517_v52 }
  0x92   : > { %2232 = vmatprep.subr.bf16.mxu1 %v3521_v48 }
  0x94   : > { %2202 = vmatpush1.bf16.msra.mxu0 %v3527_v51 }
  0x95   : > { %2234 = vmatpush1.bf16.msra.mxu1 %v3531_v47  ;;  %2204 = vmatprep.subr.bf16.mxu0 %v3537_v60 }
  0x96   : > { %2236 = vmatprep.subr.bf16.mxu1 %v3541_v58 }
  0x98   : > { %2206 = vmatpush1.bf16.msra.mxu0 %v3547_v59 }
  0x99   : > { %2238 = vmatpush1.bf16.msra.mxu1 %v3551_v49  ;;  %2240 = vmatprep.subr.bf16.mxu0 %v3397_v61 }
  0x9a   : > { %2272 = vmatprep.subr.bf16.mxu1 %v3401_v63 }
  0x9b   : > { %439 = vmatmul.mubr.f32.vlgmr.msra.gmra.mrb[0].mxu0 %v371_v56 }
  0x9c   : > { %510 = vmatmul.mubr.f32.vlgmr.msra.gmra.mrb[0].mxu1 %v371_v56  ;;  %2242 = vmatpush1.bf16.msra.mxu0 %v3405_v1  ;;  %v524_v56 = vunpack.c.0.s8 %v523_v55 }
  0x9d   : > { %2274 = vmatpush1.bf16.msra.mxu1 %v3409_v3  ;;  %2244 = vmatprep.subr.bf16.mxu0 %v3413_v4 }
  0x9e   : > { %2276 = vmatprep.subr.bf16.mxu1 %v3417_v10  ;;  %637 = vmatprep.mubr.f32.mxu0 %v4122_v53  ;;  %v3593_v45 = vsub.s32 %v524_v56, %v526_v0 }
  0x9f   : > { %708 = vmatprep.mubr.f32.mxu1 %v4122_v53 }
  0xa0   : > { %2246 = vmatpush1.bf16.msra.mxu0 %v3425_v11 }
  0xa1   : > { %2278 = vmatpush1.bf16.msra.mxu1 %v3429_v18  ;;  %2248 = vmatprep.subr.bf16.mxu0 %v3435_v20 }
  0xa2   : > { %2280 = vmatprep.subr.bf16.mxu1 %v3439_v16 }
  0xa4   : > { %2250 = vmatpush1.bf16.msra.mxu0 %v3447_v19 }
  0xa5   : > { %2282 = vmatpush1.bf16.msra.mxu1 %v3451_v26  ;;  %2252 = vmatprep.subr.bf16.mxu0 %v3457_v28 }
  0xa6   : > { %2284 = vmatprep.subr.bf16.mxu1 %v3461_v14 }
  0xa8   : > { %2254 = vmatpush1.bf16.msra.mxu0 %v3467_v27 }
  0xa9   : > { %2286 = vmatpush1.bf16.msra.mxu1 %v3471_v23  ;;  %2256 = vmatprep.subr.bf16.mxu0 %v3477_v36 }
  0xaa   : > { %2288 = vmatprep.subr.bf16.mxu1 %v3481_v32 }
  0xac   : > { %2258 = vmatpush1.bf16.msra.mxu0 %v3487_v35 }
  0xad   : > { %2290 = vmatpush1.bf16.msra.mxu1 %v3491_v31  ;;  %2260 = vmatprep.subr.bf16.mxu0 %v3497_v44 }
  0xae   : > { %2292 = vmatprep.subr.bf16.mxu1 %v3501_v40 }
  0xb0   : > { %2262 = vmatpush1.bf16.msra.mxu0 %v3507_v43 }
  0xb1   : > { %2294 = vmatpush1.bf16.msra.mxu1 %v3511_v39  ;;  %2264 = vmatprep.subr.bf16.mxu0 %v3517_v52 }
  0xb2   : > { %2296 = vmatprep.subr.bf16.mxu1 %v3521_v48 }
  0xb4   : > { %2266 = vmatpush1.bf16.msra.mxu0 %v3527_v51 }
  0xb5   : > { %2298 = vmatpush1.bf16.msra.mxu1 %v3531_v47  ;;  %2268 = vmatprep.subr.bf16.mxu0 %v3537_v60 }
  0xb6   : > { %2300 = vmatprep.subr.bf16.mxu1 %v3541_v58 }
  0xb8   : > { %2270 = vmatpush1.bf16.msra.mxu0 %v3547_v59 }
  0xb9   : > { %2302 = vmatpush1.bf16.msra.mxu1 %v3551_v49  ;;  %2304 = vmatprep.subr.bf16.mxu0 %v3397_v61 }
  0xba   : > { %2336 = vmatprep.subr.bf16.mxu1 %v3401_v63 }
 0x16e   : > { %v440_v2 = vpop.f32.mrb[0].mxu0 }
 0x16f   : > { %v511_v62 = vpop.f32.mrb[0].mxu1  ;;  %v442_v50 = vpop.f32.mrb[1].mxu0 }
 0x170   : > { %v513_v46 = vpop.f32.mrb[1].mxu1  ;;  %v520_v41 = vcombine.low %v440_v2, %v442_v50 }
 0x171   : > { %v521_v37 = vcombine.low %v511_v62, %v513_v46 }
 0x172   : > { %v528_v42 = vrot.slane %v520_v41, %v3593_v45 }
 0x173   : > { %v535_v38 = vrot.slane %v521_v37, %v3593_v45 }
 0x175   : > { %v536_v29 = vcombine.low %v528_v42, %v535_v38 }
 0x177   : > { %v538_v34 = vadd.f32 %v536_v29, %v373_v33  ;;  %v372_v29 = vld [vmem:[#allocation3] sm:$0x3] }
 0x179   : > { %v2134_v30 = vmul.f32 -1.442695, %v538_v34  ;;  %v546_v54 = vrot.slane %v538_v34, 2  ;;  %v557_v57 = vrot.slane %v538_v34, 6  ;;  %v554_v56 = vrot.slane %v538_v34, 4 }
 0x17b   : > { %2776 = vpow2.f32 %v2134_v30  ;;  %v2135_v55 = vmul.f32 -1.442695, %v546_v54  ;;  %v2136_v25 = vmul.f32 -1.442695, %v557_v57 }
 0x17d   : > { %2778 = vpow2.f32 %v2135_v55 }
 0x17e   : > { %2780 = vpow2.f32 %v2136_v25 }
 0x185   : > { %v2777_v0 = vpop.eup %2776 }
 0x186   : > { %v542_v21 = vadd.f32 1.0, %v2777_v0 }
 0x187   : > { %v2779_v24 = vpop.eup %2778 }
 0x188   : > { %2782 = vrcp.f32 %v542_v21  ;;  %v551_v46 = vadd.f32 1.0, %v2779_v24  ;;  %v2781_v37 = vpop.eup %2780 }
 0x189   : > { %2784 = vtanh.f32 %v554_v56  ;;  %v562_v30 = vadd.f32 1.0, %v2781_v37  ;;  %v2137_v37 = vld [vmem:[%s3183_s27 + $0x8] sm:$0xff] }
 0x18a   : > { %2786 = vrcp.f32 %v551_v46 }
 0x18b   : > { %2788 = vrcp.f32 %v562_v30 }
 0x192   : > { %v2783_v38 = vpop.eup %2782 }
 0x193   : > { %v2785_v33 = vpop.eup %2784 }
 0x194   : > { %v2787_v41 = vpop.eup %2786  ;;  %v566_v50 = vmul.f32 %v2785_v33, %v2783_v38 }
 0x195   : > { %v565_v42 = vmul.f32 %v2787_v41, %v372_v29  ;;  %v2789_v34 = vpop.eup %2788 }
 0x197   : > { %v3598_v62 = vadd.f32 %v566_v50, %v565_v42 }
 0x199   : > { %2790 = vtanh.f32 %v3598_v62 }
 0x1a3   : > { %v2791_v25 = vpop.eup %2790 }
 0x1a4   : > { %v569_v21 = vmul.f32 %v2791_v25, %v2789_v34 }
 0x1a6   : > { %570 = vst [vmem:[%s3199_s28] sm:$0x3] %v569_v21  ;;  %638 = vmatmul.mubr.f32.vlgmr.msra.gmra.mrb[2].mxu0 %v569_v21  ;;  %709 = vmatmul.mubr.f32.vlgmr.msra.gmra.mrb[2].mxu1 %v569_v21 }
 0x1a7   : > { %2306 = vmatpush1.bf16.msra.mxu0 %v3405_v1  ;;  %2338 = vmatpush1.bf16.msra.mxu1 %v3409_v3 }
 0x1a8   : > { %2308 = vmatprep.subr.bf16.mxu0 %v3413_v4  ;;  %2340 = vmatprep.subr.bf16.mxu1 %v3417_v10 }
 0x1a9   : > { %837 = vmatprep.mubr.f32.mxu0 %v4122_v53  ;;  %908 = vmatprep.mubr.f32.mxu1 %v4122_v53 }
 0x1ab   : > { %2310 = vmatpush1.bf16.msra.mxu0 %v3425_v11  ;;  %2342 = vmatpush1.bf16.msra.mxu1 %v3429_v18 }
 0x1ac   : > { %2312 = vmatprep.subr.bf16.mxu0 %v3435_v20  ;;  %2344 = vmatprep.subr.bf16.mxu1 %v3439_v16 }
 0x1af   : > { %2314 = vmatpush1.bf16.msra.mxu0 %v3447_v19  ;;  %2346 = vmatpush1.bf16.msra.mxu1 %v3451_v26 }
 0x1b0   : > { %2316 = vmatprep.subr.bf16.mxu0 %v3457_v28  ;;  %2348 = vmatprep.subr.bf16.mxu1 %v3461_v14 }
 0x1b3   : > { %2318 = vmatpush1.bf16.msra.mxu0 %v3467_v27  ;;  %2350 = vmatpush1.bf16.msra.mxu1 %v3471_v23 }
 0x1b4   : > { %2320 = vmatprep.subr.bf16.mxu0 %v3477_v36  ;;  %2352 = vmatprep.subr.bf16.mxu1 %v3481_v32 }
 0x1b7   : > { %2322 = vmatpush1.bf16.msra.mxu0 %v3487_v35  ;;  %2354 = vmatpush1.bf16.msra.mxu1 %v3491_v31 }
 0x1b8   : > { %2324 = vmatprep.subr.bf16.mxu0 %v3497_v44  ;;  %2356 = vmatprep.subr.bf16.mxu1 %v3501_v40 }
 0x1bb   : > { %2326 = vmatpush1.bf16.msra.mxu0 %v3507_v43  ;;  %2358 = vmatpush1.bf16.msra.mxu1 %v3511_v39 }
 0x1bc   : > { %2328 = vmatprep.subr.bf16.mxu0 %v3517_v52  ;;  %2360 = vmatprep.subr.bf16.mxu1 %v3521_v48 }
 0x1bf   : > { %2330 = vmatpush1.bf16.msra.mxu0 %v3527_v51  ;;  %2362 = vmatpush1.bf16.msra.mxu1 %v3531_v47 }
 0x1c0   : > { %2332 = vmatprep.subr.bf16.mxu0 %v3537_v60  ;;  %2364 = vmatprep.subr.bf16.mxu1 %v3541_v58 }
 0x1c3   : > { %2334 = vmatpush1.bf16.msra.mxu0 %v3547_v59  ;;  %2366 = vmatpush1.bf16.msra.mxu1 %v3551_v49 }
 0x1c4   : > { %2368 = vmatprep.subr.bf16.mxu0 %v3397_v61  ;;  %2400 = vmatprep.subr.bf16.mxu1 %v3401_v63 }
 0x279   : > { %v639_v24 = vpop.f32.mrb[2].mxu0  ;;  %v710_v2 = vpop.f32.mrb[2].mxu1 }
 0x27a   : > { %v641_v54 = vpop.f32.mrb[3].mxu0  ;;  %v712_v55 = vpop.f32.mrb[3].mxu1 }
 0x27b   : > { %v719_v57 = vcombine.low %v639_v24, %v641_v54  ;;  %v720_v0 = vcombine.low %v710_v2, %v712_v55 }
 0x27d   : > { %v727_v56 = vrot.slane %v719_v57, %v3593_v45  ;;  %v734_v46 = vrot.slane %v720_v0, %v3593_v45 }
 0x27f   : > { %v735_v38 = vcombine.low %v727_v56, %v734_v46 }
 0x281   : > { %v737_v29 = vadd.f32 %v2137_v37, %v735_v38 }
 0x283   : > { %v2138_v33 = vmul.f32 -1.442695, %v737_v29  ;;  %v745_v41 = vrot.slane %v737_v29, 2  ;;  %v756_v61 = vrot.slane %v737_v29, 6  ;;  %v753_v50 = vrot.slane %v737_v29, 4 }
 0x285   : > { %2792 = vpow2.f32 %v2138_v33  ;;  %v2139_v30 = vmul.f32 -1.442695, %v745_v41  ;;  %v2140_v63 = vmul.f32 -1.442695, %v756_v61 }
 0x287   : > { %2794 = vpow2.f32 %v2139_v30 }
 0x288   : > { %2796 = vpow2.f32 %v2140_v63 }
 0x28f   : > { %v2793_v42 = vpop.eup %2792 }
 0x290   : > { %v741_v34 = vadd.f32 1.0, %v2793_v42 }
 0x291   : > { %v2795_v25 = vpop.eup %2794 }
 0x292   : > { %2798 = vrcp.f32 %v741_v34  ;;  %v750_v21 = vadd.f32 1.0, %v2795_v25  ;;  %v2797_v24 = vpop.eup %2796  ;;  %v2147_v25 = vld [vmem:[%s3183_s27 + $0x18] sm:$0xff] }
 0x293   : > { %2800 = vtanh.f32 %v753_v50  ;;  %v761_v57 = vadd.f32 1.0, %v2797_v24 }
 0x294   : > { %2802 = vrcp.f32 %v750_v21 }
 0x295   : > { %2804 = vrcp.f32 %v761_v57 }
 0x29c   : > { %v2799_v2 = vpop.eup %2798 }
 0x29d   : > { %v2801_v54 = vpop.eup %2800 }
 0x29e   : > { %v2803_v55 = vpop.eup %2802  ;;  %v765_v56 = vmul.f32 %v2801_v54, %v2799_v2 }
 0x29f   : > { %v764_v0 = vmul.f32 %v2803_v55, %v3598_v62  ;;  %v2805_v37 = vpop.eup %2804 }
 0x2a1   : > { %v3640_v46 = vadd.f32 %v765_v56, %v764_v0 }
 0x2a3   : > { %2806 = vtanh.f32 %v3640_v46 }
 0x2ad   : > { %v2807_v38 = vpop.eup %2806 }
 0x2ae   : > { %v768_v29 = vmul.f32 %v2807_v38, %v2805_v37 }
 0x2b0   : > { %2141 = vst [vmem:[%s3199_s28 + $0x2] sm:$0x3] %v768_v29  ;;  %838 = vmatmul.mubr.f32.vlgmr.msra.gmra.mrb[4].mxu0 %v768_v29  ;;  %909 = vmatmul.mubr.f32.vlgmr.msra.gmra.mrb[4].mxu1 %v768_v29 }
 0x2b1   : > { %2370 = vmatpush1.bf16.msra.mxu0 %v3405_v1  ;;  %2402 = vmatpush1.bf16.msra.mxu1 %v3409_v3 }
 0x2b2   : > { %2372 = vmatprep.subr.bf16.mxu0 %v3413_v4  ;;  %2404 = vmatprep.subr.bf16.mxu1 %v3417_v10 }
 0x2b3   : > { %1037 = vmatprep.mubr.f32.mxu0 %v4122_v53  ;;  %1108 = vmatprep.mubr.f32.mxu1 %v4122_v53 }
 0x2b5   : > { %2374 = vmatpush1.bf16.msra.mxu0 %v3425_v11  ;;  %2406 = vmatpush1.bf16.msra.mxu1 %v3429_v18 }
 0x2b6   : > { %2376 = vmatprep.subr.bf16.mxu0 %v3435_v20  ;;  %2408 = vmatprep.subr.bf16.mxu1 %v3439_v16 }
 0x2b9   : > { %2378 = vmatpush1.bf16.msra.mxu0 %v3447_v19  ;;  %2410 = vmatpush1.bf16.msra.mxu1 %v3451_v26  ;;  %v2142_v26 = vld [vmem:[%s3183_s27 + $0x10] sm:$0xff] }
 0x2ba   : > { %2380 = vmatprep.subr.bf16.mxu0 %v3457_v28  ;;  %2412 = vmatprep.subr.bf16.mxu1 %v3461_v14 }
 0x2bd   : > { %2382 = vmatpush1.bf16.msra.mxu0 %v3467_v27  ;;  %2414 = vmatpush1.bf16.msra.mxu1 %v3471_v23 }
 0x2be   : > { %2384 = vmatprep.subr.bf16.mxu0 %v3477_v36  ;;  %2416 = vmatprep.subr.bf16.mxu1 %v3481_v32 }
 0x2c1   : > { %2386 = vmatpush1.bf16.msra.mxu0 %v3487_v35  ;;  %2418 = vmatpush1.bf16.msra.mxu1 %v3491_v31 }
 0x2c2   : > { %2388 = vmatprep.subr.bf16.mxu0 %v3497_v44  ;;  %2420 = vmatprep.subr.bf16.mxu1 %v3501_v40 }
 0x2c5   : > { %2390 = vmatpush1.bf16.msra.mxu0 %v3507_v43  ;;  %2422 = vmatpush1.bf16.msra.mxu1 %v3511_v39 }
 0x2c6   : > { %2392 = vmatprep.subr.bf16.mxu0 %v3517_v52  ;;  %2424 = vmatprep.subr.bf16.mxu1 %v3521_v48 }
 0x2c9   : > { %2394 = vmatpush1.bf16.msra.mxu0 %v3527_v51  ;;  %2426 = vmatpush1.bf16.msra.mxu1 %v3531_v47 }
 0x2ca   : > { %2396 = vmatprep.subr.bf16.mxu0 %v3537_v60  ;;  %2428 = vmatprep.subr.bf16.mxu1 %v3541_v58 }
 0x2cd   : > { %2398 = vmatpush1.bf16.msra.mxu0 %v3547_v59  ;;  %2430 = vmatpush1.bf16.msra.mxu1 %v3551_v49 }
 0x383   : > { %v839_v10 = vpop.f32.mrb[4].mxu0  ;;  %v910_v11 = vpop.f32.mrb[4].mxu1 }
 0x384   : > { %v841_v14 = vpop.f32.mrb[5].mxu0  ;;  %v912_v16 = vpop.f32.mrb[5].mxu1 }
 0x385   : > { %v919_v18 = vcombine.low %v839_v10, %v841_v14  ;;  %v920_v19 = vcombine.low %v910_v11, %v912_v16 }
 0x387   : > { %v927_v20 = vrot.slane %v919_v18, %v3593_v45  ;;  %v934_v23 = vrot.slane %v920_v19, %v3593_v45 }
 0x389   : > { %v935_v27 = vcombine.low %v927_v20, %v934_v23 }
 0x38b   : > { %v937_v28 = vadd.f32 %v2142_v26, %v935_v27 }
 0x38d   : > { %v2143_v31 = vmul.f32 -1.442695, %v937_v28  ;;  %v945_v32 = vrot.slane %v937_v28, 2  ;;  %v956_v36 = vrot.slane %v937_v28, 6  ;;  %v953_v43 = vrot.slane %v937_v28, 4 }
 0x38f   : > { %2808 = vpow2.f32 %v2143_v31  ;;  %v2144_v35 = vmul.f32 -1.442695, %v945_v32  ;;  %v2145_v39 = vmul.f32 -1.442695, %v956_v36 }
 0x391   : > { %2810 = vpow2.f32 %v2144_v35 }
 0x392   : > { %2812 = vpow2.f32 %v2145_v39 }
 0x399   : > { %v2809_v40 = vpop.eup %2808 }
 0x39a   : > { %v941_v44 = vadd.f32 1.0, %v2809_v40 }
 0x39b   : > { %v2811_v47 = vpop.eup %2810 }
 0x39c   : > { %2814 = vrcp.f32 %v941_v44  ;;  %v950_v48 = vadd.f32 1.0, %v2811_v47  ;;  %v2813_v49 = vpop.eup %2812 }
 0x39d   : > { %2816 = vtanh.f32 %v953_v43  ;;  %v961_v59 = vadd.f32 1.0, %v2813_v49 }
 0x39e   : > { %2818 = vrcp.f32 %v950_v48 }
 0x39f   : > { %2820 = vrcp.f32 %v961_v59 }
 0x3a6   : > { %v2815_v51 = vpop.eup %2814 }
 0x3a7   : > { %v2817_v52 = vpop.eup %2816 }
 0x3a8   : > { %v2819_v58 = vpop.eup %2818  ;;  %v965_v1 = vmul.f32 %v2817_v52, %v2815_v51 }
 0x3a9   : > { %v964_v60 = vmul.f32 %v2819_v58, %v3640_v46  ;;  %v2821_v4 = vpop.eup %2820 }
 0x3ab   : > { %v966_v3 = vadd.f32 %v965_v1, %v964_v60 }
 0x3ad   : > { %2822 = vtanh.f32 %v966_v3 }
 0x3b7   : > { %v2823_v53 = vpop.eup %2822 }
 0x3b8   : > { %v968_v62 = vmul.f32 %v2823_v53, %v2821_v4 }
 0x3ba   : > { %2146 = vst [vmem:[%s3199_s28 + $0x4] sm:$0x3] %v968_v62  ;;  %1038 = vmatmul.mubr.f32.vlgmr.msra.gmra.mrb[6].mxu0 %v968_v62  ;;  %1109 = vmatmul.mubr.f32.vlgmr.msra.gmra.mrb[6].mxu1 %v968_v62 }
 0x48d   : > { %v1039_v33 = vpop.f32.mrb[6].mxu0  ;;  %v1110_v41 = vpop.f32.mrb[6].mxu1 }
 0x48e   : > { %v1041_v30 = vpop.f32.mrb[7].mxu0  ;;  %v1112_v61 = vpop.f32.mrb[7].mxu1 }
 0x48f   : > { %v1119_v63 = vcombine.low %v1039_v33, %v1041_v30  ;;  %v1120_v42 = vcombine.low %v1110_v41, %v1112_v61 }
 0x491   : > { %v1127_v50 = vrot.slane %v1119_v63, %v3593_v45  ;;  %v1134_v34 = vrot.slane %v1120_v42, %v3593_v45 }
 0x493   : > { %v1135_v21 = vcombine.low %v1127_v50, %v1134_v34 }
 0x495   : > { %v1137_v24 = vadd.f32 %v2147_v25, %v1135_v21 }
 0x497   : > { %v2148_v2 = vmul.f32 -1.442695, %v1137_v24  ;;  %v1145_v54 = vrot.slane %v1137_v24, 2  ;;  %v1156_v57 = vrot.slane %v1137_v24, 6  ;;  %v1153_v46 = vrot.slane %v1137_v24, 4 }
 0x499   : > { %2824 = vpow2.f32 %v2148_v2  ;;  %v2149_v55 = vmul.f32 -1.442695, %v1145_v54  ;;  %v2150_v0 = vmul.f32 -1.442695, %v1156_v57 }
 0x49b   : > { %2826 = vpow2.f32 %v2149_v55 }
 0x49c   : > { %2828 = vpow2.f32 %v2150_v0 }
 0x4a3   : > { %v2825_v56 = vpop.eup %2824 }
 0x4a4   : > { %v1141_v37 = vadd.f32 1.0, %v2825_v56 }
 0x4a5   : > { %v2827_v38 = vpop.eup %2826 }
 0x4a6   : > { %2830 = vrcp.f32 %v1141_v37  ;;  %v1150_v29 = vadd.f32 1.0, %v2827_v38  ;;  %v2829_v45 = vpop.eup %2828 }
 0x4a7   : > { %2832 = vtanh.f32 %v1153_v46  ;;  %v1161_v16 = vadd.f32 1.0, %v2829_v45 }
 0x4a8   : > { %2834 = vrcp.f32 %v1150_v29 }
 0x4a9   : > { %2836 = vrcp.f32 %v1161_v16 }
 0x4b0   : > { %v2831_v10 = vpop.eup %2830 }
 0x4b1   : > { %v2833_v11 = vpop.eup %2832 }
 0x4b2   : > { %v2835_v14 = vpop.eup %2834  ;;  %v1165_v19 = vmul.f32 %v2833_v11, %v2831_v10 }
 0x4b3   : > { %v1164_v18 = vmul.f32 %v2835_v14, %v966_v3  ;;  %v2837_v23 = vpop.eup %2836 }
 0x4b5   : > { %v1166_v20 = vadd.f32 %v1165_v19, %v1164_v18 }
 0x4b7   : > { %2838 = vtanh.f32 %v1166_v20  ;;  %1172 = vst [vmem:[#allocation3] sm:$0x3] %v1166_v20 }
 0x4c1   : > { %v2839_v26 = vpop.eup %2838 }
 0x4c2   : > { %v1168_v27 = vmul.f32 %v2839_v26, %v2837_v23 }
 0x4c4   : > { %2151 = vst [vmem:[%s3199_s28 + $0x6] sm:$0x3] %v1168_v27  ;;  %1171 = vst [vmem:[#allocation2] sm:$0x3] %v1168_v27 }
 0x4c5 PF: > { %p2152_p9 = scmp.ne.s32.totalorder %s3002_s15, 1 }
 0x4c6   : > { %v4123_v28 = vld [vmem:[#allocation8_spill] sm:$0xff] (!%p2152_p9)  ;;  %v3692_v32 = vpack.c.bf16 (!%p2152_p9), %v3224_v12, %v3212_v8  ;;  %v3696_v35 = vpack.c.bf16 (!%p2152_p9), %v3215_v9, %v3203_v5  ;;  %v4124_v36 = vld [vmem:[#allocation9_spill] sm:$0xff] (!%p2152_p9)  ;;  %v4125_v40 = vld [vmem:[#allocation10_spill] sm:$0xff] (!%p2152_p9)  ;;  %v3716_v5 = vpack.c.bf16 (!%p2152_p9), %v3239_v17, %v3227_v13  ;;  %v3022_v58 = vmov (!%p2152_p9), 0.0  }
 0x4c7   : > { %1176 = sbr.rel (%p2152_p9) target bundleno = 2322 (0x912), region = 82  ;;  %v3688_v31 = vpack.c.bf16 (!%p2152_p9), %v4123_v28, %v3206_v6  ;;  %v3700_v39 = vpack.c.bf16 (!%p2152_p9), %v4124_v36, %v3209_v7  ;;  %v4126_v43 = vld [vmem:[#allocation12_spill] sm:$0xff] (!%p2152_p9)  ;;  %v4127_v47 = vld [vmem:[#allocation11_spill] sm:$0xff] (!%p2152_p9)  ;;  %v4128_v48 = vld [vmem:[#allocation14_spill] sm:$0xff] (!%p2152_p9)  ;;  %1245 = vmatprep.mubr.f32.mxu0 (!%p2152_p9), %v3022_v58  ;;  %1316 = vmatprep.mubr.f32.mxu1 (!%p2152_p9), %v3022_v58 }
 0x4c8   : > { %v3704_v44 = vpack.c.bf16 (!%p2152_p9), %v4126_v43, %v4125_v40  ;;  %v3708_v6 = vpack.c.bf16 (!%p2152_p9), %v4128_v48, %v4127_v47  ;;  %2464 = vmatprep.subr.bf16.mxu1 (!%p2152_p9), %v3692_v32  ;;  %v4129_v7 = vld [vmem:[#allocation13_spill] sm:$0xff] (!%p2152_p9)  ;;  %v4130_v9 = vld [vmem:[#allocation19_spill] sm:$0xff] (!%p2152_p9)  ;;  %v4135_v59 = vld [vmem:[#allocation16_spill] sm:$0xff] (!%p2152_p9) }
 0x4c9   : > { %2432 = vmatprep.subr.bf16.mxu0 (!%p2152_p9), %v3688_v31  ;;  %2466 = vmatpush1.bf16.msra.mxu1 (!%p2152_p9), %v3700_v39  ;;  %v3720_v8 = vpack.c.bf16 (!%p2152_p9), %v4129_v7, %v3233_v15  ;;  %v3726_v12 = vpack.c.bf16 (!%p2152_p9), %v4130_v9, %v3254_v22  ;;  %v4131_v49 = vld [vmem:[#allocation17_spill] sm:$0xff] (!%p2152_p9)  ;;  %v4133_v13 = vld [vmem:[#allocation15_spill] sm:$0xff] (!%p2152_p9)  ;;  %v4134_v15 = vld [vmem:[#allocation18_spill] sm:$0xff] (!%p2152_p9) }
 0x4ca   : > { %2434 = vmatpush1.bf16.msra.mxu0 (!%p2152_p9), %v3696_v35  ;;  %2468 = vmatprep.subr.bf16.mxu1 (!%p2152_p9), %v3708_v6  ;;  %v4132_v51 = vld [vmem:[#allocation21_spill] sm:$0xff] (!%p2152_p9)  ;;  %v3738_v17 = vpack.c.bf16 (!%p2152_p9), %v4134_v15, %v4133_v13  ;;  %v4136_v22 = vld [vmem:[#allocation20_spill] sm:$0xff] (!%p2152_p9)  ;;  %v4137_v1 = vld [vmem:[#allocation23_spill] sm:$0xff] (!%p2152_p9) }
 0x4cb   : > { %2436 = vmatprep.subr.bf16.mxu0 (!%p2152_p9), %v3704_v44  ;;  %v3730_v52 = vpack.c.bf16 (!%p2152_p9), %v4132_v51, %v4131_v49  ;;  %v3742_v60 = vpack.c.bf16 (!%p2152_p9), %v4136_v22, %v4135_v59  ;;  %v4138_v3 = vld [vmem:[#allocation27_spill] sm:$0xff] (!%p2152_p9)  ;;  %v4139_v53 = vld [vmem:[#allocation25_spill] sm:$0xff] (!%p2152_p9)  ;;  %v4141_v41 = vld [vmem:[#allocation22_spill] sm:$0xff] (!%p2152_p9) }
 0x4cc   : > { %v3748_v4 = vpack.c.bf16 (!%p2152_p9), %v4138_v3, %v4137_v1  ;;  %v4140_v62 = vld [vmem:[#allocation29_spill] sm:$0xff] (!%p2152_p9)  ;;  %v4142_v30 = vld [vmem:[#allocation26_spill] sm:$0xff] (!%p2152_p9)  ;;  %v4143_v63 = vld [vmem:[#allocation24_spill] sm:$0xff] (!%p2152_p9) }
 0x4cd   : > { %2470 = vmatpush1.bf16.msra.mxu1 (!%p2152_p9), %v3720_v8  ;;  %v3752_v33 = vpack.c.bf16 (!%p2152_p9), %v4140_v62, %v4139_v53  ;;  %v3758_v61 = vpack.c.bf16 (!%p2152_p9), %v4142_v30, %v4141_v41  ;;  %v4144_v42 = vld [vmem:[#allocation28_spill] sm:$0xff] (!%p2152_p9)  ;;  %v4145_v34 = vld [vmem:[#allocation31_spill] sm:$0xff] (!%p2152_p9)  ;;  %v4147_v24 = vld [vmem:[#allocation33_spill] sm:$0xff] (!%p2152_p9) }
 0x4ce   : > { %2438 = vmatpush1.bf16.msra.mxu0 %v3716_v5  ;;  %2472 = vmatprep.subr.bf16.mxu1 %v3730_v52  ;;  %v3762_v50 = vpack.c.bf16 %v4144_v42, %v4143_v63  ;;  %v4146_v25 = vld [vmem:[#allocation35_spill] sm:$0xff]  ;;  %v4148_v2 = vld [vmem:[#allocation37_spill] sm:$0xff]  ;;  %v4149_v55 = vld [vmem:[#allocation30_spill] sm:$0xff] }
 0x4cf   : > { %2440 = vmatprep.subr.bf16.mxu0 %v3726_v12  ;;  %v3768_v21 = vpack.c.bf16 %v4146_v25, %v4145_v34  ;;  %v3772_v54 = vpack.c.bf16 %v4148_v2, %v4147_v24  ;;  %v4150_v57 = vld [vmem:[#allocation34_spill] sm:$0xff]  ;;  %v4151_v56 = vld [vmem:[#allocation32_spill] sm:$0xff]  ;;  %v4153_v38 = vld [vmem:[#allocation39_spill] sm:$0xff]  ;;  %v3023_v24 = vmov 1983009808  }
 0x4d0   : > { %v3778_v0 = vpack.c.bf16 %v4150_v57, %v4149_v55  ;;  %v4152_v46 = vld [vmem:[#allocation36_spill] sm:$0xff]  ;;  %v4154_v29 = vld [vmem:[#allocation43_spill] sm:$0xff]  ;;  %v4155_v10 = vld [vmem:[#allocation41_spill] sm:$0xff]  ;;  %v1330_v2 = vunpack.c.l.s4 %v3023_v24  ;;  %v1332_v55 = vlaneseq }
 0x4d1   : > { %2474 = vmatpush1.bf16.msra.mxu1 %v3742_v60  ;;  %v3782_v37 = vpack.c.bf16 %v4152_v46, %v4151_v56  ;;  %v3788_v45 = vpack.c.bf16 %v4154_v29, %v4153_v38  ;;  %v4156_v11 = vld [vmem:[#allocation45_spill] sm:$0xff]  ;;  %v4157_v16 = vld [vmem:[#allocation38_spill] sm:$0xff]  ;;  %v4159_v20 = vld [vmem:[#allocation40_spill] sm:$0xff] }
 0x4d2   : > { %2442 = vmatpush1.bf16.msra.mxu0 %v3738_v17  ;;  %2476 = vmatprep.subr.bf16.mxu1 %v3752_v33  ;;  %v3792_v14 = vpack.c.bf16 %v4156_v11, %v4155_v10  ;;  %v4158_v18 = vld [vmem:[#allocation42_spill] sm:$0xff]  ;;  %v4160_v23 = vld [vmem:[#allocation44_spill] sm:$0xff]  ;;  %v4161_v27 = vld [vmem:[#allocation47_spill] sm:$0xff]  ;;  %v1331_v57 = vunpack.c.0.s8 %v1330_v2  ;;  %v1333_v56 = vshrl.u32 %v1332_v55, 7 }
 0x4d3   : > { %2444 = vmatprep.subr.bf16.mxu0 %v3748_v4  ;;  %v3798_v19 = vpack.c.bf16 %v4158_v18, %v4157_v16  ;;  %v3802_v26 = vpack.c.bf16 %v4160_v23, %v4159_v20  ;;  %v4162_v28 = vld [vmem:[#allocation51_spill] sm:$0xff]  ;;  %v4163_v40 = vld [vmem:[#allocation49_spill] sm:$0xff]  ;;  %v4165_v48 = vld [vmem:[#allocation46_spill] sm:$0xff] }
 0x4d4   : > { %v3808_v36 = vpack.c.bf16 %v4162_v28, %v4161_v27  ;;  %v4164_v43 = vld [vmem:[#allocation53_spill] sm:$0xff]  ;;  %v4166_v7 = vld [vmem:[#allocation50_spill] sm:$0xff]  ;;  %v4167_v49 = vld [vmem:[#allocation48_spill] sm:$0xff]  ;;  %v3884_v29 = vsub.s32 %v1331_v57, %v1333_v56 }
 0x4d5   : > { %2478 = vmatpush1.bf16.msra.mxu1 %v3762_v50  ;;  %v3812_v47 = vpack.c.bf16 %v4164_v43, %v4163_v40  ;;  %v3818_v9 = vpack.c.bf16 %v4166_v7, %v4165_v48  ;;  %v4168_v51 = vld [vmem:[#allocation52_spill] sm:$0xff]  ;;  %v4169_v15 = vld [vmem:[#allocation55_spill] sm:$0xff]  ;;  %v4171_v1 = vld [vmem:[#allocation57_spill] sm:$0xff] }
 0x4d6   : > { %2446 = vmatpush1.bf16.msra.mxu0 %v3758_v61  ;;  %2480 = vmatprep.subr.bf16.mxu1 %v3772_v54  ;;  %v3822_v13 = vpack.c.bf16 %v4168_v51, %v4167_v49  ;;  %v4170_v59 = vld [vmem:[#allocation59_spill] sm:$0xff]  ;;  %v4172_v3 = vld [vmem:[#allocation61_spill] sm:$0xff]  ;;  %v4173_v62 = vld [vmem:[#allocation54_spill] sm:$0xff] }
 0x4d7   : > { %2448 = vmatprep.subr.bf16.mxu0 %v3768_v21  ;;  %v3828_v22 = vpack.c.bf16 %v4170_v59, %v4169_v15  ;;  %v3832_v53 = vpack.c.bf16 %v4172_v3, %v4171_v1  ;;  %v4174_v41 = vld [vmem:[#allocation58_spill] sm:$0xff]  ;;  %v4175_v63 = vld [vmem:[#allocation56_spill] sm:$0xff]  ;;  %v1177_v25 = vld [vmem:[#allocation2] sm:$0x3] }
 0x4d8   : > { %v3838_v30 = vpack.c.bf16 %v4174_v41, %v4173_v62  ;;  %v4176_v42 = vld [vmem:[#allocation60_spill] sm:$0xff]  ;;  %v2153_v27 = vld [vmem:[%s3183_s27 + $0x18] sm:$0xff] }
 0x4d9   : > { %2482 = vmatpush1.bf16.msra.mxu1 %v3782_v37  ;;  %v3842_v34 = vpack.c.bf16 %v4176_v42, %v4175_v63  ;;  %v1178_v42 = vld [vmem:[#allocation3] sm:$0x3] }
 0x4da   : > { %2450 = vmatpush1.bf16.msra.mxu0 %v3778_v0  ;;  %2484 = vmatprep.subr.bf16.mxu1 %v3792_v14 }
 0x4db   : > { %2452 = vmatprep.subr.bf16.mxu0 %v3788_v45 }
 0x4dd   : > { %2486 = vmatpush1.bf16.msra.mxu1 %v3802_v26 }
 0x4de   : > { %2454 = vmatpush1.bf16.msra.mxu0 %v3798_v19  ;;  %2488 = vmatprep.subr.bf16.mxu1 %v3812_v47 }
 0x4df   : > { %2456 = vmatprep.subr.bf16.mxu0 %v3808_v36 }
 0x4e1   : > { %2490 = vmatpush1.bf16.msra.mxu1 %v3822_v13 }
 0x4e2   : > { %2458 = vmatpush1.bf16.msra.mxu0 %v3818_v9  ;;  %2492 = vmatprep.subr.bf16.mxu1 %v3832_v53 }
 0x4e3   : > { %2460 = vmatprep.subr.bf16.mxu0 %v3828_v22 }
 0x4e5   : > { %2494 = vmatpush1.bf16.msra.mxu1 %v3842_v34 }
 0x4e6   : > { %2462 = vmatpush1.bf16.msra.mxu0 %v3838_v30  ;;  %2528 = vmatprep.subr.bf16.mxu1 %v3692_v32 }
 0x4e7   : > { %2496 = vmatprep.subr.bf16.mxu0 %v3688_v31 }
 0x4e8   : > { %1317 = vmatmul.mubr.f32.vlgmr.msra.gmra.mrb[0].mxu1 %v1177_v25 }
 0x4e9   : > { %1246 = vmatmul.mubr.f32.vlgmr.msra.gmra.mrb[0].mxu0 %v1177_v25  ;;  %2530 = vmatpush1.bf16.msra.mxu1 %v3700_v39 }
 0x4ea   : > { %2498 = vmatpush1.bf16.msra.mxu0 %v3696_v35  ;;  %2532 = vmatprep.subr.bf16.mxu1 %v3708_v6 }
 0x4eb   : > { %2500 = vmatprep.subr.bf16.mxu0 %v3704_v44  ;;  %1445 = vmatprep.mubr.f32.mxu0 %v3022_v58 }
 0x4ec   : > { %1516 = vmatprep.mubr.f32.mxu1 %v3022_v58 }
 0x4ed   : > { %2534 = vmatpush1.bf16.msra.mxu1 %v3720_v8 }
 0x4ee   : > { %2502 = vmatpush1.bf16.msra.mxu0 %v3716_v5  ;;  %2536 = vmatprep.subr.bf16.mxu1 %v3730_v52 }
 0x4ef   : > { %2504 = vmatprep.subr.bf16.mxu0 %v3726_v12 }
 0x4f1   : > { %2538 = vmatpush1.bf16.msra.mxu1 %v3742_v60 }
 0x4f2   : > { %2506 = vmatpush1.bf16.msra.mxu0 %v3738_v17  ;;  %2540 = vmatprep.subr.bf16.mxu1 %v3752_v33 }
 0x4f3   : > { %2508 = vmatprep.subr.bf16.mxu0 %v3748_v4 }
 0x4f5   : > { %2542 = vmatpush1.bf16.msra.mxu1 %v3762_v50 }
 0x4f6   : > { %2510 = vmatpush1.bf16.msra.mxu0 %v3758_v61  ;;  %2544 = vmatprep.subr.bf16.mxu1 %v3772_v54 }
 0x4f7   : > { %2512 = vmatprep.subr.bf16.mxu0 %v3768_v21 }
 0x4f9   : > { %2546 = vmatpush1.bf16.msra.mxu1 %v3782_v37 }
 0x4fa   : > { %2514 = vmatpush1.bf16.msra.mxu0 %v3778_v0  ;;  %2548 = vmatprep.subr.bf16.mxu1 %v3792_v14 }
 0x4fb   : > { %2516 = vmatprep.subr.bf16.mxu0 %v3788_v45 }
 0x4fd   : > { %2550 = vmatpush1.bf16.msra.mxu1 %v3802_v26 }
 0x4fe   : > { %2518 = vmatpush1.bf16.msra.mxu0 %v3798_v19  ;;  %2552 = vmatprep.subr.bf16.mxu1 %v3812_v47 }
 0x4ff   : > { %2520 = vmatprep.subr.bf16.mxu0 %v3808_v36 }
 0x501   : > { %2554 = vmatpush1.bf16.msra.mxu1 %v3822_v13 }
 0x502   : > { %2522 = vmatpush1.bf16.msra.mxu0 %v3818_v9  ;;  %2556 = vmatprep.subr.bf16.mxu1 %v3832_v53 }
 0x503   : > { %2524 = vmatprep.subr.bf16.mxu0 %v3828_v22 }
 0x505   : > { %2558 = vmatpush1.bf16.msra.mxu1 %v3842_v34 }
 0x506   : > { %2526 = vmatpush1.bf16.msra.mxu0 %v3838_v30  ;;  %2592 = vmatprep.subr.bf16.mxu1 %v3692_v32 }
 0x507   : > { %2560 = vmatprep.subr.bf16.mxu0 %v3688_v31 }
 0x5bb   : > { %v1318_v38 = vpop.f32.mrb[0].mxu1 }
 0x5bc   : > { %v1247_v46 = vpop.f32.mrb[0].mxu0  ;;  %v1320_v11 = vpop.f32.mrb[1].mxu1 }
 0x5bd   : > { %v1249_v10 = vpop.f32.mrb[1].mxu0  ;;  %v1328_v18 = vcombine.low %v1318_v38, %v1320_v11 }
 0x5be   : > { %v1327_v16 = vcombine.low %v1247_v46, %v1249_v10 }
 0x5bf   : > { %v1342_v23 = vrot.slane %v1328_v18, %v3884_v29 }
 0x5c0   : > { %v1335_v20 = vrot.slane %v1327_v16, %v3884_v29 }
 0x5c2   : > { %v1343_v28 = vcombine.low %v1335_v20, %v1342_v23 }
 0x5c4   : > { %v1345_v40 = vadd.f32 %v2153_v27, %v1343_v28 }
 0x5c6   : > { %v2154_v43 = vmul.f32 -1.442695, %v1345_v40  ;;  %v1353_v48 = vrot.slane %v1345_v40, 2  ;;  %v1364_v49 = vrot.slane %v1345_v40, 6  ;;  %v1361_v59 = vrot.slane %v1345_v40, 4 }
 0x5c8   : > { %2840 = vpow2.f32 %v2154_v43  ;;  %v2155_v7 = vmul.f32 -1.442695, %v1353_v48  ;;  %v2156_v51 = vmul.f32 -1.442695, %v1364_v49  ;;  %v2158_v43 = vld [vmem:[%s3183_s27 + $0x10] sm:$0xff] }
 0x5ca   : > { %2842 = vpow2.f32 %v2155_v7 }
 0x5cb   : > { %2844 = vpow2.f32 %v2156_v51 }
 0x5d2   : > { %v2841_v15 = vpop.eup %2840 }
 0x5d3   : > { %v1349_v1 = vadd.f32 1.0, %v2841_v15 }
 0x5d4   : > { %v2843_v3 = vpop.eup %2842 }
 0x5d5   : > { %2846 = vrcp.f32 %v1349_v1  ;;  %v1358_v62 = vadd.f32 1.0, %v2843_v3  ;;  %v2845_v41 = vpop.eup %2844 }
 0x5d6   : > { %2848 = vtanh.f32 %v1361_v59  ;;  %v1369_v2 = vadd.f32 1.0, %v2845_v41 }
 0x5d7   : > { %2850 = vrcp.f32 %v1358_v62 }
 0x5d8   : > { %2852 = vrcp.f32 %v1369_v2 }
 0x5df   : > { %v2847_v63 = vpop.eup %2846 }
 0x5e0   : > { %v2849_v25 = vpop.eup %2848 }
 0x5e1   : > { %v2851_v24 = vpop.eup %2850  ;;  %v1373_v57 = vmul.f32 %v2849_v25, %v2847_v63 }
 0x5e2   : > { %v1372_v55 = vmul.f32 %v2851_v24, %v1178_v42  ;;  %v2853_v46 = vpop.eup %2852 }
 0x5e4   : > { %v3889_v56 = vadd.f32 %v1373_v57, %v1372_v55 }
 0x5e6   : > { %2854 = vtanh.f32 %v3889_v56 }
 0x5f0   : > { %v2855_v38 = vpop.eup %2854 }
 0x5f1   : > { %v1376_v10 = vmul.f32 %v2855_v38, %v2853_v46 }
 0x5f3   : > { %2157 = vst [vmem:[%s3199_s28 + $0x6] sm:$0x3] %v1376_v10  ;;  %1446 = vmatmul.mubr.f32.vlgmr.msra.gmra.mrb[2].mxu0 %v1376_v10  ;;  %1517 = vmatmul.mubr.f32.vlgmr.msra.gmra.mrb[2].mxu1 %v1376_v10 }
 0x5f4   : > { %2562 = vmatpush1.bf16.msra.mxu0 %v3696_v35  ;;  %2594 = vmatpush1.bf16.msra.mxu1 %v3700_v39 }
 0x5f5   : > { %2564 = vmatprep.subr.bf16.mxu0 %v3704_v44  ;;  %2596 = vmatprep.subr.bf16.mxu1 %v3708_v6 }
 0x5f6   : > { %1645 = vmatprep.mubr.f32.mxu0 %v3022_v58  ;;  %1716 = vmatprep.mubr.f32.mxu1 %v3022_v58 }
 0x5f8   : > { %2566 = vmatpush1.bf16.msra.mxu0 %v3716_v5  ;;  %2598 = vmatpush1.bf16.msra.mxu1 %v3720_v8 }
 0x5f9   : > { %2568 = vmatprep.subr.bf16.mxu0 %v3726_v12  ;;  %2600 = vmatprep.subr.bf16.mxu1 %v3730_v52 }
 0x5fc   : > { %2570 = vmatpush1.bf16.msra.mxu0 %v3738_v17  ;;  %2602 = vmatpush1.bf16.msra.mxu1 %v3742_v60 }
 0x5fd   : > { %2572 = vmatprep.subr.bf16.mxu0 %v3748_v4  ;;  %2604 = vmatprep.subr.bf16.mxu1 %v3752_v33 }
 0x600   : > { %2574 = vmatpush1.bf16.msra.mxu0 %v3758_v61  ;;  %2606 = vmatpush1.bf16.msra.mxu1 %v3762_v50 }
 0x601   : > { %2576 = vmatprep.subr.bf16.mxu0 %v3768_v21  ;;  %2608 = vmatprep.subr.bf16.mxu1 %v3772_v54 }
 0x604   : > { %2578 = vmatpush1.bf16.msra.mxu0 %v3778_v0  ;;  %2610 = vmatpush1.bf16.msra.mxu1 %v3782_v37 }
 0x605   : > { %2580 = vmatprep.subr.bf16.mxu0 %v3788_v45  ;;  %2612 = vmatprep.subr.bf16.mxu1 %v3792_v14 }
 0x608   : > { %2582 = vmatpush1.bf16.msra.mxu0 %v3798_v19  ;;  %2614 = vmatpush1.bf16.msra.mxu1 %v3802_v26 }
 0x609   : > { %2584 = vmatprep.subr.bf16.mxu0 %v3808_v36  ;;  %2616 = vmatprep.subr.bf16.mxu1 %v3812_v47 }
 0x60c   : > { %2586 = vmatpush1.bf16.msra.mxu0 %v3818_v9  ;;  %2618 = vmatpush1.bf16.msra.mxu1 %v3822_v13 }
 0x60d   : > { %2588 = vmatprep.subr.bf16.mxu0 %v3828_v22  ;;  %2620 = vmatprep.subr.bf16.mxu1 %v3832_v53 }
 0x610   : > { %2590 = vmatpush1.bf16.msra.mxu0 %v3838_v30  ;;  %2622 = vmatpush1.bf16.msra.mxu1 %v3842_v34 }
 0x611   : > { %2624 = vmatprep.subr.bf16.mxu0 %v3688_v31  ;;  %2656 = vmatprep.subr.bf16.mxu1 %v3692_v32 }
 0x6c6   : > { %v1447_v11 = vpop.f32.mrb[2].mxu0  ;;  %v1518_v16 = vpop.f32.mrb[2].mxu1 }
 0x6c7   : > { %v1449_v18 = vpop.f32.mrb[3].mxu0  ;;  %v1520_v20 = vpop.f32.mrb[3].mxu1 }
 0x6c8   : > { %v1527_v23 = vcombine.low %v1447_v11, %v1449_v18  ;;  %v1528_v27 = vcombine.low %v1518_v16, %v1520_v20 }
 0x6ca   : > { %v1535_v28 = vrot.slane %v1527_v23, %v3884_v29  ;;  %v1542_v40 = vrot.slane %v1528_v27, %v3884_v29 }
 0x6cc   : > { %v1543_v48 = vcombine.low %v1535_v28, %v1542_v40 }
 0x6ce   : > { %v1545_v7 = vadd.f32 %v2158_v43, %v1543_v48  ;;  %v1779_v48 = vld [vmem:[%s3183_s27] sm:$0xff] }
 0x6d0   : > { %v2159_v49 = vmul.f32 -1.442695, %v1545_v7  ;;  %v1553_v51 = vrot.slane %v1545_v7, 2  ;;  %v1564_v31 = vrot.slane %v1545_v7, 6  ;;  %v1561_v1 = vrot.slane %v1545_v7, 4 }
 0x6d2   : > { %2856 = vpow2.f32 %v2159_v49  ;;  %v2160_v15 = vmul.f32 -1.442695, %v1553_v51  ;;  %v2161_v32 = vmul.f32 -1.442695, %v1564_v31 }
 0x6d4   : > { %2858 = vpow2.f32 %v2160_v15 }
 0x6d5   : > { %2860 = vpow2.f32 %v2161_v32 }
 0x6dc   : > { %v2857_v59 = vpop.eup %2856 }
 0x6dd   : > { %v1549_v3 = vadd.f32 1.0, %v2857_v59 }
 0x6de   : > { %v2859_v62 = vpop.eup %2858 }
 0x6df   : > { %2862 = vrcp.f32 %v1549_v3  ;;  %v1558_v41 = vadd.f32 1.0, %v2859_v62  ;;  %v2861_v63 = vpop.eup %2860 }
 0x6e0   : > { %2864 = vtanh.f32 %v1561_v1  ;;  %v1569_v2 = vadd.f32 1.0, %v2861_v63 }
 0x6e1   : > { %2866 = vrcp.f32 %v1558_v41 }
 0x6e2   : > { %2868 = vrcp.f32 %v1569_v2 }
 0x6e9   : > { %v2863_v42 = vpop.eup %2862 }
 0x6ea   : > { %v2865_v25 = vpop.eup %2864 }
 0x6eb   : > { %v2867_v24 = vpop.eup %2866  ;;  %v1573_v57 = vmul.f32 %v2865_v25, %v2863_v42 }
 0x6ec   : > { %v1572_v55 = vmul.f32 %v2867_v24, %v3889_v56  ;;  %v2869_v38 = vpop.eup %2868 }
 0x6ee   : > { %v3931_v46 = vadd.f32 %v1573_v57, %v1572_v55 }
 0x6f0   : > { %2870 = vtanh.f32 %v3931_v46 }
 0x6fa   : > { %v2871_v10 = vpop.eup %2870 }
 0x6fb   : > { %v1576_v11 = vmul.f32 %v2871_v10, %v2869_v38 }
 0x6fd   : > { %2162 = vst [vmem:[%s3199_s28 + $0x4] sm:$0x3] %v1576_v11  ;;  %1646 = vmatmul.mubr.f32.vlgmr.msra.gmra.mrb[4].mxu0 %v1576_v11  ;;  %1717 = vmatmul.mubr.f32.vlgmr.msra.gmra.mrb[4].mxu1 %v1576_v11 }
 0x6fe   : > { %2626 = vmatpush1.bf16.msra.mxu0 %v3696_v35  ;;  %2658 = vmatpush1.bf16.msra.mxu1 %v3700_v39 }
 0x6ff   : > { %2628 = vmatprep.subr.bf16.mxu0 %v3704_v44  ;;  %2660 = vmatprep.subr.bf16.mxu1 %v3708_v6 }
 0x700   : > { %1844 = vmatprep.mubr.f32.mxu0 %v3022_v58  ;;  %1915 = vmatprep.mubr.f32.mxu1 %v3022_v58  ;;  %v2163_v58 = vld [vmem:[%s3183_s27 + $0x8] sm:$0xff] }
 0x702   : > { %2630 = vmatpush1.bf16.msra.mxu0 %v3716_v5  ;;  %2662 = vmatpush1.bf16.msra.mxu1 %v3720_v8 }
 0x703   : > { %2632 = vmatprep.subr.bf16.mxu0 %v3726_v12  ;;  %2664 = vmatprep.subr.bf16.mxu1 %v3730_v52 }
 0x706   : > { %2634 = vmatpush1.bf16.msra.mxu0 %v3738_v17  ;;  %2666 = vmatpush1.bf16.msra.mxu1 %v3742_v60 }
 0x707   : > { %2636 = vmatprep.subr.bf16.mxu0 %v3748_v4  ;;  %2668 = vmatprep.subr.bf16.mxu1 %v3752_v33 }
 0x70a   : > { %2638 = vmatpush1.bf16.msra.mxu0 %v3758_v61  ;;  %2670 = vmatpush1.bf16.msra.mxu1 %v3762_v50 }
 0x70b   : > { %2640 = vmatprep.subr.bf16.mxu0 %v3768_v21  ;;  %2672 = vmatprep.subr.bf16.mxu1 %v3772_v54 }
 0x70e   : > { %2642 = vmatpush1.bf16.msra.mxu0 %v3778_v0  ;;  %2674 = vmatpush1.bf16.msra.mxu1 %v3782_v37 }
 0x70f   : > { %2644 = vmatprep.subr.bf16.mxu0 %v3788_v45  ;;  %2676 = vmatprep.subr.bf16.mxu1 %v3792_v14 }
 0x712   : > { %2646 = vmatpush1.bf16.msra.mxu0 %v3798_v19  ;;  %2678 = vmatpush1.bf16.msra.mxu1 %v3802_v26 }
 0x713   : > { %2648 = vmatprep.subr.bf16.mxu0 %v3808_v36  ;;  %2680 = vmatprep.subr.bf16.mxu1 %v3812_v47 }
 0x716   : > { %2650 = vmatpush1.bf16.msra.mxu0 %v3818_v9  ;;  %2682 = vmatpush1.bf16.msra.mxu1 %v3822_v13 }
 0x717   : > { %2652 = vmatprep.subr.bf16.mxu0 %v3828_v22  ;;  %2684 = vmatprep.subr.bf16.mxu1 %v3832_v53 }
 0x71a   : > { %2654 = vmatpush1.bf16.msra.mxu0 %v3838_v30  ;;  %2686 = vmatpush1.bf16.msra.mxu1 %v3842_v34 }
 0x7d0   : > { %v1647_v35 = vpop.f32.mrb[4].mxu0  ;;  %v1718_v39 = vpop.f32.mrb[4].mxu1 }
 0x7d1   : > { %v1649_v44 = vpop.f32.mrb[5].mxu0  ;;  %v1720_v6 = vpop.f32.mrb[5].mxu1 }
 0x7d2   : > { %v1727_v5 = vcombine.low %v1647_v35, %v1649_v44  ;;  %v1728_v8 = vcombine.low %v1718_v39, %v1720_v6 }
 0x7d4   : > { %v1735_v12 = vrot.slane %v1727_v5, %v3884_v29  ;;  %v1742_v52 = vrot.slane %v1728_v8, %v3884_v29 }
 0x7d6   : > { %v1743_v17 = vcombine.low %v1735_v12, %v1742_v52 }
 0x7d8   : > { %v1745_v60 = vadd.f32 %v2163_v58, %v1743_v17 }
 0x7da   : > { %v2164_v4 = vmul.f32 -1.442695, %v1745_v60  ;;  %v1753_v33 = vrot.slane %v1745_v60, 2  ;;  %v1764_v50 = vrot.slane %v1745_v60, 6  ;;  %v1761_v0 = vrot.slane %v1745_v60, 4 }
 0x7dc   : > { %2872 = vpow2.f32 %v2164_v4  ;;  %v2165_v61 = vmul.f32 -1.442695, %v1753_v33  ;;  %v2166_v21 = vmul.f32 -1.442695, %v1764_v50 }
 0x7de   : > { %2874 = vpow2.f32 %v2165_v61 }
 0x7df   : > { %2876 = vpow2.f32 %v2166_v21 }
 0x7e6   : > { %v2873_v54 = vpop.eup %2872 }
 0x7e7   : > { %v1749_v37 = vadd.f32 1.0, %v2873_v54 }
 0x7e8   : > { %v2875_v45 = vpop.eup %2874 }
 0x7e9   : > { %2878 = vrcp.f32 %v1749_v37  ;;  %v1758_v14 = vadd.f32 1.0, %v2875_v45  ;;  %v2877_v19 = vpop.eup %2876 }
 0x7ea   : > { %2880 = vtanh.f32 %v1761_v0  ;;  %v1769_v9 = vadd.f32 1.0, %v2877_v19 }
 0x7eb   : > { %2882 = vrcp.f32 %v1758_v14 }
 0x7ec   : > { %2884 = vrcp.f32 %v1769_v9 }
 0x7f3   : > { %v2879_v26 = vpop.eup %2878 }
 0x7f4   : > { %v2881_v36 = vpop.eup %2880 }
 0x7f5   : > { %v2883_v47 = vpop.eup %2882  ;;  %v1773_v22 = vmul.f32 %v2881_v36, %v2879_v26 }
 0x7f6   : > { %v1772_v13 = vmul.f32 %v2883_v47, %v3931_v46  ;;  %v2885_v30 = vpop.eup %2884 }
 0x7f8   : > { %v1774_v53 = vadd.f32 %v1773_v22, %v1772_v13 }
 0x7fa   : > { %2886 = vtanh.f32 %v1774_v53 }
 0x804   : > { %v2887_v34 = vpop.eup %2886 }
 0x805   : > { %v1776_v56 = vmul.f32 %v2887_v34, %v2885_v30 }
 0x807   : > { %2167 = vst [vmem:[%s3199_s28 + $0x2] sm:$0x3] %v1776_v56  ;;  %1845 = vmatmul.mubr.f32.vlgmr.msra.gmra.mrb[6].mxu0 %v1776_v56  ;;  %1916 = vmatmul.mubr.f32.vlgmr.msra.gmra.mrb[6].mxu1 %v1776_v56 }
 0x8da   : > { %v1846_v16 = vpop.f32.mrb[6].mxu0  ;;  %v1917_v18 = vpop.f32.mrb[6].mxu1 }
 0x8db   : > { %v1848_v20 = vpop.f32.mrb[7].mxu0  ;;  %v1919_v23 = vpop.f32.mrb[7].mxu1 }
 0x8dc   : > { %v1926_v27 = vcombine.low %v1846_v16, %v1848_v20  ;;  %v1927_v28 = vcombine.low %v1917_v18, %v1919_v23 }
 0x8de   : > { %v1934_v40 = vrot.slane %v1926_v27, %v3884_v29  ;;  %v1941_v43 = vrot.slane %v1927_v28, %v3884_v29 }
 0x8e0   : > { %v1942_v7 = vcombine.low %v1934_v40, %v1941_v43 }
 0x8e2   : > { %v1944_v49 = vadd.f32 %v1942_v7, %v1779_v48 }
 0x8e4   : > { %v2168_v51 = vmul.f32 -1.442695, %v1944_v49  ;;  %v1952_v15 = vrot.slane %v1944_v49, 2  ;;  %v1963_v32 = vrot.slane %v1944_v49, 6  ;;  %v1960_v3 = vrot.slane %v1944_v49, 4 }
 0x8e6   : > { %2888 = vpow2.f32 %v2168_v51  ;;  %v2169_v31 = vmul.f32 -1.442695, %v1952_v15  ;;  %v2170_v59 = vmul.f32 -1.442695, %v1963_v32 }
 0x8e8   : > { %2890 = vpow2.f32 %v2169_v31 }
 0x8e9   : > { %2892 = vpow2.f32 %v2170_v59 }
 0x8f0   : > { %v2889_v1 = vpop.eup %2888 }
 0x8f1   : > { %v1948_v62 = vadd.f32 1.0, %v2889_v1 }
 0x8f2   : > { %v2891_v41 = vpop.eup %2890 }
 0x8f3   : > { %2894 = vrcp.f32 %v1948_v62  ;;  %v1957_v63 = vadd.f32 1.0, %v2891_v41  ;;  %v2893_v29 = vpop.eup %2892 }
 0x8f4   : > { %2896 = vtanh.f32 %v1960_v3  ;;  %v1968_v2 = vadd.f32 1.0, %v2893_v29 }
 0x8f5   : > { %2898 = vrcp.f32 %v1957_v63 }
 0x8f6   : > { %2900 = vrcp.f32 %v1968_v2 }
 0x8fd   : > { %v2895_v42 = vpop.eup %2894 }
 0x8fe   : > { %v2897_v25 = vpop.eup %2896 }
 0x8ff   : > { %v2899_v24 = vpop.eup %2898  ;;  %v1972_v57 = vmul.f32 %v2897_v25, %v2895_v42 }
 0x900   : > { %v1971_v55 = vmul.f32 %v2899_v24, %v1774_v53  ;;  %v2901_v38 = vpop.eup %2900 }
 0x902   : > { %v1973_v46 = vadd.f32 %v1972_v57, %v1971_v55 }
 0x904   : > { %2902 = vtanh.f32 %v1973_v46  ;;  %1978 = vst [vmem:[#allocation3] sm:$0x3] %v1973_v46 }
 0x90e   : > { %v2903_v10 = vpop.eup %2902 }
 0x90f   : > { %v1975_v11 = vmul.f32 %v2903_v10, %v2901_v38 }
 0x911   : > { %1976 = vst [vmem:[%s3199_s28] sm:$0x3] %v1975_v11  ;;  %1977 = vst [vmem:[#allocation2] sm:$0x3] %v1975_v11 }
 0x912 PF: > { %s15_s18 = sadd.s32 1, %s3014_s18   ;;  %s4177_s9 = smov %s2982_s10 }
 0x913   : > { %p12_p10 = scmp.ge.s32.totalorder %s15_s18, 6   ;;  %s4178_s10 = smov %s2986_s11 }
 0x914   : > { %s4179_s11 = smov %s3118_s5  ;;  %s4180_s12 = smov %s2994_s13 }
 0x915   : > { %s4181_s13 = smov %s3136_s25  ;;  %s4182_s14 = smov %s3006_s16 }
 0x916   : > { %s4183_s15 = smov %s3010_s17  ;;  %s4184_s16 = smov %s4187_s20 }
 0x917   : > { %s4185_s17 = smov %s4191_s21  ;;  %14 = sbr.rel (!%p12_p10) target bundleno = 6 (0x6), region = 138 }
 0x91e   :  { %2021 = vsyncpa [#allocation6], 1 }
 0x91f   :  { %2023 = vsyncpa [#allocation6 + $0x1], 1 }

// kernel: crnn_head.8
= control target key start
LH: loop header
LB: loop body
LE: loop exit
PB: predicated region body
PF: predicated region fallthrough
CT: control target
= control target key end

     0   :  { %s2919_s9 = smov 0   ;;  %s2921_s10 = smov 0   ;;  %s3804_s0 = inlined_call_operand.vmem [shape: f32[8,2,1024], index: 0, kind: input, shape index: {}]   ;;  %s3805_s1 = inlined_call_operand.vmem [shape: f32[2,128,512], index: 1, kind: input, shape index: {}]   ;;  %s3806_s2 = inlined_call_operand.vmem [shape: f32[2,8,2,128], index: 2, kind: output, shape index: {}]  }
   0x1   :  { %s2923_s11 = smov 0   ;;  %s2925_s12 = smov 0  }
   0x2   :  { %s2927_s13 = smov 0   ;;  %s2929_s14 = smov 0  }
   0x3   :  { %s2931_s15 = smov 0  }
   0x4 LB: > { %s21_s16 = sadd.s32 1, %s2889_s13  ;;  %s24_s17 = sadd.s32 1, %s2893_s14  ;;  %s2897_s15 = sphi %s2931_s15, %s12_s15   ;;  %s2893_s14 = sphi %s2929_s14, %s3978_s14   ;;  %s2889_s13 = sphi %s2927_s13, %s3977_s13   ;;  %s2885_s12 = sphi %s2925_s12, %s3976_s12   ;;  %s2881_s11 = sphi %s2923_s11, %s3975_s11   ;;  %s2877_s10 = sphi %s2921_s10, %s3974_s10   ;;  %s2873_s9 = sphi %s2919_s9, %s3973_s9  }
   0x5   : > { %p22_p0 = scmp.ge.s32.totalorder %s21_s16, 2  ;;  %s2079_s18 = sshll.u32 %s2893_s14, 1 }
   0x6   : > { %s29_s19 = ssub.s32 1, %s2079_s18  ;;  %p48_p1 = scmp.ne.s32.totalorder %s2877_s10, %s2873_s9 }
   0x7   : > { %s3980_s16 = smov (%p22_p0, %s21_s16), 0  ;;  %s3982_s17 = smov (!%p22_p0, %s24_s17), %s2893_s14 }
   0x8   : > { %p26_p2 = scmp.ge.s32.totalorder %s3982_s17, 2  ;;  %p49_p3 = scmp.eq.s32.totalorder %s2897_s15, 0 }
   0x9   : > { %s30_s20 = smul.u32 %s2889_s13, %s29_s19  ;;  %s41_s30 = sadd.s32 1, %s2877_s10 }
   0xa   : > { %s3984_s17 = smov (%p26_p2, %s3982_s17), 0  ;;  %p2966_p4 = por %p49_p3, %p48_p1 }
   0xb   : > { %s2080_s22 = sshll.u32 %s3984_s17, 1  ;;  %s31_s24 = sadd.s32 %s2893_s14, %s30_s20 }
   0xc   : > { %s33_s23 = ssub.s32 1, %s2080_s22  ;;  %s37_s26 = ssub.s32 %s2893_s14, %s3984_s17 }
   0xd   : > { %s34_s25 = smul.u32 %s33_s23, %s3980_s16  ;;  %p2084_p6 = scmp.ge.s32.totalorder %s2897_s15, 4 }
   0xf   : > { %s35_s27 = sadd.s32 %s34_s25, %s3984_s17  ;;  %136 = sbr.rel (%p2084_p6) target bundleno = 31 (0x1f), region = 16 }
  0x10   : > { %s36_s28 = ssub.s32 %s31_s24, %s35_s27 }
  0x11   : > { %s38_s29 = sor.u32 %s37_s26, %s36_s28 }
  0x12   : > { %p39_p5 = scmp.eq.s32.totalorder %s38_s29, 0 }
  0x14   : > { %s2978_s3 = scalar_select %p39_p5, %s2877_s10, %s41_s30  }
  0x16   : > { %139 = sbr.rel (!%p2966_p4) target bundleno = 31 (0x1f), region = 20  ;;  %s141_s4 = sand.u32 (%p2966_p4), 1, %s2877_s10  }
  0x17   : > { %s2088_s5 = sshll.u32 (%p2966_p4), %s2893_s14, 2  ;;  %s2085_s6 = sshll.u32 (%p2966_p4), %s141_s4, 5 }
  0x18   : > { %s2140_s7 = sshll.u32 (%p2966_p4), %s31_s24, 5  ;;  %s143_s23 = scalar_lea.vmem (%p2966_p4), [#allocation4], %s2085_s6 }
  0x19   : > { %s151_s8 = sadd.s32 (%p2966_p4), %s2140_s7, %s2088_s5 }
  0x1a   : > { %s2090_s18 = sshll.u32 (%p2966_p4), %s151_s8, 1 }
  0x1b   : > { %s153_s22 = scalar_lea.vmem (%p2966_p4), %s3804_s0, %s2090_s18 }
  0x1c   : > { %v187_v0 = vld [vmem:[%s153_s22] sm:$0xff] (%p2966_p4)  ;;  %v189_v1 = vld [vmem:[%s153_s22 + $0x10] sm:$0xff] (%p2966_p4) }
  0x1d   : > { %v191_v2 = vld [vmem:[%s153_s22 + $0x20] sm:$0xff]  ;;  %188 = vst [vmem:[%s143_s23] sm:$0xff] %v187_v0  ;;  %190 = vst [vmem:[%s143_s23 + $0x8] sm:$0xff] %v189_v1  ;;  %v193_v3 = vld [vmem:[%s153_s22 + $0x30] sm:$0xff] }
  0x1e   : > { %192 = vst [vmem:[%s143_s23 + $0x10] sm:$0xff] %v191_v2  ;;  %194 = vst [vmem:[%s143_s23 + $0x18] sm:$0xff] %v193_v3 }
  0x1f PF: > { %p2091_p7 = scmp.ge.s32.totalorder %s2897_s15, 1  ;;  %p207_p8 = scmp.lt.s32.totalorder %s2897_s15, 5 }
  0x21   : > { %p208_p9 = pnand %p2091_p7, %p207_p8 }
  0x23   : > { %211 = sbr.rel (%p208_p9) target bundleno = 2284 (0x8ec), region = 62 }
  0x2a   : > { %s214_s21 = sand.u32 1, %s2873_s9   ;;  %p254_p10 = scmp.lt.s32.totalorder %s2885_s12, 1 }
  0x2b   : > { %s2092_s24 = sshll.u32 %s214_s21, 5  ;;  %s2095_s25 = sshll.u32 %s2885_s12, 1 }
  0x2c   : > { %s260_s26 = ssub.s32 1, %s2095_s25  ;;  %s3006_s23 = scalar_lea.vmem [#allocation4], %s2092_s24 }
  0x2d   : > { %s255_s27 = scalar_select %p254_p10, %s2885_s12, 1 }
  0x2e   : > { %s261_s28 = smul.u32 %s2881_s11, %s260_s26  ;;  %p2099_p12 = scmp.ne.s32.totalorder %s2881_s11, 0 }
  0x2f   : > { %s2141_s29 = sshll.u32 %s255_s27, 9  ;;  %s2097_s8 = sshll.u32 %s255_s27, 3  ;;  %v2899_v4 = vmov (!%p2099_p12), 0.0  }
  0x30   : > { %s2998_s5 = scalar_lea.vmem %s3805_s1, %s2141_s29  ;;  %s262_s6 = sadd.s32 %s2885_s12, %s261_s28  ;;  %281 = vst [vmem:[#allocation2] sm:$0x3] (!%p2099_p12), %v2899_v4  ;;  %282 = vst [vmem:[#allocation3] sm:$0x3] (!%p2099_p12), %v2899_v4 }
  0x31   : > { %s2096_s7 = sshll.u32 %s262_s6, 2  ;;  %280 = sbr.rel (%p2099_p12) target bundleno = 56 (0x38), region = 70 }
  0x32   : > { %p266_p11 = scmp.lt.s32.totalorder %s2096_s7, 7 }
  0x34   : > { %s3986_s7 = smov (!%p266_p11, %s2096_s7), 7 }
  0x35   : > { %s269_s18 = sadd.s32 %s2097_s8, %s3986_s7 }
  0x36   : > { %s2098_s19 = sshll.u32 %s269_s18, 1 }
  0x37   : > { %s3004_s22 = scalar_lea.vmem %s3806_s2, %s2098_s19 }
  0x38 PF: > { %v3010_v5 = vld [vmem:[%s2998_s5] sm:$0xff]  ;;  %v3013_v6 = vld [vmem:[%s2998_s5 + $0x8] sm:$0xff]  ;;  %v3016_v7 = vld [vmem:[%s2998_s5 + $0x10] sm:$0xff]  ;;  %p2100_p13 = scmp.ne.s32.totalorder %s2885_s12, 0 }
  0x39   : > { %v3019_v8 = vld [vmem:[%s2998_s5 + $0x18] sm:$0xff]  ;;  %v3022_v9 = vld [vmem:[%s2998_s5 + $0x20] sm:$0xff]  ;;  %v3025_v10 = vld [vmem:[%s2998_s5 + $0x28] sm:$0xff] }
  0x3a   : > { %3859 = vst [vmem:[#allocation5_spill] sm:$0xff] %v3025_v10  ;;  %v3028_v11 = vld [vmem:[%s2998_s5 + $0x30] sm:$0xff]  ;;  %v3031_v12 = vld [vmem:[%s2998_s5 + $0x38] sm:$0xff]  ;;  %v3034_v13 = vld [vmem:[%s2998_s5 + $0x40] sm:$0xff] }
  0x3b   : > { %3860 = vst [vmem:[#allocation6_spill] sm:$0xff] %v3028_v11  ;;  %v3037_v14 = vld [vmem:[%s2998_s5 + $0x48] sm:$0xff]  ;;  %v3040_v15 = vld [vmem:[%s2998_s5 + $0x50] sm:$0xff]  ;;  %v3043_v16 = vld [vmem:[%s2998_s5 + $0x58] sm:$0xff] }
  0x3c   : > { %3861 = vst [vmem:[#allocation7_spill] sm:$0xff] %v3037_v14  ;;  %3862 = vst [vmem:[#allocation8_spill] sm:$0xff] %v3043_v16  ;;  %v3046_v17 = vld [vmem:[%s2998_s5 + $0x60] sm:$0xff]  ;;  %v3049_v18 = vld [vmem:[%s2998_s5 + $0x68] sm:$0xff] }
  0x3d   : > { %3863 = vst [vmem:[#allocation9_spill] sm:$0xff] %v3049_v18  ;;  %v3052_v19 = vld [vmem:[%s2998_s5 + $0x70] sm:$0xff]  ;;  %v3055_v20 = vld [vmem:[%s2998_s5 + $0x78] sm:$0xff]  ;;  %v3058_v21 = vld [vmem:[%s2998_s5 + $0x80] sm:$0xff] }
  0x3e   : > { %3864 = vst [vmem:[#allocation10_spill] sm:$0xff] %v3052_v19  ;;  %3865 = vst [vmem:[#allocation11_spill] sm:$0xff] %v3055_v20  ;;  %v3061_v22 = vld [vmem:[%s2998_s5 + $0x88] sm:$0xff]  ;;  %v3064_v23 = vld [vmem:[%s2998_s5 + $0x90] sm:$0xff] }
  0x3f   : > { %3866 = vst [vmem:[#allocation12_spill] sm:$0xff] %v3058_v21  ;;  %3867 = vst [vmem:[#allocation13_spill] sm:$0xff] %v3064_v23  ;;  %v3067_v24 = vld [vmem:[%s2998_s5 + $0x98] sm:$0xff]  ;;  %v3070_v25 = vld [vmem:[%s2998_s5 + $0xa0] sm:$0xff] }
  0x40   : > { %3868 = vst [vmem:[#allocation14_spill] sm:$0xff] %v3067_v24  ;;  %3869 = vst [vmem:[#allocation15_spill] sm:$0xff] %v3070_v25  ;;  %v3073_v26 = vld [vmem:[%s2998_s5 + $0xa8] sm:$0xff]  ;;  %v3076_v27 = vld [vmem:[%s2998_s5 + $0xb0] sm:$0xff] }
  0x41   : > { %3870 = vst [vmem:[#allocation16_spill] sm:$0xff] %v3073_v26  ;;  %3871 = vst [vmem:[#allocation17_spill] sm:$0xff] %v3076_v27  ;;  %v3079_v28 = vld [vmem:[%s2998_s5 + $0xb8] sm:$0xff]  ;;  %v3082_v29 = vld [vmem:[%s2998_s5 + $0xc0] sm:$0xff] }
  0x42   : > { %3872 = vst [vmem:[#allocation18_spill] sm:$0xff] %v3079_v28  ;;  %3873 = vst [vmem:[#allocation19_spill] sm:$0xff] %v3082_v29  ;;  %v3085_v30 = vld [vmem:[%s2998_s5 + $0xc8] sm:$0xff]  ;;  %v3088_v31 = vld [vmem:[%s2998_s5 + $0xd0] sm:$0xff] }
  0x43   : > { %3874 = vst [vmem:[#allocation20_spill] sm:$0xff] %v3085_v30  ;;  %3875 = vst [vmem:[#allocation21_spill] sm:$0xff] %v3088_v31  ;;  %v3091_v32 = vld [vmem:[%s2998_s5 + $0xd8] sm:$0xff]  ;;  %v3094_v33 = vld [vmem:[%s2998_s5 + $0xe0] sm:$0xff] }
  0x44   : > { %3876 = vst [vmem:[#allocation22_spill] sm:$0xff] %v3091_v32  ;;  %3877 = vst [vmem:[#allocation23_spill] sm:$0xff] %v3094_v33  ;;  %v3097_v34 = vld [vmem:[%s2998_s5 + $0xe8] sm:$0xff]  ;;  %v3100_v35 = vld [vmem:[%s2998_s5 + $0xf0] sm:$0xff] }
  0x45   : > { %3878 = vst [vmem:[#allocation24_spill] sm:$0xff] %v3097_v34  ;;  %3879 = vst [vmem:[#allocation25_spill] sm:$0xff] %v3100_v35  ;;  %v3103_v36 = vld [vmem:[%s2998_s5 + $0xf8] sm:$0xff]  ;;  %v3106_v37 = vld [vmem:[%s2998_s5 + $0x100] sm:$0xff] }
  0x46   : > { %3880 = vst [vmem:[#allocation26_spill] sm:$0xff] %v3103_v36  ;;  %3881 = vst [vmem:[#allocation27_spill] sm:$0xff] %v3106_v37  ;;  %v3109_v38 = vld [vmem:[%s2998_s5 + $0x108] sm:$0xff]  ;;  %v3112_v39 = vld [vmem:[%s2998_s5 + $0x110] sm:$0xff] }
  0x47   : > { %3882 = vst [vmem:[#allocation28_spill] sm:$0xff] %v3109_v38  ;;  %3883 = vst [vmem:[#allocation29_spill] sm:$0xff] %v3112_v39  ;;  %v3115_v40 = vld [vmem:[%s2998_s5 + $0x118] sm:$0xff]  ;;  %v3118_v41 = vld [vmem:[%s2998_s5 + $0x120] sm:$0xff] }
  0x48   : > { %3884 = vst [vmem:[#allocation30_spill] sm:$0xff] %v3115_v40  ;;  %3885 = vst [vmem:[#allocation31_spill] sm:$0xff] %v3118_v41  ;;  %v3121_v42 = vld [vmem:[%s2998_s5 + $0x128] sm:$0xff]  ;;  %v3124_v43 = vld [vmem:[%s2998_s5 + $0x130] sm:$0xff] }
  0x49   : > { %3886 = vst [vmem:[#allocation32_spill] sm:$0xff] %v3121_v42  ;;  %3887 = vst [vmem:[#allocation33_spill] sm:$0xff] %v3124_v43  ;;  %v3127_v44 = vld [vmem:[%s2998_s5 + $0x138] sm:$0xff]  ;;  %v3130_v45 = vld [vmem:[%s2998_s5 + $0x140] sm:$0xff] }
  0x4a   : > { %3888 = vst [vmem:[#allocation34_spill] sm:$0xff] %v3127_v44  ;;  %3889 = vst [vmem:[#allocation35_spill] sm:$0xff] %v3130_v45  ;;  %v3133_v46 = vld [vmem:[%s2998_s5 + $0x148] sm:$0xff]  ;;  %v3136_v47 = vld [vmem:[%s2998_s5 + $0x150] sm:$0xff] }
  0x4b   : > { %3890 = vst [vmem:[#allocation36_spill] sm:$0xff] %v3133_v46  ;;  %3891 = vst [vmem:[#allocation37_spill] sm:$0xff] %v3136_v47  ;;  %v3139_v48 = vld [vmem:[%s2998_s5 + $0x158] sm:$0xff]  ;;  %v3142_v49 = vld [vmem:[%s2998_s5 + $0x160] sm:$0xff] }
  0x4c   : > { %3892 = vst [vmem:[#allocation38_spill] sm:$0xff] %v3139_v48  ;;  %3893 = vst [vmem:[#allocation39_spill] sm:$0xff] %v3142_v49  ;;  %v3145_v50 = vld [vmem:[%s2998_s5 + $0x168] sm:$0xff]  ;;  %v3148_v51 = vld [vmem:[%s2998_s5 + $0x170] sm:$0xff] }
  0x4d   : > { %3894 = vst [vmem:[#allocation40_spill] sm:$0xff] %v3145_v50  ;;  %3895 = vst [vmem:[#allocation41_spill] sm:$0xff] %v3148_v51  ;;  %v3151_v52 = vld [vmem:[%s2998_s5 + $0x178] sm:$0xff]  ;;  %v3154_v53 = vld [vmem:[%s2998_s5 + $0x180] sm:$0xff] }
  0x4e   : > { %3896 = vst [vmem:[#allocation42_spill] sm:$0xff] %v3151_v52  ;;  %3897 = vst [vmem:[#allocation43_spill] sm:$0xff] %v3154_v53  ;;  %v3157_v54 = vld [vmem:[%s2998_s5 + $0x188] sm:$0xff]  ;;  %v3160_v55 = vld [vmem:[%s2998_s5 + $0x190] sm:$0xff] }
  0x4f   : > { %3898 = vst [vmem:[#allocation44_spill] sm:$0xff] %v3157_v54  ;;  %3899 = vst [vmem:[#allocation45_spill] sm:$0xff] %v3160_v55  ;;  %v3163_v56 = vld [vmem:[%s2998_s5 + $0x198] sm:$0xff]  ;;  %v3166_v57 = vld [vmem:[%s2998_s5 + $0x1a0] sm:$0xff] }
  0x50   : > { %3900 = vst [vmem:[#allocation46_spill] sm:$0xff] %v3163_v56  ;;  %3901 = vst [vmem:[#allocation47_spill] sm:$0xff] %v3166_v57  ;;  %v3169_v58 = vld [vmem:[%s2998_s5 + $0x1a8] sm:$0xff]  ;;  %v3172_v59 = vld [vmem:[%s2998_s5 + $0x1b0] sm:$0xff]  ;;  %350 = sbr.rel (%p2100_p13) target bundleno = 1183 (0x49f), region = 74 }
  0x51   : > { %3902 = vst [vmem:[#allocation48_spill] sm:$0xff] %v3169_v58  ;;  %3903 = vst [vmem:[#allocation49_spill] sm:$0xff] %v3172_v59  ;;  %v3175_v60 = vld [vmem:[%s2998_s5 + $0x1b8] sm:$0xff]  ;;  %v3178_v61 = vld [vmem:[%s2998_s5 + $0x1c0] sm:$0xff] }
  0x52   : > { %3904 = vst [vmem:[#allocation50_spill] sm:$0xff] %v3175_v60  ;;  %3905 = vst [vmem:[#allocation51_spill] sm:$0xff] %v3178_v61  ;;  %v3181_v62 = vld [vmem:[%s2998_s5 + $0x1c8] sm:$0xff]  ;;  %v3184_v63 = vld [vmem:[%s2998_s5 + $0x1d0] sm:$0xff]  ;;  %v3204_v61 = vpack.c.bf16 (!%p2100_p13), %v3025_v10, %v3013_v6  ;;  %v3224_v10 = vpack.c.bf16 (!%p2100_p13), %v3055_v20, %v3043_v16  ;;  %v3242_v20 = vpack.c.bf16 (!%p2100_p13), %v3073_v26, %v3061_v22 }
  0x53   : > { %3906 = vst [vmem:[#allocation52_spill] sm:$0xff] %v3181_v62  ;;  %3907 = vst [vmem:[#allocation53_spill] sm:$0xff] %v3184_v63  ;;  %v3187_v0 = vld [vmem:[%s2998_s5 + $0x1d8] sm:$0xff]  ;;  %v3190_v1 = vld [vmem:[%s2998_s5 + $0x1e0] sm:$0xff]  ;;  %v3208_v63 = vpack.c.bf16 (!%p2100_p13), %v3031_v12, %v3019_v8  ;;  %v3246_v16 = vpack.c.bf16 (!%p2100_p13), %v3079_v28, %v3067_v24  ;;  %v3258_v26 = vpack.c.bf16 (!%p2100_p13), %v3076_v27, %v3064_v23 }
  0x54   : > { %3908 = vst [vmem:[#allocation54_spill] sm:$0xff] %v3187_v0  ;;  %3909 = vst [vmem:[#allocation55_spill] sm:$0xff] %v3190_v1  ;;  %v3193_v2 = vld [vmem:[%s2998_s5 + $0x1e8] sm:$0xff]  ;;  %v3196_v3 = vld [vmem:[%s2998_s5 + $0x1f0] sm:$0xff]  ;;  %v3212_v1 = vpack.c.bf16 (!%p2100_p13), %v3022_v9, %v3010_v5  ;;  %2143 = vmatprep.subr.bf16.mxu0 (!%p2100_p13), %v3204_v61  ;;  %v3264_v28 = vpack.c.bf16 (!%p2100_p13), %v3097_v34, %v3085_v30  ;;  %v3274_v27 = vpack.c.bf16 (!%p2100_p13), %v3094_v33, %v3082_v29 }
  0x55   : > { %3910 = vst [vmem:[#allocation56_spill] sm:$0xff] %v3193_v2  ;;  %3911 = vst [vmem:[#allocation57_spill] sm:$0xff] %v3196_v3  ;;  %v3199_v4 = vld [vmem:[%s2998_s5 + $0x1f8] sm:$0xff]  ;;  %v3216_v3 = vpack.c.bf16 (!%p2100_p13), %v3028_v11, %v3016_v7  ;;  %2175 = vmatprep.subr.bf16.mxu1 (!%p2100_p13), %v3208_v63  ;;  %v3232_v11 = vpack.c.bf16 (!%p2100_p13), %v3046_v17, %v3034_v13  ;;  %v3278_v23 = vpack.c.bf16 (!%p2100_p13), %v3100_v35, %v3088_v31  ;;  %v353_v33 = vld [vmem:[%s3006_s23] sm:$0xff] (!%p2100_p13) }
  0x56   : > { %3912 = vst [vmem:[#allocation58_spill] sm:$0xff] %v3199_v4  ;;  %v3220_v4 = vpack.c.bf16 (!%p2100_p13), %v3049_v18, %v3037_v14  ;;  %2145 = vmatpush1.bf16.msra.mxu0 (!%p2100_p13), %v3212_v1  ;;  %v3236_v18 = vpack.c.bf16 (!%p2100_p13), %v3052_v19, %v3040_v15  ;;  %v3816_v14 = vmov (!%p2100_p13), 0.0   ;;  %v3254_v19 = vpack.c.bf16 (!%p2100_p13), %v3070_v25, %v3058_v21 }
  0x57   : > { %2177 = vmatpush1.bf16.msra.mxu1 %v3216_v3  ;;  %418 = vmatprep.mubr.f32.mxu0 %v3816_v14  ;;  %v3294_v35 = vpack.c.bf16 %v3118_v41, %v3106_v37  ;;  %v3298_v31 = vpack.c.bf16 %v3124_v43, %v3112_v39  ;;  %v3314_v43 = vpack.c.bf16 %v3142_v49, %v3130_v45 }
  0x58   : > { %2147 = vmatprep.subr.bf16.mxu0 %v3220_v4  ;;  %2179 = vmatprep.subr.bf16.mxu1 %v3224_v10  ;;  %v3318_v39 = vpack.c.bf16 %v3148_v51, %v3136_v47  ;;  %v3334_v51 = vpack.c.bf16 %v3166_v57, %v3154_v53  ;;  %v3338_v47 = vpack.c.bf16 %v3172_v59, %v3160_v55 }
  0x59   : > { %489 = vmatprep.mubr.f32.mxu1 %v3816_v14  ;;  %v3268_v14 = vpack.c.bf16 %v3103_v36, %v3091_v32  ;;  %v3284_v36 = vpack.c.bf16 %v3121_v42, %v3109_v38  ;;  %v3288_v32 = vpack.c.bf16 %v3127_v44, %v3115_v40  ;;  %v3304_v44 = vpack.c.bf16 %v3145_v50, %v3133_v46  ;;  %v3914_v57 = vld [vmem:[#allocation51_spill] sm:$0xff] }
  0x5a   : > { %2149 = vmatpush1.bf16.msra.mxu0 %v3232_v11  ;;  %v3308_v40 = vpack.c.bf16 %v3151_v52, %v3139_v48  ;;  %v3324_v52 = vpack.c.bf16 %v3169_v58, %v3157_v54  ;;  %v3328_v48 = vpack.c.bf16 %v3175_v60, %v3163_v56  ;;  %v3344_v60 = vpack.c.bf16 %v3193_v2, %v3181_v62  ;;  %v3916_v55 = vld [vmem:[#allocation53_spill] sm:$0xff] }
  0x5b   : > { %2181 = vmatpush1.bf16.msra.mxu1 %v3236_v18  ;;  %2151 = vmatprep.subr.bf16.mxu0 %v3242_v20  ;;  %v3915_v53 = vld [vmem:[#allocation55_spill] sm:$0xff] }
  0x5c   : > { %2183 = vmatprep.subr.bf16.mxu1 %v3246_v16  ;;  %v3354_v59 = vpack.c.bf16 %v3915_v53, %v3914_v57  ;;  %v3917_v54 = vld [vmem:[#allocation57_spill] sm:$0xff]  ;;  %v3918_v53 = vmov 0.0   ;;  %v505_v57 = vlaneseq }
  0x5d   : > { %v3913_v56 = vld [vmem:[#allocation58_spill] sm:$0xff]  ;;  %v3358_v49 = vpack.c.bf16 %v3917_v54, %v3916_v55  ;;  %v2901_v54 = vmov 1983009808  }
  0x5e   : > { %2153 = vmatpush1.bf16.msra.mxu0 %v3254_v19  ;;  %v3348_v58 = vpack.c.bf16 %v3913_v56, %v3187_v0  ;;  %v351_v56 = vld [vmem:[#allocation2] sm:$0x3]  ;;  %v503_v55 = vunpack.c.l.s4 %v2901_v54  ;;  %v506_v0 = vshrl.u32 %v505_v57, 7 }
  0x5f   : > { %2185 = vmatpush1.bf16.msra.mxu1 %v3258_v26  ;;  %2155 = vmatprep.subr.bf16.mxu0 %v3264_v28 }
  0x60   : > { %2187 = vmatprep.subr.bf16.mxu1 %v3268_v14 }
  0x62   : > { %2157 = vmatpush1.bf16.msra.mxu0 %v3274_v27 }
  0x63   : > { %2189 = vmatpush1.bf16.msra.mxu1 %v3278_v23  ;;  %2159 = vmatprep.subr.bf16.mxu0 %v3284_v36 }
  0x64   : > { %2191 = vmatprep.subr.bf16.mxu1 %v3288_v32 }
  0x66   : > { %2161 = vmatpush1.bf16.msra.mxu0 %v3294_v35 }
  0x67   : > { %2193 = vmatpush1.bf16.msra.mxu1 %v3298_v31  ;;  %2163 = vmatprep.subr.bf16.mxu0 %v3304_v44 }
  0x68   : > { %2195 = vmatprep.subr.bf16.mxu1 %v3308_v40 }
  0x6a   : > { %2165 = vmatpush1.bf16.msra.mxu0 %v3314_v43 }
  0x6b   : > { %2197 = vmatpush1.bf16.msra.mxu1 %v3318_v39  ;;  %2167 = vmatprep.subr.bf16.mxu0 %v3324_v52 }
  0x6c   : > { %2199 = vmatprep.subr.bf16.mxu1 %v3328_v48 }
  0x6e   : > { %2169 = vmatpush1.bf16.msra.mxu0 %v3334_v51 }
  0x6f   : > { %2201 = vmatpush1.bf16.msra.mxu1 %v3338_v47  ;;  %2171 = vmatprep.subr.bf16.mxu0 %v3344_v60 }
  0x70   : > { %2203 = vmatprep.subr.bf16.mxu1 %v3348_v58 }
  0x72   : > { %2173 = vmatpush1.bf16.msra.mxu0 %v3354_v59 }
  0x73   : > { %2205 = vmatpush1.bf16.msra.mxu1 %v3358_v49  ;;  %2207 = vmatprep.subr.bf16.mxu0 %v3204_v61 }
  0x74   : > { %2239 = vmatprep.subr.bf16.mxu1 %v3208_v63 }
  0x75   : > { %419 = vmatmul.mubr.f32.vlgmr.msra.gmra.mrb[0].mxu0 %v351_v56 }
  0x76   : > { %490 = vmatmul.mubr.f32.vlgmr.msra.gmra.mrb[0].mxu1 %v351_v56  ;;  %2209 = vmatpush1.bf16.msra.mxu0 %v3212_v1  ;;  %v504_v56 = vunpack.c.0.s8 %v503_v55 }
  0x77   : > { %2241 = vmatpush1.bf16.msra.mxu1 %v3216_v3  ;;  %2211 = vmatprep.subr.bf16.mxu0 %v3220_v4 }
  0x78   : > { %2243 = vmatprep.subr.bf16.mxu1 %v3224_v10  ;;  %617 = vmatprep.mubr.f32.mxu0 %v3918_v53  ;;  %v3400_v45 = vsub.s32 %v504_v56, %v506_v0 }
  0x79   : > { %688 = vmatprep.mubr.f32.mxu1 %v3918_v53 }
  0x7a   : > { %2213 = vmatpush1.bf16.msra.mxu0 %v3232_v11 }
  0x7b   : > { %2245 = vmatpush1.bf16.msra.mxu1 %v3236_v18  ;;  %2215 = vmatprep.subr.bf16.mxu0 %v3242_v20 }
  0x7c   : > { %2247 = vmatprep.subr.bf16.mxu1 %v3246_v16 }
  0x7e   : > { %2217 = vmatpush1.bf16.msra.mxu0 %v3254_v19 }
  0x7f   : > { %2249 = vmatpush1.bf16.msra.mxu1 %v3258_v26  ;;  %2219 = vmatprep.subr.bf16.mxu0 %v3264_v28 }
  0x80   : > { %2251 = vmatprep.subr.bf16.mxu1 %v3268_v14 }
  0x82   : > { %2221 = vmatpush1.bf16.msra.mxu0 %v3274_v27 }
  0x83   : > { %2253 = vmatpush1.bf16.msra.mxu1 %v3278_v23  ;;  %2223 = vmatprep.subr.bf16.mxu0 %v3284_v36 }
  0x84   : > { %2255 = vmatprep.subr.bf16.mxu1 %v3288_v32 }
  0x86   : > { %2225 = vmatpush1.bf16.msra.mxu0 %v3294_v35 }
  0x87   : > { %2257 = vmatpush1.bf16.msra.mxu1 %v3298_v31  ;;  %2227 = vmatprep.subr.bf16.mxu0 %v3304_v44 }
  0x88   : > { %2259 = vmatprep.subr.bf16.mxu1 %v3308_v40 }
  0x8a   : > { %2229 = vmatpush1.bf16.msra.mxu0 %v3314_v43 }
  0x8b   : > { %2261 = vmatpush1.bf16.msra.mxu1 %v3318_v39  ;;  %2231 = vmatprep.subr.bf16.mxu0 %v3324_v52 }
  0x8c   : > { %2263 = vmatprep.subr.bf16.mxu1 %v3328_v48 }
  0x8e   : > { %2233 = vmatpush1.bf16.msra.mxu0 %v3334_v51 }
  0x8f   : > { %2265 = vmatpush1.bf16.msra.mxu1 %v3338_v47  ;;  %2235 = vmatprep.subr.bf16.mxu0 %v3344_v60 }
  0x90   : > { %2267 = vmatprep.subr.bf16.mxu1 %v3348_v58 }
  0x92   : > { %2237 = vmatpush1.bf16.msra.mxu0 %v3354_v59 }
  0x93   : > { %2269 = vmatpush1.bf16.msra.mxu1 %v3358_v49  ;;  %2271 = vmatprep.subr.bf16.mxu0 %v3204_v61 }
  0x94   : > { %2303 = vmatprep.subr.bf16.mxu1 %v3208_v63 }
 0x148   : > { %v420_v2 = vpop.f32.mrb[0].mxu0 }
 0x149   : > { %v491_v62 = vpop.f32.mrb[0].mxu1  ;;  %v422_v50 = vpop.f32.mrb[1].mxu0 }
 0x14a   : > { %v493_v46 = vpop.f32.mrb[1].mxu1  ;;  %v500_v41 = vcombine.low %v420_v2, %v422_v50 }
 0x14b   : > { %v501_v37 = vcombine.low %v491_v62, %v493_v46 }
 0x14c   : > { %v508_v42 = vrot.slane %v500_v41, %v3400_v45 }
 0x14d   : > { %v515_v38 = vrot.slane %v501_v37, %v3400_v45 }
 0x14f   : > { %v516_v29 = vcombine.low %v508_v42, %v515_v38 }
 0x151   : > { %v518_v34 = vadd.f32 %v516_v29, %v353_v33  ;;  %v352_v29 = vld [vmem:[#allocation3] sm:$0x3] }
 0x153   : > { %v2101_v30 = vmul.f32 -1.442695, %v518_v34  ;;  %v526_v54 = vrot.slane %v518_v34, 2  ;;  %v537_v57 = vrot.slane %v518_v34, 6  ;;  %v534_v56 = vrot.slane %v518_v34, 4 }
 0x155   : > { %2715 = vpow2.f32 %v2101_v30  ;;  %v2102_v55 = vmul.f32 -1.442695, %v526_v54  ;;  %v2103_v25 = vmul.f32 -1.442695, %v537_v57 }
 0x157   : > { %2717 = vpow2.f32 %v2102_v55 }
 0x158   : > { %2719 = vpow2.f32 %v2103_v25 }
 0x15f   : > { %v2716_v0 = vpop.eup %2715 }
 0x160   : > { %v522_v21 = vadd.f32 1.0, %v2716_v0 }
 0x161   : > { %v2718_v24 = vpop.eup %2717 }
 0x162   : > { %2721 = vrcp.f32 %v522_v21  ;;  %v531_v46 = vadd.f32 1.0, %v2718_v24  ;;  %v2720_v37 = vpop.eup %2719 }
 0x163   : > { %2723 = vtanh.f32 %v534_v56  ;;  %v542_v30 = vadd.f32 1.0, %v2720_v37  ;;  %v2104_v37 = vld [vmem:[%s3006_s23 + $0x8] sm:$0xff] }
 0x164   : > { %2725 = vrcp.f32 %v531_v46 }
 0x165   : > { %2727 = vrcp.f32 %v542_v30 }
 0x16c   : > { %v2722_v38 = vpop.eup %2721 }
 0x16d   : > { %v2724_v33 = vpop.eup %2723 }
 0x16e   : > { %v2726_v41 = vpop.eup %2725  ;;  %v546_v50 = vmul.f32 %v2724_v33, %v2722_v38 }
 0x16f   : > { %v545_v42 = vmul.f32 %v2726_v41, %v352_v29  ;;  %v2728_v34 = vpop.eup %2727 }
 0x171   : > { %v3405_v62 = vadd.f32 %v546_v50, %v545_v42 }
 0x173   : > { %2729 = vtanh.f32 %v3405_v62 }
 0x17d   : > { %v2730_v25 = vpop.eup %2729 }
 0x17e   : > { %v549_v21 = vmul.f32 %v2730_v25, %v2728_v34 }
 0x180   : > { %550 = vst [vmem:[%s3004_s22] sm:$0x3] %v549_v21  ;;  %618 = vmatmul.mubr.f32.vlgmr.msra.gmra.mrb[2].mxu0 %v549_v21  ;;  %689 = vmatmul.mubr.f32.vlgmr.msra.gmra.mrb[2].mxu1 %v549_v21 }
 0x181   : > { %2273 = vmatpush1.bf16.msra.mxu0 %v3212_v1  ;;  %2305 = vmatpush1.bf16.msra.mxu1 %v3216_v3 }
 0x182   : > { %2275 = vmatprep.subr.bf16.mxu0 %v3220_v4  ;;  %2307 = vmatprep.subr.bf16.mxu1 %v3224_v10 }
 0x183   : > { %817 = vmatprep.mubr.f32.mxu0 %v3918_v53  ;;  %888 = vmatprep.mubr.f32.mxu1 %v3918_v53 }
 0x185   : > { %2277 = vmatpush1.bf16.msra.mxu0 %v3232_v11  ;;  %2309 = vmatpush1.bf16.msra.mxu1 %v3236_v18 }
 0x186   : > { %2279 = vmatprep.subr.bf16.mxu0 %v3242_v20  ;;  %2311 = vmatprep.subr.bf16.mxu1 %v3246_v16 }
 0x189   : > { %2281 = vmatpush1.bf16.msra.mxu0 %v3254_v19  ;;  %2313 = vmatpush1.bf16.msra.mxu1 %v3258_v26 }
 0x18a   : > { %2283 = vmatprep.subr.bf16.mxu0 %v3264_v28  ;;  %2315 = vmatprep.subr.bf16.mxu1 %v3268_v14 }
 0x18d   : > { %2285 = vmatpush1.bf16.msra.mxu0 %v3274_v27  ;;  %2317 = vmatpush1.bf16.msra.mxu1 %v3278_v23 }
 0x18e   : > { %2287 = vmatprep.subr.bf16.mxu0 %v3284_v36  ;;  %2319 = vmatprep.subr.bf16.mxu1 %v3288_v32 }
 0x191   : > { %2289 = vmatpush1.bf16.msra.mxu0 %v3294_v35  ;;  %2321 = vmatpush1.bf16.msra.mxu1 %v3298_v31 }
 0x192   : > { %2291 = vmatprep.subr.bf16.mxu0 %v3304_v44  ;;  %2323 = vmatprep.subr.bf16.mxu1 %v3308_v40 }
 0x195   : > { %2293 = vmatpush1.bf16.msra.mxu0 %v3314_v43  ;;  %2325 = vmatpush1.bf16.msra.mxu1 %v3318_v39 }
 0x196   : > { %2295 = vmatprep.subr.bf16.mxu0 %v3324_v52  ;;  %2327 = vmatprep.subr.bf16.mxu1 %v3328_v48 }
 0x199   : > { %2297 = vmatpush1.bf16.msra.mxu0 %v3334_v51  ;;  %2329 = vmatpush1.bf16.msra.mxu1 %v3338_v47 }
 0x19a   : > { %2299 = vmatprep.subr.bf16.mxu0 %v3344_v60  ;;  %2331 = vmatprep.subr.bf16.mxu1 %v3348_v58 }
 0x19d   : > { %2301 = vmatpush1.bf16.msra.mxu0 %v3354_v59  ;;  %2333 = vmatpush1.bf16.msra.mxu1 %v3358_v49 }
 0x19e   : > { %2335 = vmatprep.subr.bf16.mxu0 %v3204_v61  ;;  %2367 = vmatprep.subr.bf16.mxu1 %v3208_v63 }
 0x253   : > { %v619_v24 = vpop.f32.mrb[2].mxu0  ;;  %v690_v2 = vpop.f32.mrb[2].mxu1 }
 0x254   : > { %v621_v54 = vpop.f32.mrb[3].mxu0  ;;  %v692_v55 = vpop.f32.mrb[3].mxu1 }
 0x255   : > { %v699_v57 = vcombine.low %v619_v24, %v621_v54  ;;  %v700_v0 = vcombine.low %v690_v2, %v692_v55 }
 0x257   : > { %v707_v56 = vrot.slane %v699_v57, %v3400_v45  ;;  %v714_v46 = vrot.slane %v700_v0, %v3400_v45 }
 0x259   : > { %v715_v38 = vcombine.low %v707_v56, %v714_v46 }
 0x25b   : > { %v717_v29 = vadd.f32 %v2104_v37, %v715_v38 }
 0x25d   : > { %v2105_v33 = vmul.f32 -1.442695, %v717_v29  ;;  %v725_v41 = vrot.slane %v717_v29, 2  ;;  %v736_v61 = vrot.slane %v717_v29, 6  ;;  %v733_v50 = vrot.slane %v717_v29, 4 }
 0x25f   : > { %2731 = vpow2.f32 %v2105_v33  ;;  %v2106_v30 = vmul.f32 -1.442695, %v725_v41  ;;  %v2107_v63 = vmul.f32 -1.442695, %v736_v61 }
 0x261   : > { %2733 = vpow2.f32 %v2106_v30 }
 0x262   : > { %2735 = vpow2.f32 %v2107_v63 }
 0x269   : > { %v2732_v42 = vpop.eup %2731 }
 0x26a   : > { %v721_v34 = vadd.f32 1.0, %v2732_v42 }
 0x26b   : > { %v2734_v25 = vpop.eup %2733 }
 0x26c   : > { %2737 = vrcp.f32 %v721_v34  ;;  %v730_v21 = vadd.f32 1.0, %v2734_v25  ;;  %v2736_v24 = vpop.eup %2735  ;;  %v2114_v25 = vld [vmem:[%s3006_s23 + $0x18] sm:$0xff] }
 0x26d   : > { %2739 = vtanh.f32 %v733_v50  ;;  %v741_v57 = vadd.f32 1.0, %v2736_v24 }
 0x26e   : > { %2741 = vrcp.f32 %v730_v21 }
 0x26f   : > { %2743 = vrcp.f32 %v741_v57 }
 0x276   : > { %v2738_v2 = vpop.eup %2737 }
 0x277   : > { %v2740_v54 = vpop.eup %2739 }
 0x278   : > { %v2742_v55 = vpop.eup %2741  ;;  %v745_v56 = vmul.f32 %v2740_v54, %v2738_v2 }
 0x279   : > { %v744_v0 = vmul.f32 %v2742_v55, %v3405_v62  ;;  %v2744_v37 = vpop.eup %2743 }
 0x27b   : > { %v3447_v46 = vadd.f32 %v745_v56, %v744_v0 }
 0x27d   : > { %2745 = vtanh.f32 %v3447_v46 }
 0x287   : > { %v2746_v38 = vpop.eup %2745 }
 0x288   : > { %v748_v29 = vmul.f32 %v2746_v38, %v2744_v37 }
 0x28a   : > { %2108 = vst [vmem:[%s3004_s22 + $0x2] sm:$0x3] %v748_v29  ;;  %818 = vmatmul.mubr.f32.vlgmr.msra.gmra.mrb[4].mxu0 %v748_v29  ;;  %889 = vmatmul.mubr.f32.vlgmr.msra.gmra.mrb[4].mxu1 %v748_v29 }
 0x28b   : > { %2337 = vmatpush1.bf16.msra.mxu0 %v3212_v1  ;;  %2369 = vmatpush1.bf16.msra.mxu1 %v3216_v3 }
 0x28c   : > { %2339 = vmatprep.subr.bf16.mxu0 %v3220_v4  ;;  %2371 = vmatprep.subr.bf16.mxu1 %v3224_v10 }
 0x28d   : > { %1017 = vmatprep.mubr.f32.mxu0 %v3918_v53  ;;  %1088 = vmatprep.mubr.f32.mxu1 %v3918_v53 }
 0x28f   : > { %2341 = vmatpush1.bf16.msra.mxu0 %v3232_v11  ;;  %2373 = vmatpush1.bf16.msra.mxu1 %v3236_v18 }
 0x290   : > { %2343 = vmatprep.subr.bf16.mxu0 %v3242_v20  ;;  %2375 = vmatprep.subr.bf16.mxu1 %v3246_v16 }
 0x293   : > { %2345 = vmatpush1.bf16.msra.mxu0 %v3254_v19  ;;  %2377 = vmatpush1.bf16.msra.mxu1 %v3258_v26  ;;  %v2109_v26 = vld [vmem:[%s3006_s23 + $0x10] sm:$0xff] }
 0x294   : > { %2347 = vmatprep.subr.bf16.mxu0 %v3264_v28  ;;  %2379 = vmatprep.subr.bf16.mxu1 %v3268_v14 }
 0x297   : > { %2349 = vmatpush1.bf16.msra.mxu0 %v3274_v27  ;;  %2381 = vmatpush1.bf16.msra.mxu1 %v3278_v23 }
 0x298   : > { %2351 = vmatprep.subr.bf16.mxu0 %v3284_v36  ;;  %2383 = vmatprep.subr.bf16.mxu1 %v3288_v32 }
 0x29b   : > { %2353 = vmatpush1.bf16.msra.mxu0 %v3294_v35  ;;  %2385 = vmatpush1.bf16.msra.mxu1 %v3298_v31 }
 0x29c   : > { %2355 = vmatprep.subr.bf16.mxu0 %v3304_v44  ;;  %2387 = vmatprep.subr.bf16.mxu1 %v3308_v40 }
 0x29f   : > { %2357 = vmatpush1.bf16.msra.mxu0 %v3314_v43  ;;  %2389 = vmatpush1.bf16.msra.mxu1 %v3318_v39 }
 0x2a0   : > { %2359 = vmatprep.subr.bf16.mxu0 %v3324_v52  ;;  %2391 = vmatprep.subr.bf16.mxu1 %v3328_v48 }
 0x2a3   : > { %2361 = vmatpush1.bf16.msra.mxu0 %v3334_v51  ;;  %2393 = vmatpush1.bf16.msra.mxu1 %v3338_v47 }
 0x2a4   : > { %2363 = vmatprep.subr.bf16.mxu0 %v3344_v60  ;;  %2395 = vmatprep.subr.bf16.mxu1 %v3348_v58 }
 0x2a7   : > { %2365 = vmatpush1.bf16.msra.mxu0 %v3354_v59  ;;  %2397 = vmatpush1.bf16.msra.mxu1 %v3358_v49 }
 0x35d   : > { %v819_v10 = vpop.f32.mrb[4].mxu0  ;;  %v890_v11 = vpop.f32.mrb[4].mxu1 }
 0x35e   : > { %v821_v14 = vpop.f32.mrb[5].mxu0  ;;  %v892_v16 = vpop.f32.mrb[5].mxu1 }
 0x35f   : > { %v899_v18 = vcombine.low %v819_v10, %v821_v14  ;;  %v900_v19 = vcombine.low %v890_v11, %v892_v16 }
 0x361   : > { %v907_v20 = vrot.slane %v899_v18, %v3400_v45  ;;  %v914_v23 = vrot.slane %v900_v19, %v3400_v45 }
 0x363   : > { %v915_v27 = vcombine.low %v907_v20, %v914_v23 }
 0x365   : > { %v917_v28 = vadd.f32 %v2109_v26, %v915_v27 }
 0x367   : > { %v2110_v31 = vmul.f32 -1.442695, %v917_v28  ;;  %v925_v32 = vrot.slane %v917_v28, 2  ;;  %v936_v36 = vrot.slane %v917_v28, 6  ;;  %v933_v43 = vrot.slane %v917_v28, 4 }
 0x369   : > { %2747 = vpow2.f32 %v2110_v31  ;;  %v2111_v35 = vmul.f32 -1.442695, %v925_v32  ;;  %v2112_v39 = vmul.f32 -1.442695, %v936_v36 }
 0x36b   : > { %2749 = vpow2.f32 %v2111_v35 }
 0x36c   : > { %2751 = vpow2.f32 %v2112_v39 }
 0x373   : > { %v2748_v40 = vpop.eup %2747 }
 0x374   : > { %v921_v44 = vadd.f32 1.0, %v2748_v40 }
 0x375   : > { %v2750_v47 = vpop.eup %2749 }
 0x376   : > { %2753 = vrcp.f32 %v921_v44  ;;  %v930_v48 = vadd.f32 1.0, %v2750_v47  ;;  %v2752_v49 = vpop.eup %2751 }
 0x377   : > { %2755 = vtanh.f32 %v933_v43  ;;  %v941_v59 = vadd.f32 1.0, %v2752_v49 }
 0x378   : > { %2757 = vrcp.f32 %v930_v48 }
 0x379   : > { %2759 = vrcp.f32 %v941_v59 }
 0x380   : > { %v2754_v51 = vpop.eup %2753 }
 0x381   : > { %v2756_v52 = vpop.eup %2755 }
 0x382   : > { %v2758_v58 = vpop.eup %2757  ;;  %v945_v1 = vmul.f32 %v2756_v52, %v2754_v51 }
 0x383   : > { %v944_v60 = vmul.f32 %v2758_v58, %v3447_v46  ;;  %v2760_v4 = vpop.eup %2759 }
 0x385   : > { %v946_v3 = vadd.f32 %v945_v1, %v944_v60 }
 0x387   : > { %2761 = vtanh.f32 %v946_v3 }
 0x391   : > { %v2762_v53 = vpop.eup %2761 }
 0x392   : > { %v948_v62 = vmul.f32 %v2762_v53, %v2760_v4 }
 0x394   : > { %2113 = vst [vmem:[%s3004_s22 + $0x4] sm:$0x3] %v948_v62  ;;  %1018 = vmatmul.mubr.f32.vlgmr.msra.gmra.mrb[6].mxu0 %v948_v62  ;;  %1089 = vmatmul.mubr.f32.vlgmr.msra.gmra.mrb[6].mxu1 %v948_v62 }
 0x467   : > { %v1019_v33 = vpop.f32.mrb[6].mxu0  ;;  %v1090_v41 = vpop.f32.mrb[6].mxu1 }
 0x468   : > { %v1021_v30 = vpop.f32.mrb[7].mxu0  ;;  %v1092_v61 = vpop.f32.mrb[7].mxu1 }
 0x469   : > { %v1099_v63 = vcombine.low %v1019_v33, %v1021_v30  ;;  %v1100_v42 = vcombine.low %v1090_v41, %v1092_v61 }
 0x46b   : > { %v1107_v50 = vrot.slane %v1099_v63, %v3400_v45  ;;  %v1114_v34 = vrot.slane %v1100_v42, %v3400_v45 }
 0x46d   : > { %v1115_v21 = vcombine.low %v1107_v50, %v1114_v34 }
 0x46f   : > { %v1117_v24 = vadd.f32 %v2114_v25, %v1115_v21 }
 0x471   : > { %v2115_v2 = vmul.f32 -1.442695, %v1117_v24  ;;  %v1125_v54 = vrot.slane %v1117_v24, 2  ;;  %v1136_v57 = vrot.slane %v1117_v24, 6  ;;  %v1133_v46 = vrot.slane %v1117_v24, 4 }
 0x473   : > { %2763 = vpow2.f32 %v2115_v2  ;;  %v2116_v55 = vmul.f32 -1.442695, %v1125_v54  ;;  %v2117_v0 = vmul.f32 -1.442695, %v1136_v57 }
 0x475   : > { %2765 = vpow2.f32 %v2116_v55 }
 0x476   : > { %2767 = vpow2.f32 %v2117_v0 }
 0x47d   : > { %v2764_v56 = vpop.eup %2763 }
 0x47e   : > { %v1121_v37 = vadd.f32 1.0, %v2764_v56 }
 0x47f   : > { %v2766_v38 = vpop.eup %2765 }
 0x480   : > { %2769 = vrcp.f32 %v1121_v37  ;;  %v1130_v29 = vadd.f32 1.0, %v2766_v38  ;;  %v2768_v45 = vpop.eup %2767 }
 0x481   : > { %2771 = vtanh.f32 %v1133_v46  ;;  %v1141_v16 = vadd.f32 1.0, %v2768_v45 }
 0x482   : > { %2773 = vrcp.f32 %v1130_v29 }
 0x483   : > { %2775 = vrcp.f32 %v1141_v16 }
 0x48a   : > { %v2770_v10 = vpop.eup %2769 }
 0x48b   : > { %v2772_v11 = vpop.eup %2771 }
 0x48c   : > { %v2774_v14 = vpop.eup %2773  ;;  %v1145_v19 = vmul.f32 %v2772_v11, %v2770_v10 }
 0x48d   : > { %v1144_v18 = vmul.f32 %v2774_v14, %v946_v3  ;;  %v2776_v23 = vpop.eup %2775 }
 0x48f   : > { %v1146_v20 = vadd.f32 %v1145_v19, %v1144_v18 }
 0x491   : > { %2777 = vtanh.f32 %v1146_v20  ;;  %1152 = vst [vmem:[#allocation3] sm:$0x3] %v1146_v20 }
 0x49b   : > { %v2778_v26 = vpop.eup %2777 }
 0x49c   : > { %v1148_v27 = vmul.f32 %v2778_v26, %v2776_v23 }
 0x49e   : > { %2118 = vst [vmem:[%s3004_s22 + $0x6] sm:$0x3] %v1148_v27  ;;  %1151 = vst [vmem:[#allocation2] sm:$0x3] %v1148_v27 }
 0x49f PF: > { %p2119_p0 = scmp.ne.s32.totalorder %s2885_s12, 1 }
 0x4a0   : > { %v3919_v28 = vld [vmem:[#allocation5_spill] sm:$0xff] (!%p2119_p0)  ;;  %v3499_v32 = vpack.c.bf16 (!%p2119_p0), %v3031_v12, %v3019_v8  ;;  %v3503_v35 = vpack.c.bf16 (!%p2119_p0), %v3022_v9, %v3010_v5  ;;  %v3920_v36 = vld [vmem:[#allocation6_spill] sm:$0xff] (!%p2119_p0)  ;;  %v3921_v40 = vld [vmem:[#allocation7_spill] sm:$0xff] (!%p2119_p0)  ;;  %v3523_v5 = vpack.c.bf16 (!%p2119_p0), %v3046_v17, %v3034_v13  ;;  %v2902_v58 = vmov (!%p2119_p0), 0.0  }
 0x4a1   : > { %1156 = sbr.rel (%p2119_p0) target bundleno = 2284 (0x8ec), region = 78  ;;  %v3495_v31 = vpack.c.bf16 (!%p2119_p0), %v3919_v28, %v3013_v6  ;;  %v3507_v39 = vpack.c.bf16 (!%p2119_p0), %v3920_v36, %v3016_v7  ;;  %v3922_v43 = vld [vmem:[#allocation9_spill] sm:$0xff] (!%p2119_p0)  ;;  %v3923_v47 = vld [vmem:[#allocation8_spill] sm:$0xff] (!%p2119_p0)  ;;  %v3924_v48 = vld [vmem:[#allocation11_spill] sm:$0xff] (!%p2119_p0)  ;;  %1225 = vmatprep.mubr.f32.mxu0 (!%p2119_p0), %v2902_v58  ;;  %1296 = vmatprep.mubr.f32.mxu1 (!%p2119_p0), %v2902_v58 }
 0x4a2   : > { %v3511_v44 = vpack.c.bf16 (!%p2119_p0), %v3922_v43, %v3921_v40  ;;  %v3515_v6 = vpack.c.bf16 (!%p2119_p0), %v3924_v48, %v3923_v47  ;;  %2431 = vmatprep.subr.bf16.mxu1 (!%p2119_p0), %v3499_v32  ;;  %v3925_v7 = vld [vmem:[#allocation10_spill] sm:$0xff] (!%p2119_p0)  ;;  %v3926_v9 = vld [vmem:[#allocation16_spill] sm:$0xff] (!%p2119_p0)  ;;  %v3931_v59 = vld [vmem:[#allocation13_spill] sm:$0xff] (!%p2119_p0) }
 0x4a3   : > { %2399 = vmatprep.subr.bf16.mxu0 (!%p2119_p0), %v3495_v31  ;;  %2433 = vmatpush1.bf16.msra.mxu1 (!%p2119_p0), %v3507_v39  ;;  %v3527_v8 = vpack.c.bf16 (!%p2119_p0), %v3925_v7, %v3040_v15  ;;  %v3533_v12 = vpack.c.bf16 (!%p2119_p0), %v3926_v9, %v3061_v22  ;;  %v3927_v49 = vld [vmem:[#allocation14_spill] sm:$0xff] (!%p2119_p0)  ;;  %v3929_v13 = vld [vmem:[#allocation12_spill] sm:$0xff] (!%p2119_p0)  ;;  %v3930_v15 = vld [vmem:[#allocation15_spill] sm:$0xff] (!%p2119_p0) }
 0x4a4   : > { %2401 = vmatpush1.bf16.msra.mxu0 (!%p2119_p0), %v3503_v35  ;;  %2435 = vmatprep.subr.bf16.mxu1 (!%p2119_p0), %v3515_v6  ;;  %v3928_v51 = vld [vmem:[#allocation18_spill] sm:$0xff] (!%p2119_p0)  ;;  %v3545_v17 = vpack.c.bf16 (!%p2119_p0), %v3930_v15, %v3929_v13  ;;  %v3932_v22 = vld [vmem:[#allocation17_spill] sm:$0xff] (!%p2119_p0)  ;;  %v3933_v1 = vld [vmem:[#allocation20_spill] sm:$0xff] (!%p2119_p0) }
 0x4a5   : > { %2403 = vmatprep.subr.bf16.mxu0 (!%p2119_p0), %v3511_v44  ;;  %v3537_v52 = vpack.c.bf16 (!%p2119_p0), %v3928_v51, %v3927_v49  ;;  %v3549_v60 = vpack.c.bf16 (!%p2119_p0), %v3932_v22, %v3931_v59  ;;  %v3934_v3 = vld [vmem:[#allocation24_spill] sm:$0xff] (!%p2119_p0)  ;;  %v3935_v53 = vld [vmem:[#allocation22_spill] sm:$0xff] (!%p2119_p0)  ;;  %v3937_v41 = vld [vmem:[#allocation19_spill] sm:$0xff] (!%p2119_p0) }
 0x4a6   : > { %v3555_v4 = vpack.c.bf16 (!%p2119_p0), %v3934_v3, %v3933_v1  ;;  %v3936_v62 = vld [vmem:[#allocation26_spill] sm:$0xff] (!%p2119_p0)  ;;  %v3938_v30 = vld [vmem:[#allocation23_spill] sm:$0xff] (!%p2119_p0)  ;;  %v3939_v63 = vld [vmem:[#allocation21_spill] sm:$0xff] (!%p2119_p0) }
 0x4a7   : > { %2437 = vmatpush1.bf16.msra.mxu1 (!%p2119_p0), %v3527_v8  ;;  %v3559_v33 = vpack.c.bf16 (!%p2119_p0), %v3936_v62, %v3935_v53  ;;  %v3565_v61 = vpack.c.bf16 (!%p2119_p0), %v3938_v30, %v3937_v41  ;;  %v3940_v42 = vld [vmem:[#allocation25_spill] sm:$0xff] (!%p2119_p0)  ;;  %v3941_v34 = vld [vmem:[#allocation28_spill] sm:$0xff] (!%p2119_p0)  ;;  %v3943_v24 = vld [vmem:[#allocation30_spill] sm:$0xff] (!%p2119_p0) }
 0x4a8   : > { %2405 = vmatpush1.bf16.msra.mxu0 %v3523_v5  ;;  %2439 = vmatprep.subr.bf16.mxu1 %v3537_v52  ;;  %v3569_v50 = vpack.c.bf16 %v3940_v42, %v3939_v63  ;;  %v3942_v25 = vld [vmem:[#allocation32_spill] sm:$0xff]  ;;  %v3944_v2 = vld [vmem:[#allocation34_spill] sm:$0xff]  ;;  %v3945_v55 = vld [vmem:[#allocation27_spill] sm:$0xff] }
 0x4a9   : > { %2407 = vmatprep.subr.bf16.mxu0 %v3533_v12  ;;  %v3575_v21 = vpack.c.bf16 %v3942_v25, %v3941_v34  ;;  %v3579_v54 = vpack.c.bf16 %v3944_v2, %v3943_v24  ;;  %v3946_v57 = vld [vmem:[#allocation31_spill] sm:$0xff]  ;;  %v3947_v56 = vld [vmem:[#allocation29_spill] sm:$0xff]  ;;  %v3949_v38 = vld [vmem:[#allocation36_spill] sm:$0xff]  ;;  %v2903_v24 = vmov 1983009808  }
 0x4aa   : > { %v3585_v0 = vpack.c.bf16 %v3946_v57, %v3945_v55  ;;  %v3948_v46 = vld [vmem:[#allocation33_spill] sm:$0xff]  ;;  %v3950_v29 = vld [vmem:[#allocation40_spill] sm:$0xff]  ;;  %v3951_v10 = vld [vmem:[#allocation38_spill] sm:$0xff]  ;;  %v1310_v2 = vunpack.c.l.s4 %v2903_v24  ;;  %v1312_v55 = vlaneseq }
 0x4ab   : > { %2441 = vmatpush1.bf16.msra.mxu1 %v3549_v60  ;;  %v3589_v37 = vpack.c.bf16 %v3948_v46, %v3947_v56  ;;  %v3595_v45 = vpack.c.bf16 %v3950_v29, %v3949_v38  ;;  %v3952_v11 = vld [vmem:[#allocation42_spill] sm:$0xff]  ;;  %v3953_v16 = vld [vmem:[#allocation35_spill] sm:$0xff]  ;;  %v3955_v20 = vld [vmem:[#allocation37_spill] sm:$0xff] }
 0x4ac   : > { %2409 = vmatpush1.bf16.msra.mxu0 %v3545_v17  ;;  %2443 = vmatprep.subr.bf16.mxu1 %v3559_v33  ;;  %v3599_v14 = vpack.c.bf16 %v3952_v11, %v3951_v10  ;;  %v3954_v18 = vld [vmem:[#allocation39_spill] sm:$0xff]  ;;  %v3956_v23 = vld [vmem:[#allocation41_spill] sm:$0xff]  ;;  %v3957_v27 = vld [vmem:[#allocation44_spill] sm:$0xff]  ;;  %v1311_v57 = vunpack.c.0.s8 %v1310_v2  ;;  %v1313_v56 = vshrl.u32 %v1312_v55, 7 }
 0x4ad   : > { %2411 = vmatprep.subr.bf16.mxu0 %v3555_v4  ;;  %v3605_v19 = vpack.c.bf16 %v3954_v18, %v3953_v16  ;;  %v3609_v26 = vpack.c.bf16 %v3956_v23, %v3955_v20  ;;  %v3958_v28 = vld [vmem:[#allocation48_spill] sm:$0xff]  ;;  %v3959_v40 = vld [vmem:[#allocation46_spill] sm:$0xff]  ;;  %v3961_v48 = vld [vmem:[#allocation43_spill] sm:$0xff] }
 0x4ae   : > { %v3615_v36 = vpack.c.bf16 %v3958_v28, %v3957_v27  ;;  %v3960_v43 = vld [vmem:[#allocation50_spill] sm:$0xff]  ;;  %v3962_v7 = vld [vmem:[#allocation47_spill] sm:$0xff]  ;;  %v3963_v49 = vld [vmem:[#allocation45_spill] sm:$0xff]  ;;  %v3691_v29 = vsub.s32 %v1311_v57, %v1313_v56 }
 0x4af   : > { %2445 = vmatpush1.bf16.msra.mxu1 %v3569_v50  ;;  %v3619_v47 = vpack.c.bf16 %v3960_v43, %v3959_v40  ;;  %v3625_v9 = vpack.c.bf16 %v3962_v7, %v3961_v48  ;;  %v3964_v51 = vld [vmem:[#allocation49_spill] sm:$0xff]  ;;  %v3965_v15 = vld [vmem:[#allocation52_spill] sm:$0xff]  ;;  %v3967_v1 = vld [vmem:[#allocation54_spill] sm:$0xff] }
 0x4b0   : > { %2413 = vmatpush1.bf16.msra.mxu0 %v3565_v61  ;;  %2447 = vmatprep.subr.bf16.mxu1 %v3579_v54  ;;  %v3629_v13 = vpack.c.bf16 %v3964_v51, %v3963_v49  ;;  %v3966_v59 = vld [vmem:[#allocation56_spill] sm:$0xff]  ;;  %v3968_v3 = vld [vmem:[#allocation58_spill] sm:$0xff]  ;;  %v3969_v62 = vld [vmem:[#allocation51_spill] sm:$0xff] }
 0x4b1   : > { %2415 = vmatprep.subr.bf16.mxu0 %v3575_v21  ;;  %v3635_v22 = vpack.c.bf16 %v3966_v59, %v3965_v15  ;;  %v3639_v53 = vpack.c.bf16 %v3968_v3, %v3967_v1  ;;  %v3970_v41 = vld [vmem:[#allocation55_spill] sm:$0xff]  ;;  %v3971_v63 = vld [vmem:[#allocation53_spill] sm:$0xff]  ;;  %v1157_v25 = vld [vmem:[#allocation2] sm:$0x3] }
 0x4b2   : > { %v3645_v30 = vpack.c.bf16 %v3970_v41, %v3969_v62  ;;  %v3972_v42 = vld [vmem:[#allocation57_spill] sm:$0xff]  ;;  %v2120_v27 = vld [vmem:[%s3006_s23 + $0x18] sm:$0xff] }
 0x4b3   : > { %2449 = vmatpush1.bf16.msra.mxu1 %v3589_v37  ;;  %v3649_v34 = vpack.c.bf16 %v3972_v42, %v3971_v63  ;;  %v1158_v42 = vld [vmem:[#allocation3] sm:$0x3] }
 0x4b4   : > { %2417 = vmatpush1.bf16.msra.mxu0 %v3585_v0  ;;  %2451 = vmatprep.subr.bf16.mxu1 %v3599_v14 }
 0x4b5   : > { %2419 = vmatprep.subr.bf16.mxu0 %v3595_v45 }
 0x4b7   : > { %2453 = vmatpush1.bf16.msra.mxu1 %v3609_v26 }
 0x4b8   : > { %2421 = vmatpush1.bf16.msra.mxu0 %v3605_v19  ;;  %2455 = vmatprep.subr.bf16.mxu1 %v3619_v47 }
 0x4b9   : > { %2423 = vmatprep.subr.bf16.mxu0 %v3615_v36 }
 0x4bb   : > { %2457 = vmatpush1.bf16.msra.mxu1 %v3629_v13 }
 0x4bc   : > { %2425 = vmatpush1.bf16.msra.mxu0 %v3625_v9  ;;  %2459 = vmatprep.subr.bf16.mxu1 %v3639_v53 }
 0x4bd   : > { %2427 = vmatprep.subr.bf16.mxu0 %v3635_v22 }
 0x4bf   : > { %2461 = vmatpush1.bf16.msra.mxu1 %v3649_v34 }
 0x4c0   : > { %2429 = vmatpush1.bf16.msra.mxu0 %v3645_v30  ;;  %2495 = vmatprep.subr.bf16.mxu1 %v3499_v32 }
 0x4c1   : > { %2463 = vmatprep.subr.bf16.mxu0 %v3495_v31 }
 0x4c2   : > { %1297 = vmatmul.mubr.f32.vlgmr.msra.gmra.mrb[0].mxu1 %v1157_v25 }
 0x4c3   : > { %1226 = vmatmul.mubr.f32.vlgmr.msra.gmra.mrb[0].mxu0 %v1157_v25  ;;  %2497 = vmatpush1.bf16.msra.mxu1 %v3507_v39 }
 0x4c4   : > { %2465 = vmatpush1.bf16.msra.mxu0 %v3503_v35  ;;  %2499 = vmatprep.subr.bf16.mxu1 %v3515_v6 }
 0x4c5   : > { %2467 = vmatprep.subr.bf16.mxu0 %v3511_v44  ;;  %1425 = vmatprep.mubr.f32.mxu0 %v2902_v58 }
 0x4c6   : > { %1496 = vmatprep.mubr.f32.mxu1 %v2902_v58 }
 0x4c7   : > { %2501 = vmatpush1.bf16.msra.mxu1 %v3527_v8 }
 0x4c8   : > { %2469 = vmatpush1.bf16.msra.mxu0 %v3523_v5  ;;  %2503 = vmatprep.subr.bf16.mxu1 %v3537_v52 }
 0x4c9   : > { %2471 = vmatprep.subr.bf16.mxu0 %v3533_v12 }
 0x4cb   : > { %2505 = vmatpush1.bf16.msra.mxu1 %v3549_v60 }
 0x4cc   : > { %2473 = vmatpush1.bf16.msra.mxu0 %v3545_v17  ;;  %2507 = vmatprep.subr.bf16.mxu1 %v3559_v33 }
 0x4cd   : > { %2475 = vmatprep.subr.bf16.mxu0 %v3555_v4 }
 0x4cf   : > { %2509 = vmatpush1.bf16.msra.mxu1 %v3569_v50 }
 0x4d0   : > { %2477 = vmatpush1.bf16.msra.mxu0 %v3565_v61  ;;  %2511 = vmatprep.subr.bf16.mxu1 %v3579_v54 }
 0x4d1   : > { %2479 = vmatprep.subr.bf16.mxu0 %v3575_v21 }
 0x4d3   : > { %2513 = vmatpush1.bf16.msra.mxu1 %v3589_v37 }
 0x4d4   : > { %2481 = vmatpush1.bf16.msra.mxu0 %v3585_v0  ;;  %2515 = vmatprep.subr.bf16.mxu1 %v3599_v14 }
 0x4d5   : > { %2483 = vmatprep.subr.bf16.mxu0 %v3595_v45 }
 0x4d7   : > { %2517 = vmatpush1.bf16.msra.mxu1 %v3609_v26 }
 0x4d8   : > { %2485 = vmatpush1.bf16.msra.mxu0 %v3605_v19  ;;  %2519 = vmatprep.subr.bf16.mxu1 %v3619_v47 }
 0x4d9   : > { %2487 = vmatprep.subr.bf16.mxu0 %v3615_v36 }
 0x4db   : > { %2521 = vmatpush1.bf16.msra.mxu1 %v3629_v13 }
 0x4dc   : > { %2489 = vmatpush1.bf16.msra.mxu0 %v3625_v9  ;;  %2523 = vmatprep.subr.bf16.mxu1 %v3639_v53 }
 0x4dd   : > { %2491 = vmatprep.subr.bf16.mxu0 %v3635_v22 }
 0x4df   : > { %2525 = vmatpush1.bf16.msra.mxu1 %v3649_v34 }
 0x4e0   : > { %2493 = vmatpush1.bf16.msra.mxu0 %v3645_v30  ;;  %2559 = vmatprep.subr.bf16.mxu1 %v3499_v32 }
 0x4e1   : > { %2527 = vmatprep.subr.bf16.mxu0 %v3495_v31 }
 0x595   : > { %v1298_v38 = vpop.f32.mrb[0].mxu1 }
 0x596   : > { %v1227_v46 = vpop.f32.mrb[0].mxu0  ;;  %v1300_v11 = vpop.f32.mrb[1].mxu1 }
 0x597   : > { %v1229_v10 = vpop.f32.mrb[1].mxu0  ;;  %v1308_v18 = vcombine.low %v1298_v38, %v1300_v11 }
 0x598   : > { %v1307_v16 = vcombine.low %v1227_v46, %v1229_v10 }
 0x599   : > { %v1322_v23 = vrot.slane %v1308_v18, %v3691_v29 }
 0x59a   : > { %v1315_v20 = vrot.slane %v1307_v16, %v3691_v29 }
 0x59c   : > { %v1323_v28 = vcombine.low %v1315_v20, %v1322_v23 }
 0x59e   : > { %v1325_v40 = vadd.f32 %v2120_v27, %v1323_v28 }
 0x5a0   : > { %v2121_v43 = vmul.f32 -1.442695, %v1325_v40  ;;  %v1333_v48 = vrot.slane %v1325_v40, 2  ;;  %v1344_v49 = vrot.slane %v1325_v40, 6  ;;  %v1341_v59 = vrot.slane %v1325_v40, 4 }
 0x5a2   : > { %2779 = vpow2.f32 %v2121_v43  ;;  %v2122_v7 = vmul.f32 -1.442695, %v1333_v48  ;;  %v2123_v51 = vmul.f32 -1.442695, %v1344_v49  ;;  %v2125_v43 = vld [vmem:[%s3006_s23 + $0x10] sm:$0xff] }
 0x5a4   : > { %2781 = vpow2.f32 %v2122_v7 }
 0x5a5   : > { %2783 = vpow2.f32 %v2123_v51 }
 0x5ac   : > { %v2780_v15 = vpop.eup %2779 }
 0x5ad   : > { %v1329_v1 = vadd.f32 1.0, %v2780_v15 }
 0x5ae   : > { %v2782_v3 = vpop.eup %2781 }
 0x5af   : > { %2785 = vrcp.f32 %v1329_v1  ;;  %v1338_v62 = vadd.f32 1.0, %v2782_v3  ;;  %v2784_v41 = vpop.eup %2783 }
 0x5b0   : > { %2787 = vtanh.f32 %v1341_v59  ;;  %v1349_v2 = vadd.f32 1.0, %v2784_v41 }
 0x5b1   : > { %2789 = vrcp.f32 %v1338_v62 }
 0x5b2   : > { %2791 = vrcp.f32 %v1349_v2 }
 0x5b9   : > { %v2786_v63 = vpop.eup %2785 }
 0x5ba   : > { %v2788_v25 = vpop.eup %2787 }
 0x5bb   : > { %v2790_v24 = vpop.eup %2789  ;;  %v1353_v57 = vmul.f32 %v2788_v25, %v2786_v63 }
 0x5bc   : > { %v1352_v55 = vmul.f32 %v2790_v24, %v1158_v42  ;;  %v2792_v46 = vpop.eup %2791 }
 0x5be   : > { %v3696_v56 = vadd.f32 %v1353_v57, %v1352_v55 }
 0x5c0   : > { %2793 = vtanh.f32 %v3696_v56 }
 0x5ca   : > { %v2794_v38 = vpop.eup %2793 }
 0x5cb   : > { %v1356_v10 = vmul.f32 %v2794_v38, %v2792_v46 }
 0x5cd   : > { %2124 = vst [vmem:[%s3004_s22 + $0x6] sm:$0x3] %v1356_v10  ;;  %1426 = vmatmul.mubr.f32.vlgmr.msra.gmra.mrb[2].mxu0 %v1356_v10  ;;  %1497 = vmatmul.mubr.f32.vlgmr.msra.gmra.mrb[2].mxu1 %v1356_v10 }
 0x5ce   : > { %2529 = vmatpush1.bf16.msra.mxu0 %v3503_v35  ;;  %2561 = vmatpush1.bf16.msra.mxu1 %v3507_v39 }
 0x5cf   : > { %2531 = vmatprep.subr.bf16.mxu0 %v3511_v44  ;;  %2563 = vmatprep.subr.bf16.mxu1 %v3515_v6 }
 0x5d0   : > { %1625 = vmatprep.mubr.f32.mxu0 %v2902_v58  ;;  %1696 = vmatprep.mubr.f32.mxu1 %v2902_v58 }
 0x5d2   : > { %2533 = vmatpush1.bf16.msra.mxu0 %v3523_v5  ;;  %2565 = vmatpush1.bf16.msra.mxu1 %v3527_v8 }
 0x5d3   : > { %2535 = vmatprep.subr.bf16.mxu0 %v3533_v12  ;;  %2567 = vmatprep.subr.bf16.mxu1 %v3537_v52 }
 0x5d6   : > { %2537 = vmatpush1.bf16.msra.mxu0 %v3545_v17  ;;  %2569 = vmatpush1.bf16.msra.mxu1 %v3549_v60 }
 0x5d7   : > { %2539 = vmatprep.subr.bf16.mxu0 %v3555_v4  ;;  %2571 = vmatprep.subr.bf16.mxu1 %v3559_v33 }
 0x5da   : > { %2541 = vmatpush1.bf16.msra.mxu0 %v3565_v61  ;;  %2573 = vmatpush1.bf16.msra.mxu1 %v3569_v50 }
 0x5db   : > { %2543 = vmatprep.subr.bf16.mxu0 %v3575_v21  ;;  %2575 = vmatprep.subr.bf16.mxu1 %v3579_v54 }
 0x5de   : > { %2545 = vmatpush1.bf16.msra.mxu0 %v3585_v0  ;;  %2577 = vmatpush1.bf16.msra.mxu1 %v3589_v37 }
 0x5df   : > { %2547 = vmatprep.subr.bf16.mxu0 %v3595_v45  ;;  %2579 = vmatprep.subr.bf16.mxu1 %v3599_v14 }
 0x5e2   : > { %2549 = vmatpush1.bf16.msra.mxu0 %v3605_v19  ;;  %2581 = vmatpush1.bf16.msra.mxu1 %v3609_v26 }
 0x5e3   : > { %2551 = vmatprep.subr.bf16.mxu0 %v3615_v36  ;;  %2583 = vmatprep.subr.bf16.mxu1 %v3619_v47 }
 0x5e6   : > { %2553 = vmatpush1.bf16.msra.mxu0 %v3625_v9  ;;  %2585 = vmatpush1.bf16.msra.mxu1 %v3629_v13 }
 0x5e7   : > { %2555 = vmatprep.subr.bf16.mxu0 %v3635_v22  ;;  %2587 = vmatprep.subr.bf16.mxu1 %v3639_v53 }
 0x5ea   : > { %2557 = vmatpush1.bf16.msra.mxu0 %v3645_v30  ;;  %2589 = vmatpush1.bf16.msra.mxu1 %v3649_v34 }
 0x5eb   : > { %2591 = vmatprep.subr.bf16.mxu0 %v3495_v31  ;;  %2623 = vmatprep.subr.bf16.mxu1 %v3499_v32 }
 0x6a0   : > { %v1427_v11 = vpop.f32.mrb[2].mxu0  ;;  %v1498_v16 = vpop.f32.mrb[2].mxu1 }
 0x6a1   : > { %v1429_v18 = vpop.f32.mrb[3].mxu0  ;;  %v1500_v20 = vpop.f32.mrb[3].mxu1 }
 0x6a2   : > { %v1507_v23 = vcombine.low %v1427_v11, %v1429_v18  ;;  %v1508_v27 = vcombine.low %v1498_v16, %v1500_v20 }
 0x6a4   : > { %v1515_v28 = vrot.slane %v1507_v23, %v3691_v29  ;;  %v1522_v40 = vrot.slane %v1508_v27, %v3691_v29 }
 0x6a6   : > { %v1523_v48 = vcombine.low %v1515_v28, %v1522_v40 }
 0x6a8   : > { %v1525_v7 = vadd.f32 %v2125_v43, %v1523_v48  ;;  %v1759_v48 = vld [vmem:[%s3006_s23] sm:$0xff] }
 0x6aa   : > { %v2126_v49 = vmul.f32 -1.442695, %v1525_v7  ;;  %v1533_v51 = vrot.slane %v1525_v7, 2  ;;  %v1544_v31 = vrot.slane %v1525_v7, 6  ;;  %v1541_v1 = vrot.slane %v1525_v7, 4 }
 0x6ac   : > { %2795 = vpow2.f32 %v2126_v49  ;;  %v2127_v15 = vmul.f32 -1.442695, %v1533_v51  ;;  %v2128_v32 = vmul.f32 -1.442695, %v1544_v31 }
 0x6ae   : > { %2797 = vpow2.f32 %v2127_v15 }
 0x6af   : > { %2799 = vpow2.f32 %v2128_v32 }
 0x6b6   : > { %v2796_v59 = vpop.eup %2795 }
 0x6b7   : > { %v1529_v3 = vadd.f32 1.0, %v2796_v59 }
 0x6b8   : > { %v2798_v62 = vpop.eup %2797 }
 0x6b9   : > { %2801 = vrcp.f32 %v1529_v3  ;;  %v1538_v41 = vadd.f32 1.0, %v2798_v62  ;;  %v2800_v63 = vpop.eup %2799 }
 0x6ba   : > { %2803 = vtanh.f32 %v1541_v1  ;;  %v1549_v2 = vadd.f32 1.0, %v2800_v63 }
 0x6bb   : > { %2805 = vrcp.f32 %v1538_v41 }
 0x6bc   : > { %2807 = vrcp.f32 %v1549_v2 }
 0x6c3   : > { %v2802_v42 = vpop.eup %2801 }
 0x6c4   : > { %v2804_v25 = vpop.eup %2803 }
 0x6c5   : > { %v2806_v24 = vpop.eup %2805  ;;  %v1553_v57 = vmul.f32 %v2804_v25, %v2802_v42 }
 0x6c6   : > { %v1552_v55 = vmul.f32 %v2806_v24, %v3696_v56  ;;  %v2808_v38 = vpop.eup %2807 }
 0x6c8   : > { %v3738_v46 = vadd.f32 %v1553_v57, %v1552_v55 }
 0x6ca   : > { %2809 = vtanh.f32 %v3738_v46 }
 0x6d4   : > { %v2810_v10 = vpop.eup %2809 }
 0x6d5   : > { %v1556_v11 = vmul.f32 %v2810_v10, %v2808_v38 }
 0x6d7   : > { %2129 = vst [vmem:[%s3004_s22 + $0x4] sm:$0x3] %v1556_v11  ;;  %1626 = vmatmul.mubr.f32.vlgmr.msra.gmra.mrb[4].mxu0 %v1556_v11  ;;  %1697 = vmatmul.mubr.f32.vlgmr.msra.gmra.mrb[4].mxu1 %v1556_v11 }
 0x6d8   : > { %2593 = vmatpush1.bf16.msra.mxu0 %v3503_v35  ;;  %2625 = vmatpush1.bf16.msra.mxu1 %v3507_v39 }
 0x6d9   : > { %2595 = vmatprep.subr.bf16.mxu0 %v3511_v44  ;;  %2627 = vmatprep.subr.bf16.mxu1 %v3515_v6 }
 0x6da   : > { %1824 = vmatprep.mubr.f32.mxu0 %v2902_v58  ;;  %1895 = vmatprep.mubr.f32.mxu1 %v2902_v58  ;;  %v2130_v58 = vld [vmem:[%s3006_s23 + $0x8] sm:$0xff] }
 0x6dc   : > { %2597 = vmatpush1.bf16.msra.mxu0 %v3523_v5  ;;  %2629 = vmatpush1.bf16.msra.mxu1 %v3527_v8 }
 0x6dd   : > { %2599 = vmatprep.subr.bf16.mxu0 %v3533_v12  ;;  %2631 = vmatprep.subr.bf16.mxu1 %v3537_v52 }
 0x6e0   : > { %2601 = vmatpush1.bf16.msra.mxu0 %v3545_v17  ;;  %2633 = vmatpush1.bf16.msra.mxu1 %v3549_v60 }
 0x6e1   : > { %2603 = vmatprep.subr.bf16.mxu0 %v3555_v4  ;;  %2635 = vmatprep.subr.bf16.mxu1 %v3559_v33 }
 0x6e4   : > { %2605 = vmatpush1.bf16.msra.mxu0 %v3565_v61  ;;  %2637 = vmatpush1.bf16.msra.mxu1 %v3569_v50 }
 0x6e5   : > { %2607 = vmatprep.subr.bf16.mxu0 %v3575_v21  ;;  %2639 = vmatprep.subr.bf16.mxu1 %v3579_v54 }
 0x6e8   : > { %2609 = vmatpush1.bf16.msra.mxu0 %v3585_v0  ;;  %2641 = vmatpush1.bf16.msra.mxu1 %v3589_v37 }
 0x6e9   : > { %2611 = vmatprep.subr.bf16.mxu0 %v3595_v45  ;;  %2643 = vmatprep.subr.bf16.mxu1 %v3599_v14 }
 0x6ec   : > { %2613 = vmatpush1.bf16.msra.mxu0 %v3605_v19  ;;  %2645 = vmatpush1.bf16.msra.mxu1 %v3609_v26 }
 0x6ed   : > { %2615 = vmatprep.subr.bf16.mxu0 %v3615_v36  ;;  %2647 = vmatprep.subr.bf16.mxu1 %v3619_v47 }
 0x6f0   : > { %2617 = vmatpush1.bf16.msra.mxu0 %v3625_v9  ;;  %2649 = vmatpush1.bf16.msra.mxu1 %v3629_v13 }
 0x6f1   : > { %2619 = vmatprep.subr.bf16.mxu0 %v3635_v22  ;;  %2651 = vmatprep.subr.bf16.mxu1 %v3639_v53 }
 0x6f4   : > { %2621 = vmatpush1.bf16.msra.mxu0 %v3645_v30  ;;  %2653 = vmatpush1.bf16.msra.mxu1 %v3649_v34 }
 0x7aa   : > { %v1627_v35 = vpop.f32.mrb[4].mxu0  ;;  %v1698_v39 = vpop.f32.mrb[4].mxu1 }
 0x7ab   : > { %v1629_v44 = vpop.f32.mrb[5].mxu0  ;;  %v1700_v6 = vpop.f32.mrb[5].mxu1 }
 0x7ac   : > { %v1707_v5 = vcombine.low %v1627_v35, %v1629_v44  ;;  %v1708_v8 = vcombine.low %v1698_v39, %v1700_v6 }
 0x7ae   : > { %v1715_v12 = vrot.slane %v1707_v5, %v3691_v29  ;;  %v1722_v52 = vrot.slane %v1708_v8, %v3691_v29 }
 0x7b0   : > { %v1723_v17 = vcombine.low %v1715_v12, %v1722_v52 }
 0x7b2   : > { %v1725_v60 = vadd.f32 %v2130_v58, %v1723_v17 }
 0x7b4   : > { %v2131_v4 = vmul.f32 -1.442695, %v1725_v60  ;;  %v1733_v33 = vrot.slane %v1725_v60, 2  ;;  %v1744_v50 = vrot.slane %v1725_v60, 6  ;;  %v1741_v0 = vrot.slane %v1725_v60, 4 }
 0x7b6   : > { %2811 = vpow2.f32 %v2131_v4  ;;  %v2132_v61 = vmul.f32 -1.442695, %v1733_v33  ;;  %v2133_v21 = vmul.f32 -1.442695, %v1744_v50 }
 0x7b8   : > { %2813 = vpow2.f32 %v2132_v61 }
 0x7b9   : > { %2815 = vpow2.f32 %v2133_v21 }
 0x7c0   : > { %v2812_v54 = vpop.eup %2811 }
 0x7c1   : > { %v1729_v37 = vadd.f32 1.0, %v2812_v54 }
 0x7c2   : > { %v2814_v45 = vpop.eup %2813 }
 0x7c3   : > { %2817 = vrcp.f32 %v1729_v37  ;;  %v1738_v14 = vadd.f32 1.0, %v2814_v45  ;;  %v2816_v19 = vpop.eup %2815 }
 0x7c4   : > { %2819 = vtanh.f32 %v1741_v0  ;;  %v1749_v9 = vadd.f32 1.0, %v2816_v19 }
 0x7c5   : > { %2821 = vrcp.f32 %v1738_v14 }
 0x7c6   : > { %2823 = vrcp.f32 %v1749_v9 }
 0x7cd   : > { %v2818_v26 = vpop.eup %2817 }
 0x7ce   : > { %v2820_v36 = vpop.eup %2819 }
 0x7cf   : > { %v2822_v47 = vpop.eup %2821  ;;  %v1753_v22 = vmul.f32 %v2820_v36, %v2818_v26 }
 0x7d0   : > { %v1752_v13 = vmul.f32 %v2822_v47, %v3738_v46  ;;  %v2824_v30 = vpop.eup %2823 }
 0x7d2   : > { %v1754_v53 = vadd.f32 %v1753_v22, %v1752_v13 }
 0x7d4   : > { %2825 = vtanh.f32 %v1754_v53 }
 0x7de   : > { %v2826_v34 = vpop.eup %2825 }
 0x7df   : > { %v1756_v56 = vmul.f32 %v2826_v34, %v2824_v30 }
 0x7e1   : > { %2134 = vst [vmem:[%s3004_s22 + $0x2] sm:$0x3] %v1756_v56  ;;  %1825 = vmatmul.mubr.f32.vlgmr.msra.gmra.mrb[6].mxu0 %v1756_v56  ;;  %1896 = vmatmul.mubr.f32.vlgmr.msra.gmra.mrb[6].mxu1 %v1756_v56 }
 0x8b4   : > { %v1826_v16 = vpop.f32.mrb[6].mxu0  ;;  %v1897_v18 = vpop.f32.mrb[6].mxu1 }
 0x8b5   : > { %v1828_v20 = vpop.f32.mrb[7].mxu0  ;;  %v1899_v23 = vpop.f32.mrb[7].mxu1 }
 0x8b6   : > { %v1906_v27 = vcombine.low %v1826_v16, %v1828_v20  ;;  %v1907_v28 = vcombine.low %v1897_v18, %v1899_v23 }
 0x8b8   : > { %v1914_v40 = vrot.slane %v1906_v27, %v3691_v29  ;;  %v1921_v43 = vrot.slane %v1907_v28, %v3691_v29 }
 0x8ba   : > { %v1922_v7 = vcombine.low %v1914_v40, %v1921_v43 }
 0x8bc   : > { %v1924_v49 = vadd.f32 %v1922_v7, %v1759_v48 }
 0x8be   : > { %v2135_v51 = vmul.f32 -1.442695, %v1924_v49  ;;  %v1932_v15 = vrot.slane %v1924_v49, 2  ;;  %v1943_v32 = vrot.slane %v1924_v49, 6  ;;  %v1940_v3 = vrot.slane %v1924_v49, 4 }
 0x8c0   : > { %2827 = vpow2.f32 %v2135_v51  ;;  %v2136_v31 = vmul.f32 -1.442695, %v1932_v15  ;;  %v2137_v59 = vmul.f32 -1.442695, %v1943_v32 }
 0x8c2   : > { %2829 = vpow2.f32 %v2136_v31 }
 0x8c3   : > { %2831 = vpow2.f32 %v2137_v59 }
 0x8ca   : > { %v2828_v1 = vpop.eup %2827 }
 0x8cb   : > { %v1928_v62 = vadd.f32 1.0, %v2828_v1 }
 0x8cc   : > { %v2830_v41 = vpop.eup %2829 }
 0x8cd   : > { %2833 = vrcp.f32 %v1928_v62  ;;  %v1937_v63 = vadd.f32 1.0, %v2830_v41  ;;  %v2832_v29 = vpop.eup %2831 }
 0x8ce   : > { %2835 = vtanh.f32 %v1940_v3  ;;  %v1948_v2 = vadd.f32 1.0, %v2832_v29 }
 0x8cf   : > { %2837 = vrcp.f32 %v1937_v63 }
 0x8d0   : > { %2839 = vrcp.f32 %v1948_v2 }
 0x8d7   : > { %v2834_v42 = vpop.eup %2833 }
 0x8d8   : > { %v2836_v25 = vpop.eup %2835 }
 0x8d9   : > { %v2838_v24 = vpop.eup %2837  ;;  %v1952_v57 = vmul.f32 %v2836_v25, %v2834_v42 }
 0x8da   : > { %v1951_v55 = vmul.f32 %v2838_v24, %v1754_v53  ;;  %v2840_v38 = vpop.eup %2839 }
 0x8dc   : > { %v1953_v46 = vadd.f32 %v1952_v57, %v1951_v55 }
 0x8de   : > { %2841 = vtanh.f32 %v1953_v46  ;;  %1958 = vst [vmem:[#allocation3] sm:$0x3] %v1953_v46 }
 0x8e8   : > { %v2842_v10 = vpop.eup %2841 }
 0x8e9   : > { %v1955_v11 = vmul.f32 %v2842_v10, %v2840_v38 }
 0x8eb   : > { %1956 = vst [vmem:[%s3004_s22] sm:$0x3] %v1955_v11  ;;  %1957 = vst [vmem:[#allocation2] sm:$0x3] %v1955_v11 }
 0x8ec PF: > { %s12_s15 = sadd.s32 1, %s2897_s15   ;;  %s3973_s9 = smov %s2877_s10 }
 0x8ed   : > { %p9_p1 = scmp.ge.s32.totalorder %s12_s15, 6   ;;  %s3974_s10 = smov %s2978_s3 }
 0x8ee   : > { %s3975_s11 = smov %s2889_s13  ;;  %s3976_s12 = smov %s2893_s14 }
 0x8ef   : > { %s3977_s13 = smov %s3980_s16  ;;  %s3978_s14 = smov %s3984_s17 }
 0x8f0   :  { %11 = sbr.rel (!%p9_p1) target bundleno = 4 (0x4), region = 128 }

// kernel: crnn_head.9
= control target key start
LH: loop header
LB: loop body
LE: loop exit
PB: predicated region body
PF: predicated region fallthrough
CT: control target
= control target key end

     0   :  { %s596_s0 = inlined_call_operand.vmem [shape: f32[2,16,128], index: 0, kind: input, shape index: {}, may-alias: {0,1}]   ;;  %s597_s1 = inlined_call_operand.vmem [shape: f32[2,16,128], index: 1, kind: input, shape index: {}, may-alias: {0,1}]   ;;  %s598_s2 = inlined_call_operand.vmem [shape: f32[128,16], index: 2, kind: input, shape index: {}]   ;;  %s599_s3 = inlined_call_operand.vmem [shape: f32[128,16], index: 3, kind: input, shape index: {}]   ;;  %s600_s4 = inlined_call_operand.vmem [shape: f32[1,16], index: 4, kind: input, shape index: {}]   ;;  %s601_s5 = inlined_call_operand.hbm [shape: f32[16,16], index: 5, kind: output, shape index: {}]  }
   0x1   :  { %v44_v0 = vld [vmem:[%s599_s3] sm:$0xff]  ;;  %v45_v1 = vld [vmem:[%s599_s3 + $0x8] sm:$0xff]  ;;  %v46_v5 = vld [vmem:[%s599_s3 + $0x10] sm:$0xff] }
   0x2   :  { %v26_v2 = vld [vmem:[%s598_s2] sm:$0xff]  ;;  %v347_v3 = vpack.c.bf16 %v45_v1, %v44_v0  ;;  %v27_v4 = vld [vmem:[%s598_s2 + $0x8] sm:$0xff]  ;;  %v47_v6 = vld [vmem:[%s599_s3 + $0x18] sm:$0xff] }
   0x3   :  { %v379_v7 = vpack.c.bf16 %v27_v4, %v26_v2  ;;  %v351_v8 = vpack.c.bf16 %v47_v6, %v46_v5  ;;  %v28_v9 = vld [vmem:[%s598_s2 + $0x10] sm:$0xff]  ;;  %v29_v10 = vld [vmem:[%s598_s2 + $0x18] sm:$0xff]  ;;  %v48_v11 = vld [vmem:[%s599_s3 + $0x20] sm:$0xff] }
   0x4   :  { %348 = vmatprep.subr.bf16.mxu1 %v347_v3  ;;  %v383_v12 = vpack.c.bf16 %v29_v10, %v28_v9  ;;  %v49_v13 = vld [vmem:[%s599_s3 + $0x28] sm:$0xff]  ;;  %v30_v14 = vld [vmem:[%s598_s2 + $0x20] sm:$0xff]  ;;  %v50_v18 = vld [vmem:[%s599_s3 + $0x30] sm:$0xff] }
   0x5   :  { %v31_v15 = vld [vmem:[%s598_s2 + $0x28] sm:$0xff]  ;;  %380 = vmatprep.subr.bf16.mxu0 %v379_v7  ;;  %350 = vmatpush3.bf16.msra.mxu1 %v347_v3  ;;  %v355_v16 = vpack.c.bf16 %v49_v13, %v48_v11  ;;  %v51_v19 = vld [vmem:[%s599_s3 + $0x38] sm:$0xff]  ;;  %v32_v20 = vld [vmem:[%s598_s2 + $0x30] sm:$0xff] }
   0x6   :  { %382 = vmatpush3.bf16.msra.mxu0 %v379_v7  ;;  %352 = vmatprep.subr.bf16.mxu1 %v351_v8  ;;  %v387_v17 = vpack.c.bf16 %v31_v15, %v30_v14  ;;  %v33_v21 = vld [vmem:[%s598_s2 + $0x38] sm:$0xff]  ;;  %v359_v22 = vpack.c.bf16 %v51_v19, %v50_v18  ;;  %v52_v24 = vld [vmem:[%s599_s3 + $0x40] sm:$0xff]  ;;  %v53_v25 = vld [vmem:[%s599_s3 + $0x48] sm:$0xff] }
   0x7   :  { %384 = vmatprep.subr.bf16.mxu0 %v383_v12  ;;  %v391_v23 = vpack.c.bf16 %v33_v21, %v32_v20  ;;  %v238_v26 = vld [vmem:[%s597_s1 + $0x10] sm:$0xff]  ;;  %v34_v27 = vld [vmem:[%s598_s2 + $0x40] sm:$0xff]  ;;  %v35_v28 = vld [vmem:[%s598_s2 + $0x48] sm:$0xff] }
   0x8   :  { %309 = vmatprep.mubr.f32.mxu1 %v238_v26  ;;  %v24_v29 = vld [vmem:[%s596_s0] sm:$0xff] }
   0x9   :  { %354 = vmatpush3.bf16.msra.mxu1 %v351_v8  ;;  %344 = vmatprep.mubr.f32.mxu0 %v24_v29 }
   0xa   :  { %386 = vmatpush3.bf16.msra.mxu0 %v383_v12  ;;  %356 = vmatprep.subr.bf16.mxu1 %v355_v16 }
   0xb   :  { %388 = vmatprep.subr.bf16.mxu0 %v387_v17 }
   0xd   :  { %358 = vmatpush3.bf16.msra.mxu1 %v355_v16 }
   0xe   :  { %10 = vsyncpa [#allocation3], 0  ;;  %390 = vmatpush3.bf16.msra.mxu0 %v387_v17  ;;  %360 = vmatprep.subr.bf16.mxu1 %v359_v22  ;;  %v363_v30 = vpack.c.bf16 %v53_v25, %v52_v24  ;;  %v395_v31 = vpack.c.bf16 %v35_v28, %v34_v27  ;;  %v54_v32 = vld [vmem:[%s599_s3 + $0x50] sm:$0xff]  ;;  %v55_v33 = vld [vmem:[%s599_s3 + $0x58] sm:$0xff]  ;;  %s440_s15 = smov [#allocation2]   ;;  %vm219_vm0 = vcmask 130048  }
   0xf   :  { %392 = vmatprep.subr.bf16.mxu0 %v391_v23  ;;  %v36_v34 = vld [vmem:[%s598_s2 + $0x50] sm:$0xff]  ;;  %v37_v35 = vld [vmem:[%s598_s2 + $0x58] sm:$0xff]  ;;  %v367_v36 = vpack.c.bf16 %v55_v33, %v54_v32  ;;  %v56_v38 = vld [vmem:[%s599_s3 + $0x60] sm:$0xff]  ;;  %s227_s16 = sshll.u32 %s440_s15, 4  ;;  %s228_s16 = int_to_ptr.vmem [resolvable:$true] %s227_s16 }
  0x10   :  { %v399_v37 = vpack.c.bf16 %v37_v35, %v36_v34  ;;  %v57_v39 = vld [vmem:[%s599_s3 + $0x68] sm:$0xff]  ;;  %v38_v40 = vld [vmem:[%s598_s2 + $0x60] sm:$0xff]  ;;  %v58_v44 = vld [vmem:[%s599_s3 + $0x70] sm:$0xff]  ;;  %p421_p1 = scmp.lt.s32.totalorder %s228_s16, %s228_s16 }
  0x11   :  { %362 = vmatpush3.bf16.msra.mxu1 %v359_v22  ;;  %v39_v41 = vld [vmem:[%s598_s2 + $0x68] sm:$0xff]  ;;  %v371_v42 = vpack.c.bf16 %v57_v39, %v56_v38  ;;  %v59_v45 = vld [vmem:[%s599_s3 + $0x78] sm:$0xff]  ;;  %v40_v46 = vld [vmem:[%s598_s2 + $0x70] sm:$0xff] }
  0x12   :  { %394 = vmatpush3.bf16.msra.mxu0 %v391_v23  ;;  %364 = vmatprep.subr.bf16.mxu1 %v363_v30  ;;  %v403_v43 = vpack.c.bf16 %v39_v41, %v38_v40  ;;  %v41_v47 = vld [vmem:[%s598_s2 + $0x78] sm:$0xff]  ;;  %v375_v48 = vpack.c.bf16 %v59_v45, %v58_v44  ;;  %v25_v51 = vld [vmem:[%s596_s0 + $0x8] sm:$0xff]  ;;  %v240_v54 = vld [vmem:[%s600_s4] ss:$0 sm:$0xff]  ;;  %s416_s0 = scalar_lea.vmem %s228_s16, 256 }
  0x13   :  { %396 = vmatprep.subr.bf16.mxu0 %v395_v31  ;;  %v407_v49 = vpack.c.bf16 %v41_v47, %v40_v46  ;;  %v239_v50 = vld [vmem:[%s597_s1 + $0x18] sm:$0xff]  ;;  %p417_p0 = scmp.ne.s32.totalorder %s228_s16, %s416_s0  ;;  %p422_p2 = scmp.lt.s32.totalorder %s416_s0, %s416_s0 }
  0x15   :  { %366 = vmatpush3.bf16.msra.mxu1 %v363_v30  ;;  %p423_p3 = por %p422_p2, %p421_p1 }
  0x16   :  { %398 = vmatpush3.bf16.msra.mxu0 %v395_v31  ;;  %368 = vmatprep.subr.bf16.mxu1 %v367_v36 }
  0x17   :  { %400 = vmatprep.subr.bf16.mxu0 %v399_v37  ;;  %p424_p4 = pnand %p423_p3, %p417_p0 }
  0x19   :  { %370 = vmatpush3.bf16.msra.mxu1 %v367_v36 }
  0x1a   :  { %402 = vmatpush3.bf16.msra.mxu0 %v399_v37  ;;  %372 = vmatprep.subr.bf16.mxu1 %v371_v42 }
  0x1b   :  { %404 = vmatprep.subr.bf16.mxu0 %v403_v43 }
  0x1d   :  { %374 = vmatpush3.bf16.msra.mxu1 %v371_v42 }
  0x1e   :  { %406 = vmatpush3.bf16.msra.mxu0 %v403_v43  ;;  %376 = vmatprep.subr.bf16.mxu1 %v375_v48 }
  0x1f   :  { %408 = vmatprep.subr.bf16.mxu0 %v407_v49 }
  0x21   :  { %378 = vmatpush3.bf16.msra.mxu1 %v375_v48 }
  0x22   :  { %410 = vmatpush3.bf16.msra.mxu0 %v407_v49 }
  0x24   :  { %310 = vmatmul.mubr.f32.vlgmr.msra.gmra.mrb[0].mxu1 %v239_v50 }
  0x25   :  { %345 = vmatmul.mubr.f32.vlgmr.msra.gmra.mrb[0].mxu0 %v25_v51 }
  0xf7   :  { %v311_v52 = vpop.f32.mrb[0].mxu1 }
  0xf8   :  { %v346_v53 = vpop.f32.mrb[0].mxu0  ;;  %v126_v55 = vpop.f32.mrb[1].mxu1 }
  0xf9   :  { %v207_v56 = vadd.f32 %v346_v53, %v311_v52  ;;  %v201_v57 = vpop.f32.mrb[1].mxu0 }
  0xfa   :  { %v202_v58 = vadd.f32 %v201_v57, %v126_v55 }
  0xfb   :  { %v218_v59 = vadd.f32 %v240_v54, %v207_v56 }
  0xfc   :  { %v217_v60 = vadd.f32 %v240_v54, %v202_v58 }
  0xfd   :  { %221 = vst.msk [vmem:[#allocation2 + $0x8] sm:$0xff] %vm219_vm0, %v218_v59 }
  0xfe   :  { %220 = vst.msk [vmem:[#allocation2] sm:$0xff] %vm219_vm0, %v217_v60 }
  0xff   :  { %427 = shalt.err (!%p424_p4)
}
 0x100   :  { %s428_s17 = scalar_lea.hbm %s601_s5, 256 }
 0x101   :  { %p429_p5 = scmp.ne.s32.totalorder %s601_s5, %s428_s17  ;;  %p432_p6 = scmp.lt.u32.totalorder %s428_s17, %s601_s5 }
 0x103   :  { %p434_p7 = pnand %p432_p6, %p429_p5 }
 0x105   :  { %437 = shalt.err (!%p434_p7)
}
 0x106   :  { %s441_s22 = smov 128   ;;  %s442_s23 = smov 8  }
 0x107   :  { %233 = dma.vmem_to_hbm [thread:$0]  %s228_s16, 256, %s601_s5, [#allocation3], %s441_s22, %s441_s22, %s442_s23  }
 0x108   :  { %438 = dma.done.wait [#allocation3], 256  }
 0x109   :  { %439 = vsyncadd [#allocation3], 4294967040 }
 0x10a   :  { %237 = vsyncpa [#allocation3], 1 }

</bundles_post_ra>
